<compile_context>
chip_gen: v7x
topology: tpu7x:2x2x1
jax: 0.10.0
libtpu: 0.0.40
codegen_flags: <defaults>
</compile_context>

<pallas_src>
import functools
import math

import jax
import jax.numpy as jnp
from jax.experimental import pallas as pl
from jax.experimental.pallas import tpu as pltpu

EPS = 1e-5


# ----------------------------- hardware heuristics -----------------------------
def _hw_config():
    """Return (physical VMEM bytes, MXU systolic depth) with safe fallbacks."""
    kind = ""
    try:
        kind = jax.devices()[0].device_kind.lower()
    except Exception:
        pass
    vmem = None
    try:
        vmem = int(pltpu.get_tpu_info().vmem_capacity_bytes)
    except Exception:
        vmem = None
    if not vmem:
        vmem = (64 if "7" in kind else 128) * 1024 * 1024
    mxu_k = 128 if ("v5" in kind or "v4" in kind or "v3" in kind) else 256
    return vmem, mxu_k


def _pick_tap_group(c_in, mxu_k):
    """How many 3x3 taps to fuse per MXU dot so K = group*Cin ~ MXU depth."""
    return int(min(9, max(1, -(-int(mxu_k) // max(int(c_in), 1)))))


def _largest_divisor_at_most(n, k):
    k = int(max(1, min(n, k)))
    while n % k:
        k -= 1
    return k


def _pick_batch_tile(n, h, w, cin, cout, act_bytes, group, budget_bytes):
    """Largest batch tile whose per-step working set fits the VMEM budget."""
    c = max(cin, cout)
    hw = h * w
    per_sample = (
        (h + 2) * (w + 2) * c * act_bytes          # persistent halo scratch (MXU dtype)
        + 2 * hw * group * c * act_bytes           # live grouped-tap im2col operand(s)
        + 2 * hw * (cin + 2 * cout) * act_bytes    # double-buffered in/out blocks
        + 4 * hw * cout * 4                        # f32 conv accumulators / BN temps
    )
    fixed = 2 * 9 * c * c * act_bytes              # double-buffered conv weights
    return max(1, (int(budget_bytes) - fixed) // max(per_sample, 1))


# ------------------------------ in-kernel helpers ------------------------------
def _zero_halo(pad_ref):
    """Zero the 1-wide padding border of a (bt, H+2, W+2, C) VMEM scratch.

    Done on every grid step (see module NOTE): with "parallel" megacore
    sharding each TensorCore has its own uninitialized scratch, so a
    program_id(0)==0 gate would leave one core's halo full of garbage.
    """
    bt, hp, wp, c = pad_ref.shape
    zrow = jnp.zeros((bt, 1, wp, c), pad_ref.dtype)
    zcol = jnp.zeros((bt, hp, 1, c), pad_ref.dtype)
    pad_ref[:, 0:1, :, :] = zrow
    pad_ref[:, hp - 1:hp, :, :] = zrow
    pad_ref[:, :, 0:1, :] = zcol
    pad_ref[:, :, wp - 1:wp, :] = zcol


def _conv3x3(pad_ref, w_ref, group):
    """3x3 'same' conv of a zero-padded VMEM tile via grouped-tap MXU dots.

    pad_ref: (bt, H+2, W+2, Cin) scratch in the MXU dtype, halo already zeroed.
    w_ref:   (9*Cin, Cout) weights, tap-major (kh, kw, cin), MXU dtype.
    group:   taps fused per dot (group*Cin ~ MXU depth).  group == 9 is full
             im2col; group == 1 is pure per-tap accumulation (no concatenate).
    returns: (bt*H*W, Cout) f32 accumulator.
    """
    bt, hp, wp, cin = pad_ref.shape
    h, w = hp - 2, wp - 2
    m = bt * h * w
    taps = [(kh, kw) for kh in range(3) for kw in range(3)]

    acc = None
    for g0 in range(0, 9, group):
        gtaps = taps[g0:g0 + group]
        if len(gtaps) == 1:
            kh, kw = gtaps[0]
            patch = pad_ref[:, kh:kh + h, kw:kw + w, :].reshape(m, cin)
        else:
            patch = jnp.concatenate(
                [pad_ref[:, kh:kh + h, kw:kw + w, :].reshape(m, cin)
                 for kh, kw in gtaps], axis=-1)
        wslab = w_ref[g0 * cin:(g0 + len(gtaps)) * cin, :]
        part = jnp.dot(patch, wslab, preferred_element_type=jnp.float32)
        acc = part if acc is None else acc + part
    return acc


# ---------------------------------- kernels ----------------------------------
def _stage1_kernel(x_ref, w1_ref, wsc_ref, y1_ref, st_ref, xpad, *, group):
    """conv1 (3x3, proj folded) + shortcut 1x1 conv BN statistics, per tile."""
    bt, h, w, cin = x_ref.shape
    cout = y1_ref.shape[-1]
    m = bt * h * w

    _zero_halo(xpad)
    x = x_ref[...]                                          # (bt,H,W,Cin), MXU dtype
    xpad[:, 1:1 + h, 1:1 + w, :] = x.astype(xpad.dtype)

    y1 = _conv3x3(xpad, w1_ref, group)                      # (M, Cout) f32
    ysc = jnp.dot(x.reshape(m, cin), wsc_ref[...],
                  preferred_element_type=jnp.float32)       # (M, Cout) f32

    # per-tile partial BN statistics (finalized by the wrapper)
    st_ref[0:1, :] = jnp.sum(y1, axis=0, keepdims=True)
    st_ref[1:2, :] = jnp.sum(y1 * y1, axis=0, keepdims=True)
    st_ref[2:3, :] = jnp.sum(ysc, axis=0, keepdims=True)
    st_ref[3:4, :] = jnp.sum(ysc * ysc, axis=0, keepdims=True)

    y1_ref[...] = y1.reshape(bt, h, w, cout).astype(y1_ref.dtype)


def _stage2_kernel(y1_ref, bn1_ref, w2_ref, y2_ref, st_ref, apad, *, group):
    """BN1 (precomputed scale/shift) + ReLU + conv2 (3x3, proj folded)."""
    bt, h, w, c = y1_ref.shape
    m = bt * h * w

    _zero_halo(apad)
    a = y1_ref[...].reshape(m, c).astype(jnp.float32)
    a = jnp.maximum(a * bn1_ref[0:1, :] + bn1_ref[1:2, :], 0.0)   # BN1 + ReLU (f32)
    # single down-cast to the MXU dtype when writing the conv operand
    apad[:, 1:1 + h, 1:1 + w, :] = a.reshape(bt, h, w, c).astype(apad.dtype)

    y2 = _conv3x3(apad, w2_ref, group)                            # (M, C) f32

    st_ref[0:1, :] = jnp.sum(y2, axis=0, keepdims=True)
    st_ref[1:2, :] = jnp.sum(y2 * y2, axis=0, keepdims=True)
    y2_ref[...] = y2.reshape(bt, h, w, c).astype(y2_ref.dtype)


def _stage3_kernel(y2_ref, x_ref, wsc_ref, bn_ref, o_ref):
    """BN2 + shortcut (1x1 conv with BN-scale folded into weights) + add + ReLU.

    bn_ref row 0 = bn2 scale, row 1 = merged bias (bn2 shift + shortcut-BN shift).
    wsc_ref already carries the shortcut-BN scale per output column.
    """
    bt, h, w, cout = o_ref.shape
    cin = x_ref.shape[-1]
    m = bt * h * w

    # Recompute the cheap 1x1 shortcut conv instead of round-tripping it via HBM.
    ysc = jnp.dot(x_ref[...].reshape(m, cin), wsc_ref[...],
                  preferred_element_type=jnp.float32)             # (M, Cout) f32
    y2 = y2_ref[...].reshape(m, cout).astype(jnp.float32)

    out = y2 * bn_ref[0:1, :] + ysc + bn_ref[1:2, :]
    o_ref[...] = jnp.maximum(out, 0.0).reshape(bt, h, w, cout).astype(o_ref.dtype)


# ------------------------------- wrapper -------------------------------
def _bn_scale_shift(s, ss, gamma, beta, count):
    """Training-mode BN (biased variance, eps=1e-5) as per-channel scale/shift."""
    mean = s / count
    var = ss / count - mean * mean
    scale = gamma * jax.lax.rsqrt(var + EPS)
    return scale, beta - mean * scale


def preact_block_proj_forward(x_nchw, task, params, *, mxu_dtype=jnp.bfloat16,
                              out_dtype=None, batch_tile=None,
                              output_layout="NCHW"):
    """Forward pass of PreActBlock_PROJ (stride=1, in_planes != planes path)."""
    if out_dtype is None:
        out_dtype = mxu_dtype
    key = str(int(task[0]))
    proj = params["proj"][key].astype(jnp.float32)

    n, cin, h, w = x_nchw.shape
    cout = params["conv1"].shape[0]
    act_bytes = jnp.dtype(mxu_dtype).itemsize
    out_bytes = jnp.dtype(out_dtype).itemsize
    m_total = n * h * w

    vmem_cap, mxu_k = _hw_config()
    vmem_limit = int(min(max(vmem_cap * 3 // 4, 32 * 1024 * 1024),
                         96 * 1024 * 1024))
    group1 = _pick_tap_group(cin, mxu_k)     # conv1: K base = Cin
    group2 = _pick_tap_group(cout, mxu_k)    # conv2: K base = Cout

    # NCHW -> NHWC (channels on the lane axis), cast once for the MXU + halved DMA.
    # TODO(synk): when chaining blocks keep activations NHWC end-to-end so this
    #             edge transpose (an extra HBM pass) disappears.
    x = jnp.transpose(x_nchw, (0, 2, 3, 1)).astype(mxu_dtype)

    # Fold the per-task feature projection into the conv weights (exact: conv
    # and proj are both linear; BN follows the projection).  3x3 kernels are
    # flattened tap-major (kh, kw, cin) for the grouped-tap dots.
    w1 = jnp.einsum("oihw,od->hwid", params["conv1"].astype(jnp.float32), proj)
    w1 = w1.reshape(9 * cin, cout).astype(mxu_dtype)
    w2 = jnp.einsum("oihw,od->hwid", params["conv2"].astype(jnp.float32), proj)
    w2 = w2.reshape(9 * cout, cout).astype(mxu_dtype)
    wsc_f32 = jnp.einsum("oi,od->id",
                         params["shortcut_conv"][:, :, 0, 0].astype(jnp.float32),
                         proj)

    if batch_tile is None:
        batch_tile = _pick_batch_tile(n, h, w, cin, cout, act_bytes,
                                      max(group1, group2), vmem_cap // 3)
    # Keep >= 2 grid steps when possible: deepens the DMA pipeline and gives
    # both TensorCores work on 2-TC parts (v7x).
    # TODO(synk): add an H-axis tile (halo via manual DMA) plus cdiv/masked
    #             batch tiling so parallelism never collapses for prime/small N.
    bt_cap = n if n == 1 else max(1, n // 2)
    bt = _largest_divisor_at_most(n, min(int(batch_tile), bt_cap))
    nt = n // bt

    cparams = pltpu.CompilerParams(dimension_semantics=("parallel",),
                                   vmem_limit_bytes=vmem_limit)
    tile4 = lambda i: (i, 0, 0, 0)           # batch-tiled 4-D activations
    whole2 = lambda i: (0, 0)                # small VMEM-resident 2-D operands

    # ---------- stage 1: conv1 (+proj) and shortcut-conv BN statistics ----------
    y1, stats1 = pl.pallas_call(
        functools.partial(_stage1_kernel, group=group1),
        grid=(nt,),
        in_specs=[pl.BlockSpec((bt, h, w, cin), tile4),
                  pl.BlockSpec((9 * cin, cout), whole2),
                  pl.BlockSpec((cin, cout), whole2)],
        out_specs=(pl.BlockSpec((bt, h, w, cout), tile4),
                   pl.BlockSpec((None, 4, cout), lambda i: (i, 0, 0))),
        out_shape=(jax.ShapeDtypeStruct((n, h, w, cout), mxu_dtype),
                   jax.ShapeDtypeStruct((nt, 4, cout), jnp.float32)),
        scratch_shapes=[pltpu.VMEM((bt, h + 2, w + 2, cin), mxu_dtype)],
        compiler_params=cparams,
        cost_estimate=pl.CostEstimate(
            flops=2 * m_total * cout * (9 * cin + cin) + 4 * m_total * cout,
            transcendentals=0,
            bytes_accessed=m_total * (cin + cout) * act_bytes
                           + 10 * cin * cout * act_bytes),
    )(x, w1, wsc_f32.astype(mxu_dtype))

    s1 = jnp.sum(stats1, axis=0)                                     # (4, Cout)
    scale1, shift1 = _bn_scale_shift(s1[0], s1[1], params["bn1_gamma"],
                                     params["bn1_beta"], m_total)
    scale_sc, shift_sc = _bn_scale_shift(s1[2], s1[3], params["bnsc_gamma"],
                                         params["bnsc_beta"], m_total)
    bn1_tab = jnp.stack([scale1, shift1]).astype(jnp.float32)        # (2, Cout)

    # ---------- stage 2: BN1 + ReLU + conv2 (+proj) ----------
    y2, stats2 = pl.pallas_call(
        functools.partial(_stage2_kernel, group=group2),
        grid=(nt,),
        in_specs=[pl.BlockSpec((bt, h, w, cout), tile4),
                  pl.BlockSpec((2, cout), whole2),
                  pl.BlockSpec((9 * cout, cout), whole2)],
        out_specs=(pl.BlockSpec((bt, h, w, cout), tile4),
                   pl.BlockSpec((None, 2, cout), lambda i: (i, 0, 0))),
        out_shape=(jax.ShapeDtypeStruct((n, h, w, cout), mxu_dtype),
                   jax.ShapeDtypeStruct((nt, 2, cout), jnp.float32)),
        scratch_shapes=[pltpu.VMEM((bt, h + 2, w + 2, cout), mxu_dtype)],
        compiler_params=cparams,
        cost_estimate=pl.CostEstimate(
            flops=2 * m_total * 9 * cout * cout + 6 * m_total * cout,
            transcendentals=0,
            bytes_accessed=2 * m_total * cout * act_bytes
                           + 9 * cout * cout * act_bytes),
    )(y1, bn1_tab, w2)

    s2 = jnp.sum(stats2, axis=0)                                     # (2, Cout)
    scale2, shift2 = _bn_scale_shift(s2[0], s2[1], params["bn2_gamma"],
                                     params["bn2_beta"], m_total)

    # Fold the shortcut-BN scale into the 1x1 weights and merge the biases:
    #   bn2(y2) + bnsc(x@wsc) == y2*s2 + x@(wsc*ssc) + (b2 + bsc)
    wsc_scaled = (wsc_f32 * scale_sc[None, :]).astype(mxu_dtype)
    bn3_tab = jnp.stack([scale2, shift2 + shift_sc]).astype(jnp.float32)

    # ---------- stage 3: BN2 + shortcut + add + ReLU ----------
    out_nhwc = pl.pallas_call(
        _stage3_kernel,
        grid=(nt,),
        in_specs=[pl.BlockSpec((bt, h, w, cout), tile4),
                  pl.BlockSpec((bt, h, w, cin), tile4),
                  pl.BlockSpec((cin, cout), whole2),
                  pl.BlockSpec((2, cout), whole2)],
        out_specs=pl.BlockSpec((bt, h, w, cout), tile4),
        out_shape=jax.ShapeDtypeStruct((n, h, w, cout), out_dtype),
        compiler_params=cparams,
        cost_estimate=pl.CostEstimate(
            flops=2 * m_total * cin * cout + 5 * m_total * cout,
            transcendentals=0,
            bytes_accessed=m_total * ((cin + cout) * act_bytes
                                      + cout * out_bytes)),
    )(y2, x, wsc_scaled, bn3_tab)

    if output_layout == "NHWC":
        return out_nhwc
    return jnp.transpose(out_nhwc, (0, 3, 1, 2))                     # back to NCHW


# ---------------- deterministic parameter construction (synthetic) ----------------
def _xavier_uniform(key, shape_oihw):
    o, i, kh, kw = shape_oihw
    fan_in, fan_out = i * kh * kw, o * kh * kw
    a = math.sqrt(6.0 / (fan_in + fan_out))
    return jax.random.uniform(key, shape_oihw, jnp.float32, -a, a)


def init_params(key, in_planes, planes):
    k1, k2, k3, k4 = jax.random.split(key, 4)
    return {
        "conv1": _xavier_uniform(k1, (planes, in_planes, 3, 3)),
        "conv2": _xavier_uniform(k2, (planes, planes, 3, 3)),
        "shortcut_conv": _xavier_uniform(k3, (planes, in_planes, 1, 1)),
        # BatchNorm2d defaults: weight=1, bias=0 (training-mode batch stats used)
        "bn1_gamma": jnp.ones((planes,), jnp.float32),
        "bn1_beta": jnp.zeros((planes,), jnp.float32),
        "bn2_gamma": jnp.ones((planes,), jnp.float32),
        "bn2_beta": jnp.zeros((planes,), jnp.float32),
        "bnsc_gamma": jnp.ones((planes,), jnp.float32),
        "bnsc_beta": jnp.zeros((planes,), jnp.float32),
        # the torch module's nn.ParameterDict `proj` is populated externally;
        # synthesize one (planes, planes) projection for task "0".
        "proj": {"0": jax.random.normal(k4, (planes, planes), jnp.float32)
                       / math.sqrt(planes)},
    }


# ---------------- pure-JAX reference (mirrors the PyTorch forward) ----------------
def reference_forward(x, task, p):
    key = str(int(task[0]))
    proj = p["proj"][key]

    def conv(y, wgt, pad):
        return jax.lax.conv_general_dilated(
            y, wgt, (1, 1), pad, dimension_numbers=("NCHW", "OIHW", "NCHW"))

    def fproj(y):
        return jnp.einsum("nchw,cd->ndhw", y, proj)

    def bn(y, g, b):
        mean = y.mean(axis=(0, 2, 3), keepdims=True)
        var = ((y - mean) ** 2).mean(axis=(0, 2, 3), keepdims=True)
        return ((y - mean) / jnp.sqrt(var + EPS)) * g.reshape(1, -1, 1, 1) \
            + b.reshape(1, -1, 1, 1)

    sc = conv(x, p["shortcut_conv"], "VALID")              # 1x1, 'same' == no pad
    sc = bn(fproj(sc), p["bnsc_gamma"], p["bnsc_beta"])
    out = conv(x, p["conv1"], [(1, 1), (1, 1)])
    out = jax.nn.relu(bn(fproj(out), p["bn1_gamma"], p["bn1_beta"]))
    out = conv(out, p["conv2"], [(1, 1), (1, 1)])
    out = bn(fproj(out), p["bn2_gamma"], p["bn2_beta"])
    return jax.nn.relu(out + sc)


if __name__ == "__main__":
    N, in_planes, planes, H, W = 2, 4, 8, 16, 16
    root = jax.random.PRNGKey(0)
    kx, kp = jax.random.split(root)

    x = jax.random.normal(kx, (N, in_planes, H, W), jnp.float32)
    task = [0]                                  # mirrors `task[0]` -> proj key "0"
    params = init_params(kp, in_planes, planes)

    ref = reference_forward(x, task, params)

    # Higher-precision path: f32 operands everywhere; batch_tile=1 forces a
    # 2-step grid and exercises the cross-tile BN-statistics accumulation.
    out_f32 = jax.block_until_ready(
        preact_block_proj_forward(x, task, params,
                                  mxu_dtype=jnp.float32, batch_tile=1))
    assert out_f32.shape == (N, planes, H, W), out_f32.shape
    err32 = float(jnp.max(jnp.abs(out_f32.astype(jnp.float32) - ref)))
    assert err32 < 5e-2, f"f32 path max err {err32}"

    # Performance path (default): bf16 operands into the MXU, f32 accumulate,
    # BN statistics / normalization / ReLU in f32, bf16 writeback.
    out_bf16 = jax.block_until_ready(preact_block_proj_forward(x, task, params))
    assert out_bf16.shape == (N, planes, H, W), out_bf16.shape
    err16 = float(jnp.max(jnp.abs(out_bf16.astype(jnp.float32) - ref)))
    assert err16 < 1.5e-1, f"bf16 path max err {err16}"

    print("KERNEL_OK")
</pallas_src>

<mosaic_0001>
module attributes {stable_mosaic.version = 11 : i64} {
  func.func @_stage1_kernel(%arg0: i32, %arg1: memref<1x16x16x4xf32, #tpu.memory_space<vmem>>, %arg2: memref<36x8xf32, #tpu.memory_space<vmem>>, %arg3: memref<4x8xf32, #tpu.memory_space<vmem>>, %arg4: memref<1x16x16x8xf32, #tpu.memory_space<vmem>>, %arg5: memref<1x4x8xf32, #tpu.memory_space<vmem>>, %arg6: memref<1x18x18x4xf32, #tpu.memory_space<vmem>>) attributes {dimension_semantics = [#tpu.dimension_semantics<parallel>], iteration_bounds = array<i64: 2>, scalar_prefetch = 0 : i64, scratch_operands = 1 : i64, tpu.core_type = #tpu.core_type<tc>, window_params = [{transform_indices = @transform_0, window_bounds = array<i64: 1, 16, 16, 4>}, {pipeline_mode = #tpu.pipeline_mode<synchronous>, transform_indices = @transform_1, window_bounds = array<i64: 36, 8>}, {pipeline_mode = #tpu.pipeline_mode<synchronous>, transform_indices = @transform_2, window_bounds = array<i64: 4, 8>}, {transform_indices = @transform_3, window_bounds = array<i64: 1, 16, 16, 8>}, {transform_indices = @transform_4, window_bounds = array<i64: 1, 4, 8>}]} {
    %cst = arith.constant 0.000000e+00 : f32
    %0 = vector.broadcast %cst : f32 to vector<1x1x18x4xf32>
    %cst_0 = arith.constant 0.000000e+00 : f32
    %1 = vector.broadcast %cst_0 : f32 to vector<1x18x1x4xf32>
    %c0 = arith.constant 0 : index
    %c0_1 = arith.constant 0 : index
    %c0_2 = arith.constant 0 : index
    %c0_3 = arith.constant 0 : index
    %2 = vector.load %arg6[%c0, %c0_1, %c0_2, %c0_3] : memref<1x18x18x4xf32, #tpu.memory_space<vmem>>, vector<1x1x18x4xf32>
    tpu.vector_store %arg6[%c0, %c0_1, %c0_2, %c0_3], %0 {strides = array<i32>} : memref<1x18x18x4xf32, #tpu.memory_space<vmem>>, vector<1x1x18x4xf32>,
    %c0_4 = arith.constant 0 : index
    %c17 = arith.constant 17 : index
    %c0_5 = arith.constant 0 : index
    %c0_6 = arith.constant 0 : index
    %3 = vector.load %arg6[%c0_4, %c17, %c0_5, %c0_6] : memref<1x18x18x4xf32, #tpu.memory_space<vmem>>, vector<1x1x18x4xf32>
    tpu.vector_store %arg6[%c0_4, %c17, %c0_5, %c0_6], %0 {strides = array<i32>} : memref<1x18x18x4xf32, #tpu.memory_space<vmem>>, vector<1x1x18x4xf32>,
    %c0_7 = arith.constant 0 : index
    %c0_8 = arith.constant 0 : index
    %c0_9 = arith.constant 0 : index
    %c0_10 = arith.constant 0 : index
    %4 = vector.load %arg6[%c0_7, %c0_8, %c0_9, %c0_10] : memref<1x18x18x4xf32, #tpu.memory_space<vmem>>, vector<1x18x1x4xf32>
    tpu.vector_store %arg6[%c0_7, %c0_8, %c0_9, %c0_10], %1 {strides = array<i32>} : memref<1x18x18x4xf32, #tpu.memory_space<vmem>>, vector<1x18x1x4xf32>,
    %c0_11 = arith.constant 0 : index
    %c0_12 = arith.constant 0 : index
    %c17_13 = arith.constant 17 : index
    %c0_14 = arith.constant 0 : index
    %5 = vector.load %arg6[%c0_11, %c0_12, %c17_13, %c0_14] : memref<1x18x18x4xf32, #tpu.memory_space<vmem>>, vector<1x18x1x4xf32>
    tpu.vector_store %arg6[%c0_11, %c0_12, %c17_13, %c0_14], %1 {strides = array<i32>} : memref<1x18x18x4xf32, #tpu.memory_space<vmem>>, vector<1x18x1x4xf32>,
    %c0_15 = arith.constant 0 : index
    %c0_16 = arith.constant 0 : index
    %c0_17 = arith.constant 0 : index
    %c0_18 = arith.constant 0 : index
    %6 = vector.load %arg1[%c0_15, %c0_16, %c0_17, %c0_18] : memref<1x16x16x4xf32, #tpu.memory_space<vmem>>, vector<1x16x16x4xf32>
    %c0_19 = arith.constant 0 : index
    %c1 = arith.constant 1 : index
    %c1_20 = arith.constant 1 : index
    %c0_21 = arith.constant 0 : index
    %7 = vector.load %arg6[%c0_19, %c1, %c1_20, %c0_21] : memref<1x18x18x4xf32, #tpu.memory_space<vmem>>, vector<1x16x16x4xf32>
    tpu.vector_store %arg6[%c0_19, %c1, %c1_20, %c0_21], %6 {strides = array<i32>} : memref<1x18x18x4xf32, #tpu.memory_space<vmem>>, vector<1x16x16x4xf32>,
    %c0_22 = arith.constant 0 : index
    %c0_23 = arith.constant 0 : index
    %c0_24 = arith.constant 0 : index
    %c0_25 = arith.constant 0 : index
    %8 = vector.load %arg6[%c0_22, %c0_23, %c0_24, %c0_25] : memref<1x18x18x4xf32, #tpu.memory_space<vmem>>, vector<1x16x16x4xf32>
    %9 = vector.shape_cast %8 : vector<1x16x16x4xf32> to vector<256x4xf32>
    %c0_26 = arith.constant 0 : index
    %c0_27 = arith.constant 0 : index
    %c1_28 = arith.constant 1 : index
    %c0_29 = arith.constant 0 : index
    %10 = vector.load %arg6[%c0_26, %c0_27, %c1_28, %c0_29] : memref<1x18x18x4xf32, #tpu.memory_space<vmem>>, vector<1x16x16x4xf32>
    %11 = vector.shape_cast %10 : vector<1x16x16x4xf32> to vector<256x4xf32>
    %c0_30 = arith.constant 0 : index
    %c0_31 = arith.constant 0 : index
    %c2 = arith.constant 2 : index
    %c0_32 = arith.constant 0 : index
    %12 = vector.load %arg6[%c0_30, %c0_31, %c2, %c0_32] : memref<1x18x18x4xf32, #tpu.memory_space<vmem>>, vector<1x16x16x4xf32>
    %13 = vector.shape_cast %12 : vector<1x16x16x4xf32> to vector<256x4xf32>
    %c0_33 = arith.constant 0 : index
    %c1_34 = arith.constant 1 : index
    %c0_35 = arith.constant 0 : index
    %c0_36 = arith.constant 0 : index
    %14 = vector.load %arg6[%c0_33, %c1_34, %c0_35, %c0_36] : memref<1x18x18x4xf32, #tpu.memory_space<vmem>>, vector<1x16x16x4xf32>
    %15 = vector.shape_cast %14 : vector<1x16x16x4xf32> to vector<256x4xf32>
    %c0_37 = arith.constant 0 : index
    %c1_38 = arith.constant 1 : index
    %c1_39 = arith.constant 1 : index
    %c0_40 = arith.constant 0 : index
    %16 = vector.load %arg6[%c0_37, %c1_38, %c1_39, %c0_40] : memref<1x18x18x4xf32, #tpu.memory_space<vmem>>, vector<1x16x16x4xf32>
    %17 = vector.shape_cast %16 : vector<1x16x16x4xf32> to vector<256x4xf32>
    %c0_41 = arith.constant 0 : index
    %c1_42 = arith.constant 1 : index
    %c2_43 = arith.constant 2 : index
    %c0_44 = arith.constant 0 : index
    %18 = vector.load %arg6[%c0_41, %c1_42, %c2_43, %c0_44] : memref<1x18x18x4xf32, #tpu.memory_space<vmem>>, vector<1x16x16x4xf32>
    %19 = vector.shape_cast %18 : vector<1x16x16x4xf32> to vector<256x4xf32>
    %c0_45 = arith.constant 0 : index
    %c2_46 = arith.constant 2 : index
    %c0_47 = arith.constant 0 : index
    %c0_48 = arith.constant 0 : index
    %20 = vector.load %arg6[%c0_45, %c2_46, %c0_47, %c0_48] : memref<1x18x18x4xf32, #tpu.memory_space<vmem>>, vector<1x16x16x4xf32>
    %21 = vector.shape_cast %20 : vector<1x16x16x4xf32> to vector<256x4xf32>
    %c0_49 = arith.constant 0 : index
    %c2_50 = arith.constant 2 : index
    %c1_51 = arith.constant 1 : index
    %c0_52 = arith.constant 0 : index
    %22 = vector.load %arg6[%c0_49, %c2_50, %c1_51, %c0_52] : memref<1x18x18x4xf32, #tpu.memory_space<vmem>>, vector<1x16x16x4xf32>
    %23 = vector.shape_cast %22 : vector<1x16x16x4xf32> to vector<256x4xf32>
    %c0_53 = arith.constant 0 : index
    %c2_54 = arith.constant 2 : index
    %c2_55 = arith.constant 2 : index
    %c0_56 = arith.constant 0 : index
    %24 = vector.load %arg6[%c0_53, %c2_54, %c2_55, %c0_56] : memref<1x18x18x4xf32, #tpu.memory_space<vmem>>, vector<1x16x16x4xf32>
    %25 = vector.shape_cast %24 : vector<1x16x16x4xf32> to vector<256x4xf32>
    %26 = tpu.concatenate %9, %11, %13, %15, %17, %19, %21, %23, %25 in 1 : vector<256x4xf32>, vector<256x4xf32>, vector<256x4xf32>, vector<256x4xf32>, vector<256x4xf32>, vector<256x4xf32>, vector<256x4xf32>, vector<256x4xf32>, vector<256x4xf32> -> vector<256x36xf32>
    %c0_57 = arith.constant 0 : index
    %c0_58 = arith.constant 0 : index
    %27 = vector.load %arg2[%c0_57, %c0_58] : memref<36x8xf32, #tpu.memory_space<vmem>>, vector<36x8xf32>
    %cst_59 = arith.constant dense<0.000000e+00> : vector<256x8xf32>
    %28 = tpu.matmul %26, %27, %cst_59 {dimension_numbers = #tpu.dot_dimension_numbers<[1], [0], [0], [1], [0, 0, 1, 1], [], []>} : vector<256x36xf32>, vector<36x8xf32>, vector<256x8xf32> -> vector<256x8xf32>
    %29 = vector.shape_cast %6 : vector<1x16x16x4xf32> to vector<256x4xf32>
    %c0_60 = arith.constant 0 : index
    %c0_61 = arith.constant 0 : index
    %30 = vector.load %arg3[%c0_60, %c0_61] : memref<4x8xf32, #tpu.memory_space<vmem>>, vector<4x8xf32>
    %cst_62 = arith.constant dense<0.000000e+00> : vector<256x8xf32>
    %31 = tpu.matmul %29, %30, %cst_62 {dimension_numbers = #tpu.dot_dimension_numbers<[1], [0], [0], [1], [0, 0, 1, 1], [], []>} : vector<256x4xf32>, vector<4x8xf32>, vector<256x8xf32> -> vector<256x8xf32>
    %cst_63 = arith.constant dense<0.000000e+00> : vector<8xf32>
    %32 = vector.multi_reduction <add>, %28, %cst_63 [0] : vector<256x8xf32> to vector<8xf32>
    %33 = vector.shape_cast %32 : vector<8xf32> to vector<1x8xf32>
    %c0_64 = arith.constant 0 : index
    %c0_65 = arith.constant 0 : index
    %c0_66 = arith.constant 0 : index
    %34 = vector.load %arg5[%c0_64, %c0_65, %c0_66] : memref<1x4x8xf32, #tpu.memory_space<vmem>>, vector<1x1x8xf32>
    %35 = vector.shape_cast %34 : vector<1x1x8xf32> to vector<1x8xf32>
    %36 = vector.shape_cast %33 : vector<1x8xf32> to vector<1x1x8xf32>
    tpu.vector_store %arg5[%c0_64, %c0_65, %c0_66], %36 {strides = array<i32>} : memref<1x4x8xf32, #tpu.memory_space<vmem>>, vector<1x1x8xf32>,
    %37 = arith.mulf %28, %28 : vector<256x8xf32>
    %cst_67 = arith.constant dense<0.000000e+00> : vector<8xf32>
    %38 = vector.multi_reduction <add>, %37, %cst_67 [0] : vector<256x8xf32> to vector<8xf32>
    %39 = vector.shape_cast %38 : vector<8xf32> to vector<1x8xf32>
    %c0_68 = arith.constant 0 : index
    %c1_69 = arith.constant 1 : index
    %c0_70 = arith.constant 0 : index
    %40 = vector.load %arg5[%c0_68, %c1_69, %c0_70] : memref<1x4x8xf32, #tpu.memory_space<vmem>>, vector<1x1x8xf32>
    %41 = vector.shape_cast %40 : vector<1x1x8xf32> to vector<1x8xf32>
    %42 = vector.shape_cast %39 : vector<1x8xf32> to vector<1x1x8xf32>
    tpu.vector_store %arg5[%c0_68, %c1_69, %c0_70], %42 {strides = array<i32>} : memref<1x4x8xf32, #tpu.memory_space<vmem>>, vector<1x1x8xf32>,
    %cst_71 = arith.constant dense<0.000000e+00> : vector<8xf32>
    %43 = vector.multi_reduction <add>, %31, %cst_71 [0] : vector<256x8xf32> to vector<8xf32>
    %44 = vector.shape_cast %43 : vector<8xf32> to vector<1x8xf32>
    %c0_72 = arith.constant 0 : index
    %c2_73 = arith.constant 2 : index
    %c0_74 = arith.constant 0 : index
    %45 = vector.load %arg5[%c0_72, %c2_73, %c0_74] : memref<1x4x8xf32, #tpu.memory_space<vmem>>, vector<1x1x8xf32>
    %46 = vector.shape_cast %45 : vector<1x1x8xf32> to vector<1x8xf32>
    %47 = vector.shape_cast %44 : vector<1x8xf32> to vector<1x1x8xf32>
    tpu.vector_store %arg5[%c0_72, %c2_73, %c0_74], %47 {strides = array<i32>} : memref<1x4x8xf32, #tpu.memory_space<vmem>>, vector<1x1x8xf32>,
    %48 = arith.mulf %31, %31 : vector<256x8xf32>
    %cst_75 = arith.constant dense<0.000000e+00> : vector<8xf32>
    %49 = vector.multi_reduction <add>, %48, %cst_75 [0] : vector<256x8xf32> to vector<8xf32>
    %50 = vector.shape_cast %49 : vector<8xf32> to vector<1x8xf32>
    %c0_76 = arith.constant 0 : index
    %c3 = arith.constant 3 : index
    %c0_77 = arith.constant 0 : index
    %51 = vector.load %arg5[%c0_76, %c3, %c0_77] : memref<1x4x8xf32, #tpu.memory_space<vmem>>, vector<1x1x8xf32>
    %52 = vector.shape_cast %51 : vector<1x1x8xf32> to vector<1x8xf32>
    %53 = vector.shape_cast %50 : vector<1x8xf32> to vector<1x1x8xf32>
    tpu.vector_store %arg5[%c0_76, %c3, %c0_77], %53 {strides = array<i32>} : memref<1x4x8xf32, #tpu.memory_space<vmem>>, vector<1x1x8xf32>,
    %54 = vector.shape_cast %28 : vector<256x8xf32> to vector<1x16x16x8xf32>
    %c0_78 = arith.constant 0 : index
    %c0_79 = arith.constant 0 : index
    %c0_80 = arith.constant 0 : index
    %c0_81 = arith.constant 0 : index
    %55 = vector.load %arg4[%c0_78, %c0_79, %c0_80, %c0_81] : memref<1x16x16x8xf32, #tpu.memory_space<vmem>>, vector<1x16x16x8xf32>
    tpu.vector_store %arg4[%c0_78, %c0_79, %c0_80, %c0_81], %54 {strides = array<i32>} : memref<1x16x16x8xf32, #tpu.memory_space<vmem>>, vector<1x16x16x8xf32>,
    return
  }
  func.func @transform_0(%arg0: i32) -> (i32, i32, i32, i32) {
    %c0_i32 = arith.constant 0 : i32
    %c0_i32_0 = arith.constant 0 : i32
    %c0_i32_1 = arith.constant 0 : i32
    %c0_i32_2 = arith.constant 0 : i32
    return %arg0, %c0_i32, %c0_i32_0, %c0_i32_1 : i32, i32, i32, i32
  }
  func.func @transform_1(%arg0: i32) -> (i32, i32) {
    %c0_i32 = arith.constant 0 : i32
    %c0_i32_0 = arith.constant 0 : i32
    %c0_i32_1 = arith.constant 0 : i32
    return %c0_i32, %c0_i32_0 : i32, i32
  }
  func.func @transform_2(%arg0: i32) -> (i32, i32) {
    %c0_i32 = arith.constant 0 : i32
    %c0_i32_0 = arith.constant 0 : i32
    %c0_i32_1 = arith.constant 0 : i32
    return %c0_i32, %c0_i32_0 : i32, i32
  }
  func.func @transform_3(%arg0: i32) -> (i32, i32, i32, i32) {
    %c0_i32 = arith.constant 0 : i32
    %c0_i32_0 = arith.constant 0 : i32
    %c0_i32_1 = arith.constant 0 : i32
    %c0_i32_2 = arith.constant 0 : i32
    return %arg0, %c0_i32, %c0_i32_0, %c0_i32_1 : i32, i32, i32, i32
  }
  func.func @transform_4(%arg0: i32) -> (i32, i32, i32) {
    %c0_i32 = arith.constant 0 : i32
    %c0_i32_0 = arith.constant 0 : i32
    %c0_i32_1 = arith.constant 0 : i32
    return %arg0, %c0_i32, %c0_i32_0 : i32, i32, i32
  }
}

</mosaic_0001>

<bundles_post_ra>
// kernel: tpu_custom_call.1
= control target key start
LH: loop header
LB: loop body
LE: loop exit
PB: predicated region body
PF: predicated region fallthrough
CT: control target
= control target key end

     0   :  { %10 = vsyncpa [#allocation4], 0  ;;  %s5566_s0 = inlined_call_operand.hbm [shape: f32[2,16,16,4], index: 0, kind: input, shape index: {}]   ;;  %s5567_s1 = inlined_call_operand.hbm [shape: f32[36,8], index: 1, kind: input, shape index: {}]   ;;  %s5568_s2 = inlined_call_operand.hbm [shape: f32[4,8], index: 2, kind: input, shape index: {}]   ;;  %s5569_s3 = inlined_call_operand.hbm [shape: f32[2,16,16,8], index: 3, kind: output, shape index: {0}]   ;;  %s5570_s4 = inlined_call_operand.hbm [shape: f32[2,4,8], index: 4, kind: output, shape index: {1}]  }
   0x1   :  { %12 = vsyncpa [#allocation4 + $0x1], 0 }
   0x2   :  { %13 = vsyncpa [#allocation7], 0 }
   0x3   :  { %14 = vsyncpa [#allocation5], 0 }
   0x4   :  { %16 = vsyncpa [#allocation5 + $0x1], 0 }
   0x5   :  { %17 = vsyncpa [#allocation11], 0 }
   0x6   :  { %19 = vsyncpa [#allocation11 + $0x1], 0  ;;  %s3721_s15 = smov 0   ;;  %s3723_s16 = smov 0  }
   0x7   :  { %s3725_s17 = smov 0   ;;  %s3727_s18 = smov 0  }
   0x8 LB: > { %s3742_s19 = sadd.s32 4294967295, %s3677_s18   ;;  %s3130_s20 = sadd.s32 4294967294, %s3677_s18   ;;  %s3677_s18 = sphi %s3727_s18, %s5781_s18   ;;  %s3673_s17 = sphi %s3725_s17, %s5780_s17   ;;  %s3669_s16 = sphi %s3723_s16, %s5779_s16   ;;  %s3665_s15 = sphi %s3721_s15, %s5778_s15  }
   0x9   : > { %p45_p0 = scmp.ne.s32.totalorder %s3669_s16, %s3665_s15  ;;  %p5571_p1 = scmp.eq.s32.totalorder %s3742_s19, 0 }
   0xa   : > { %p117_p3 = scmp.eq.s32.totalorder %s3130_s20, 1  ;;  %p3131_p5 = scmp.ge.s32.totalorder %s3677_s18, 1 }
   0xb   : > { %p3751_p4 = por %p5571_p1, %p45_p0  ;;  %p150_p7 = scmp.lt.s32.totalorder %s3677_s18, 3 }
   0xc   : > { %p3756_p6 = por %p117_p3, %p45_p0  ;;  %s3679_s24 = smov [#allocation6]  }
   0xd   : > { %s5607_s21 = scalar_select %p3751_p4, 1, 0 }
   0xe   : > { %s5608_s22 = scalar_select %p3756_p6, 1, 0 }
   0xf   : > { %p3761_p8 = pnand %p3131_p5, %p150_p7  ;;  %s162_s25 = sshll.u32 %s3679_s24, 4  ;;  %s3765_s25 = int_to_ptr.vmem [resolvable:$true] %s162_s25 }
  0x10   : > { %s3680_s27 = smov [#allocation8]   ;;  %s3489_s5 = scalar_lea.hbm %s5567_s1, 640 }
  0x11   : > { %p3419_p9 = pneg %p3761_p8  ;;  %s176_s28 = sshll.u32 %s3680_s27, 4  ;;  %s3776_s28 = int_to_ptr.vmem [resolvable:$true] %s176_s28 }
  0x12   : > { %p3490_p12 = scmp.ne.s32.totalorder %s5567_s1, %s3489_s5  ;;  %p3496_p5 = scmp.lt.u32.totalorder %s3489_s5, %s5567_s1 }
  0x13   : > { %p3772_p11 = pnand %p3419_p9, %p5571_p1 }
  0x15   : > { %p3491_p13 = pneg %p3772_p11 }
  0x17   : > { %p3492_p0 = pnand %p3491_p13, %p3490_p12 }
  0x19   : > { %p3493_p3 = pneg %p3492_p0 }
  0x1b   : > { %p3498_p7 = pnand %p3496_p5, %p3493_p3 }
  0x1d   : > { %3501 = shalt.err (!%p3498_p7)
}
  0x1e   : > { %s3502_s10 = scalar_lea.vmem %s3765_s25, 640  ;;  %p3510_p2 = scmp.lt.s32.totalorder %s3765_s25, %s3765_s25 }
  0x1f   : > { %p3503_p9 = scmp.ne.s32.totalorder %s3765_s25, %s3502_s10  ;;  %p3511_p12 = scmp.lt.s32.totalorder %s3502_s10, %s3502_s10 }
  0x21   : > { %p3505_p10 = pnand %p3503_p9, %p3491_p13  ;;  %p3512_p0 = por %p3511_p12, %p3510_p2 }
  0x23   : > { %p3506_p1 = pneg %p3505_p10 }
  0x25   : > { %p3513_p6 = pnand %p3512_p0, %p3506_p1 }
  0x27   : > { %3516 = shalt.err (!%p3513_p6)
}
  0x28   : > { %s3681_s11 = smov 128   ;;  %s3682_s12 = smov 8  }
  0x29   : > { %3422 = dma.hbm_to_vmem [thread:$0]  (!%p3772_p11), %s5567_s1, 640, %s3765_s25, [#allocation7], %s3681_s11, %s3681_s11, %s3682_s12  }
  0x2a   : > { %s3517_s27 = scalar_lea.hbm %s5568_s2, 64 }
  0x2b   : > { %p3518_p1 = scmp.ne.s32.totalorder %s5568_s2, %s3517_s27  ;;  %p3524_p10 = scmp.lt.u32.totalorder %s3517_s27, %s5568_s2 }
  0x2d   : > { %p3520_p2 = pnand %p3518_p1, %p3491_p13 }
  0x2f   : > { %p3521_p6 = pneg %p3520_p2 }
  0x31   : > { %p3526_p3 = pnand %p3524_p10, %p3521_p6 }
  0x33   : > { %3529 = shalt.err (!%p3526_p3)
}
  0x34   : > { %s3530_s25 = scalar_lea.vmem %s3776_s28, 64  ;;  %p3538_p12 = scmp.lt.s32.totalorder %s3776_s28, %s3776_s28 }
  0x35   : > { %p3531_p5 = scmp.ne.s32.totalorder %s3776_s28, %s3530_s25  ;;  %p3539_p0 = scmp.lt.s32.totalorder %s3530_s25, %s3530_s25 }
  0x37   : > { %p3533_p7 = pnand %p3531_p5, %p3491_p13  ;;  %p3540_p1 = por %p3539_p0, %p3538_p12 }
  0x39   : > { %p3534_p9 = pneg %p3533_p7 }
  0x3b   : > { %p3541_p2 = pnand %p3540_p1, %p3534_p9 }
  0x3d   : > { %3544 = shalt.err (!%p3541_p2)
}
  0x3e   : > { %3425 = dma.hbm_to_vmem [thread:$0]  (!%p3772_p11), %s5568_s2, 64, %s3776_s28, [#allocation7]  }
  0x3f   : > { %s3834_s9 = sadd.s32 1, %s3677_s18   ;;  %s32_s26 = sadd.s32 1, %s3673_s17 }
  0x40   : > { %s29_s10 = ssub.s32 %s3677_s18, %s3834_s9  ;;  %p39_p13 = scmp.ne.s32.totalorder %s3673_s17, %s3669_s16 }
  0x41   : > { %p30_p6 = scmp.eq.s32.totalorder %s29_s10, 0  ;;  %p40_p10 = scmp.eq.s32.totalorder %s3677_s18, 0 }
  0x42   : > { %p5611_p3 = scmp.eq.s32.totalorder %s3742_s19, 1  ;;  %p3439_p7 = scmp.lt.s32.totalorder %s3677_s18, 2 }
  0x43   : > { %s3850_s14 = scalar_select %p30_p6, %s3673_s17, %s32_s26  }
  0x44   : > { %p3844_p5 = por %p5611_p3, %p39_p13  ;;  %p41_p9 = por %p40_p10, %p39_p13 }
  0x45   : > { %s187_s20 = sand.u32 1, %s3673_s17   ;;  %s3217_s28 = sshll.u32 %s3677_s18, 12 }
  0x46   : > { %s5612_s13 = scalar_select %p3844_p5, 1, 0 }
  0x47   : > { %s3135_s24 = sshll.u32 %s187_s20, 8  ;;  %s3857_s30 = scalar_lea.hbm %s5566_s0, %s3217_s28 }
  0x48   : > { %s191_s5 = scalar_lea.vmem [#allocation3], %s3135_s24  ;;  %p3861_p11 = pnand %p3439_p7, %p41_p9 }
  0x49   : > { %s198_s6 = sshll.u32 %s191_s5, 4  ;;  %s3865_s7 = scalar_lea.sflag [#allocation4], %s187_s20  ;;  %s3859_s6 = int_to_ptr.vmem [resolvable:$true] %s198_s6 }
  0x4a   : > { %s3545_s8 = scalar_lea.hbm %s3857_s30, 4096  ;;  %p3547_p0 = pneg %p3861_p11 }
  0x4b   : > { %p3546_p12 = scmp.ne.s32.totalorder %s3857_s30, %s3545_s8  ;;  %s3550_s24 = scalar_lea.hbm %s5566_s0, 8192 }
  0x4c   : > { %p3551_p13 = scmp.lt.u32.totalorder %s3857_s30, %s5566_s0  ;;  %p3552_p6 = scmp.lt.u32.totalorder %s3550_s24, %s3545_s8 }
  0x4d   : > { %p3548_p1 = pnand %p3547_p0, %p3546_p12  ;;  %p3554_p3 = scmp.lt.u32.totalorder %s3545_s8, %s3857_s30 }
  0x4e   : > { %p3553_p10 = por %p3552_p6, %p3551_p13 }
  0x4f   : > { %p3549_p2 = pneg %p3548_p1 }
  0x50   : > { %p3555_p7 = por %p3554_p3, %p3553_p10 }
  0x52   : > { %p3556_p9 = pnand %p3555_p7, %p3549_p2 }
  0x54   : > { %3559 = shalt.err (!%p3556_p9)
}
  0x55   : > { %s3560_s20 = scalar_lea.vmem %s3859_s6, 4096  ;;  %s3683_s29 = smov [#allocation3]  }
  0x56   : > { %p3561_p12 = scmp.ne.s32.totalorder %s3859_s6, %s3560_s20  ;;  %s3565_s5 = sshll.u32 %s3683_s29, 4  ;;  %s3566_s5 = int_to_ptr.vmem [resolvable:$false] %s3565_s5 }
  0x57   : > { %s3567_s26 = scalar_lea.vmem %s3566_s5, 8192  ;;  %p3568_p4 = scmp.lt.s32.totalorder %s3859_s6, %s3566_s5 }
  0x58   : > { %p3563_p1 = pnand %p3561_p12, %p3547_p0  ;;  %p3569_p13 = scmp.lt.s32.totalorder %s3567_s26, %s3560_s20 }
  0x5a   : > { %p3564_p5 = pneg %p3563_p1  ;;  %p3570_p6 = por %p3569_p13, %p3568_p4 }
  0x5c   : > { %p3571_p10 = pnand %p3570_p6, %p3564_p5 }
  0x5e   : > { %3574 = shalt.err (!%p3571_p10)
}
  0x5f   : > { %3429 = dma.hbm_to_vmem [thread:$0]  (!%p3861_p11), %s3857_s30, 4096, %s3859_s6, %s3865_s7, %s3681_s11, %s3681_s11, %s3682_s12  }
  0x60   : > { %210 = sbr.rel (%p3761_p8) target bundleno = 1023 (0x3ff), region = 32 }
  0x67   : > { %s3899_s8 = sand.u32 1, %s3669_s16   ;;  %p5614_p4 = scmp.ne.s32.totalorder %s5607_s21, 0 }
  0x68   : > { %s3139_s10 = sshll.u32 %s3899_s8, 8  ;;  %s213_s24 = scalar_lea.sflag [#allocation4], %s3899_s8 }
  0x69   : > { %s3905_s25 = scalar_lea.vmem [#allocation3], %s3139_s10 }
  0x6a   : > { %3648 = dma.done.wait (%p5614_p4), %s213_s24, 4096  }
  0x6b   : > { %3650 = vsyncadd (%p5614_p4), %s213_s24, 4294963200  ;;  %p5615_p5 = scmp.eq.s32.totalorder %s3742_s19, 0 }
  0x6d   : > { %3652 = dma.done.wait (%p5615_p5), [#allocation7], 704   ;;  %p5616_p8 = pmov %p5615_p5 }
  0x6e   : > { %vm254_vm0 = vcmask 31744   ;;  %vm257_vm1 = vcmask 25600   ;;  %v3684_v0 = vmov 0.0   ;;  %vm263_vm2 = vcmask 24576   ;;  %v300_v1 = vld [vmem:[%s3905_s25] sm:$0xff]  ;;  %v3957_v2 = vld [vmem:[%s3905_s25 + $0x10] sm:$0xff] }
  0x6f   : > { %3654 = vsyncadd (%p5616_p8), [#allocation7], 4294966592  ;;  %255 = vst.msk [vmem:[#allocation2] sm:$0xff] %vm254_vm0, %v3684_v0  ;;  %v3960_v3 = vld [vmem:[%s3905_s25 + $0x8] sm:$0xff]  ;;  %v3968_v6 = vld [vmem:[%s3905_s25 + $0x20] sm:$0xff]  ;;  %3349 = vmatprep.mubr.msk.f32.mxu1 %vm254_vm0, %v300_v1  ;;  %s3685_s21 = smov 4  }
  0x70   : > { %256 = vst.msk [vmem:[#allocation2 + $0x8] sm:$0xff] %vm254_vm0, %v3684_v0  ;;  %260 = vst.msk [vmem:[#allocation2 + $0x198] sm:$0xff] %vm254_vm0, %v3684_v0  ;;  %v3975_v7 = vld [vmem:[%s3905_s25 + $0x18] sm:$0xff]  ;;  %v3978_v8 = vld [vmem:[%s3905_s25 + $0x30] sm:$0xff]  ;;  %s3686_s23 = smov 8   ;;  %s3687_s11 = smov 12  }
  0x71   : > { %261 = vst.msk [vmem:[#allocation2 + $0x1a0] sm:$0xff] %vm254_vm0, %v3684_v0  ;;  %5617 = vst [vmem:[#allocation16_spill] sm:$0xff] %v3957_v2  ;;  %v3981_v9 = vld [vmem:[%s3905_s25 + $0x28] sm:$0xff]  ;;  %v3990_v10 = vld [vmem:[%s3905_s25 + $0x40] sm:$0xff]  ;;  %s3688_s12 = smov 16   ;;  %s3689_s30 = smov 20  }
  0x72   : > { %258 = vst.msk [vmem:[#allocation2 + $0x10] sm:$0x3] %vm257_vm1, %v3684_v0  ;;  %262 = vst.msk [vmem:[#allocation2 + $0x1a8] sm:$0x3] %vm257_vm1, %v3684_v0  ;;  %v3993_v11 = vld [vmem:[%s3905_s25 + $0x38] sm:$0xff]  ;;  %v3996_v12 = vld [vmem:[%s3905_s25 + $0x50] sm:$0xff] }
  0x73   : > { %282 = vst.msk [vmem:[#allocation2 + $0x11] sm:$0x1] %vm263_vm2, %v3684_v0  ;;  %264 = vst.msk [vmem:[#allocation2] sm:$0x1] %vm263_vm2, %v3684_v0  ;;  %v4005_v13 = vld [vmem:[%s3905_s25 + $0x48] sm:$0xff]  ;;  %v4008_v14 = vld [vmem:[%s3905_s25 + $0x60] sm:$0xff] }
  0x74   : > { %265 = vst.msk [vmem:[#allocation2 + $0x18] sm:$0x1] %vm263_vm2, %v3684_v0  ;;  %266 = vst.msk [vmem:[#allocation2 + $0x30] sm:$0x1] %vm263_vm2, %v3684_v0  ;;  %v4011_v15 = vld [vmem:[%s3905_s25 + $0x58] sm:$0xff]  ;;  %v4020_v16 = vld [vmem:[%s3905_s25 + $0x70] sm:$0xff] }
  0x75   : > { %267 = vst.msk [vmem:[#allocation2 + $0x48] sm:$0x1] %vm263_vm2, %v3684_v0  ;;  %268 = vst.msk [vmem:[#allocation2 + $0x60] sm:$0x1] %vm263_vm2, %v3684_v0  ;;  %v4023_v17 = vld [vmem:[%s3905_s25 + $0x68] sm:$0xff]  ;;  %v4026_v18 = vld [vmem:[%s3905_s25 + $0x80] sm:$0xff] }
  0x76   : > { %269 = vst.msk [vmem:[#allocation2 + $0x78] sm:$0x1] %vm263_vm2, %v3684_v0  ;;  %270 = vst.msk [vmem:[#allocation2 + $0x90] sm:$0x1] %vm263_vm2, %v3684_v0  ;;  %v4036_v19 = vld [vmem:[%s3905_s25 + $0x78] sm:$0xff]  ;;  %v4039_v20 = vld [vmem:[%s3905_s25 + $0x90] sm:$0xff] }
  0x77   : > { %271 = vst.msk [vmem:[#allocation2 + $0xa8] sm:$0x1] %vm263_vm2, %v3684_v0  ;;  %272 = vst.msk [vmem:[#allocation2 + $0xc0] sm:$0x1] %vm263_vm2, %v3684_v0  ;;  %v397_v4 = vld [vmem:[#allocation2 + $0x1] sm:$0xff]  ;;  %v4042_v21 = vld [vmem:[%s3905_s25 + $0x88] sm:$0xff] }
  0x78   : > { %273 = vst.msk [vmem:[#allocation2 + $0xd8] sm:$0x1] %vm263_vm2, %v3684_v0  ;;  %274 = vst.msk [vmem:[#allocation2 + $0xf0] sm:$0x1] %vm263_vm2, %v3684_v0  ;;  %686 = vrot.lane.b32.xlu0 %v397_v4, %s3685_s21  ;;  %v4051_v22 = vld [vmem:[%s3905_s25 + $0xa0] sm:$0xff]  ;;  %v4054_v23 = vld [vmem:[%s3905_s25 + $0x98] sm:$0xff] }
  0x79   : > { %275 = vst.msk [vmem:[#allocation2 + $0x108] sm:$0x1] %vm263_vm2, %v3684_v0  ;;  %276 = vst.msk [vmem:[#allocation2 + $0x120] sm:$0x1] %vm263_vm2, %v3684_v0  ;;  %v398_v5 = vld [vmem:[#allocation2 + $0x9] sm:$0xff]  ;;  %v4057_v24 = vld [vmem:[%s3905_s25 + $0xb0] sm:$0xff] }
  0x7a   : > { %277 = vst.msk [vmem:[#allocation2 + $0x138] sm:$0x1] %vm263_vm2, %v3684_v0  ;;  %278 = vst.msk [vmem:[#allocation2 + $0x150] sm:$0x1] %vm263_vm2, %v3684_v0  ;;  %v4072_v27 = vld [vmem:[%s3905_s25 + $0xa8] sm:$0xff]  ;;  %v4075_v28 = vld [vmem:[%s3905_s25 + $0xc0] sm:$0xff] }
  0x7b   : > { %279 = vst.msk [vmem:[#allocation2 + $0x168] sm:$0x1] %vm263_vm2, %v3684_v0  ;;  %280 = vst.msk [vmem:[#allocation2 + $0x180] sm:$0x1] %vm263_vm2, %v3684_v0  ;;  %v4096_v33 = vld [vmem:[%s3905_s25 + $0xb8] sm:$0xff]  ;;  %v4099_v34 = vld [vmem:[%s3905_s25 + $0xd0] sm:$0xff] }
  0x7c   : > { %281 = vst.msk [vmem:[#allocation2 + $0x198] sm:$0x1] %vm263_vm2, %v3684_v0  ;;  %283 = vst.msk [vmem:[#allocation2 + $0x29] sm:$0x1] %vm263_vm2, %v3684_v0  ;;  %688 = vrot.lane.b32.xlu0 %v398_v5, %s3685_s21  ;;  %v4102_v35 = vld [vmem:[%s3905_s25 + $0xc8] sm:$0xff]  ;;  %v4113_v36 = vld [vmem:[%s3905_s25 + $0xe0] sm:$0xff] }
  0x7d   : > { %284 = vst.msk [vmem:[#allocation2 + $0x41] sm:$0x1] %vm263_vm2, %v3684_v0  ;;  %285 = vst.msk [vmem:[#allocation2 + $0x59] sm:$0x1] %vm263_vm2, %v3684_v0  ;;  %v4122_v38 = vld [vmem:[%s3905_s25 + $0xd8] sm:$0xff]  ;;  %v4125_v39 = vld [vmem:[%s3905_s25 + $0xe8] sm:$0xff] }
  0x7e   : > { %286 = vst.msk [vmem:[#allocation2 + $0x71] sm:$0x1] %vm263_vm2, %v3684_v0  ;;  %287 = vst.msk [vmem:[#allocation2 + $0x89] sm:$0x1] %vm263_vm2, %v3684_v0  ;;  %v429_v62 = vld [vmem:[#allocation2 + $0x2] sm:$0xff]  ;;  %s3690_s6 = smov 24  }
  0x7f   : > { %288 = vst.msk [vmem:[#allocation2 + $0xa1] sm:$0x1] %vm263_vm2, %v3684_v0  ;;  %289 = vst.msk [vmem:[#allocation2 + $0xb9] sm:$0x1] %vm263_vm2, %v3684_v0  ;;  %vm2043_vm3 = vcmask 1043456   ;;  %s3691_s7 = smov 28  }
  0x80   : > { %290 = vst.msk [vmem:[#allocation2 + $0xd1] sm:$0x1] %vm263_vm2, %v3684_v0  ;;  %291 = vst.msk [vmem:[#allocation2 + $0xe9] sm:$0x1] %vm263_vm2, %v3684_v0  ;;  %s3692_s28 = smov 32   ;;  %vm1710_vm4 = vcmask 64512  }
  0x81   : > { %292 = vst.msk [vmem:[#allocation2 + $0x101] sm:$0x1] %vm263_vm2, %v3684_v0  ;;  %293 = vst.msk [vmem:[#allocation2 + $0x119] sm:$0x1] %vm263_vm2, %v3684_v0  ;;  %vm1743_vm5 = vcmask 97280   ;;  %vm1776_vm6 = vcmask 130048  }
  0x82   : > { %294 = vst.msk [vmem:[#allocation2 + $0x131] sm:$0x1] %vm263_vm2, %v3684_v0  ;;  %295 = vst.msk [vmem:[#allocation2 + $0x149] sm:$0x1] %vm263_vm2, %v3684_v0  ;;  %vm1809_vm7 = vcmask 162816   ;;  %vm1842_vm8 = vcmask 195584  }
  0x83   : > { %296 = vst.msk [vmem:[#allocation2 + $0x161] sm:$0x1] %vm263_vm2, %v3684_v0  ;;  %297 = vst.msk [vmem:[#allocation2 + $0x179] sm:$0x1] %vm263_vm2, %v3684_v0  ;;  %vm1875_vm9 = vcmask 228352   ;;  %vm1908_vm10 = vcmask 261120  }
  0x84   : > { %298 = vst.msk [vmem:[#allocation2 + $0x191] sm:$0x1] %vm263_vm2, %v3684_v0  ;;  %299 = vst.msk [vmem:[#allocation2 + $0x1a9] sm:$0x1] %vm263_vm2, %v3684_v0  ;;  %vm1946_vm11 = vcmask 293888   ;;  %s5130_s27 = scalar_lea.vmem [#allocation9], %s3139_s10 }
  0x85   : > { %5618 = vst [vmem:[#allocation17_spill] sm:$0xff] %v3960_v3  ;;  %333 = vst.msk [vmem:[#allocation2 + $0x19] sm:$0xff] %vm254_vm0, %v300_v1  ;;  %v430_v1 = vld [vmem:[#allocation2 + $0xa] sm:$0xff]  ;;  %s3143_s20 = sshll.u32 %s3899_s8, 2  ;;  %vm2666_vm12 = vcmask 57344   ;;  %s3218_s5 = sshll.u32 %s3742_s19, 12 }
  0x86   : > { %335 = vst.msk [vmem:[#allocation2 + $0x31] sm:$0xff] %vm254_vm0, %v3957_v2  ;;  %334 = vst.msk [vmem:[#allocation2 + $0x21] sm:$0xff] %vm254_vm0, %v3960_v3  ;;  %s5425_s29 = scalar_lea.vmem [#allocation10], %s3143_s20  ;;  %s2993_s26 = sshll.u32 %s5130_s27, 4  ;;  %s5478_s26 = int_to_ptr.vmem [resolvable:$true] %s2993_s26 }
  0x87   : > { %5619 = vst [vmem:[#allocation18_spill] sm:$0xff] %v3968_v6  ;;  %337 = vst.msk [vmem:[#allocation2 + $0x49] sm:$0xff] %vm254_vm0, %v3968_v6  ;;  %p5775_p0 = scmp.ne.s32.totalorder %s5612_s13, 0 }
  0x88   : > { %5620 = vst [vmem:[#allocation19_spill] sm:$0xff] %v3975_v7  ;;  %5621 = vst [vmem:[#allocation20_spill] sm:$0xff] %v3978_v8 }
  0x89   : > { %5622 = vst [vmem:[#allocation21_spill] sm:$0xff] %v3981_v9  ;;  %336 = vst.msk [vmem:[#allocation2 + $0x39] sm:$0xff] %vm254_vm0, %v3975_v7 }
  0x8a   : > { %339 = vst.msk [vmem:[#allocation2 + $0x61] sm:$0xff] %vm254_vm0, %v3978_v8  ;;  %338 = vst.msk [vmem:[#allocation2 + $0x51] sm:$0xff] %vm254_vm0, %v3981_v9 }
  0x8b   : > { %5623 = vst [vmem:[#allocation22_spill] sm:$0xff] %v3990_v10  ;;  %5624 = vst [vmem:[#allocation23_spill] sm:$0xff] %v3993_v11 }
  0x8c   : > { %5625 = vst [vmem:[#allocation24_spill] sm:$0xff] %v3996_v12  ;;  %341 = vst.msk [vmem:[#allocation2 + $0x79] sm:$0xff] %vm254_vm0, %v3990_v10  ;;  %v4059_v25 = vld [vmem:[#allocation2 + $0x19] sm:$0xff] }
  0x8d   : > { %340 = vst.msk [vmem:[#allocation2 + $0x69] sm:$0xff] %vm254_vm0, %v3993_v11  ;;  %343 = vst.msk [vmem:[#allocation2 + $0x91] sm:$0xff] %vm254_vm0, %v3996_v12  ;;  %v4061_v26 = vld [vmem:[#allocation2 + $0x31] sm:$0xff]  ;;  %690 = vrot.lane.b32.xlu1 %v4059_v25, %s3685_s21  ;;  %v4079_v29 = vld [vmem:[#allocation2 + $0x21] sm:$0xff] }
  0x8e   : > { %5626 = vst [vmem:[#allocation25_spill] sm:$0xff] %v4005_v13  ;;  %5627 = vst [vmem:[#allocation26_spill] sm:$0xff] %v4008_v14  ;;  %694 = vrot.lane.b32.xlu0 %v4061_v26, %s3685_s21  ;;  %v4085_v30 = vld [vmem:[#allocation2 + $0x49] sm:$0xff]  ;;  %v4177_v0 = vld [vmem:[#allocation2 + $0x1a] sm:$0xff] }
  0x8f   : > { %5628 = vst [vmem:[#allocation27_spill] sm:$0xff] %v4011_v15  ;;  %342 = vst.msk [vmem:[#allocation2 + $0x81] sm:$0xff] %vm254_vm0, %v4005_v13  ;;  %v4187_v5 = vld [vmem:[#allocation2 + $0x22] sm:$0xff] }
  0x90   : > { %345 = vst.msk [vmem:[#allocation2 + $0xa9] sm:$0xff] %vm254_vm0, %v4008_v14  ;;  %344 = vst.msk [vmem:[#allocation2 + $0x99] sm:$0xff] %vm254_vm0, %v4011_v15  ;;  %v4091_v31 = vld [vmem:[#allocation2 + $0x39] sm:$0xff] }
  0x91   : > { %5629 = vst [vmem:[#allocation28_spill] sm:$0xff] %v4020_v16  ;;  %5630 = vst [vmem:[#allocation29_spill] sm:$0xff] %v4023_v17  ;;  %692 = vrot.lane.b32.xlu1 %v4079_v29, %s3685_s21  ;;  %v4093_v32 = vld [vmem:[#allocation2 + $0x61] sm:$0xff]  ;;  %v4117_v37 = vld [vmem:[#allocation2 + $0x51] sm:$0xff] }
  0x92   : > { %5631 = vst [vmem:[#allocation30_spill] sm:$0xff] %v4026_v18  ;;  %347 = vst.msk [vmem:[#allocation2 + $0xc1] sm:$0xff] %vm254_vm0, %v4020_v16  ;;  %698 = vrot.lane.b32.xlu0 %v4085_v30, %s3685_s21  ;;  %v4182_v4 = vld [vmem:[#allocation2 + $0x32] sm:$0xff] }
  0x93   : > { %346 = vst.msk [vmem:[#allocation2 + $0xb1] sm:$0xff] %vm254_vm0, %v4023_v17  ;;  %349 = vst.msk [vmem:[#allocation2 + $0xd9] sm:$0xff] %vm254_vm0, %v4026_v18  ;;  %v4127_v40 = vld [vmem:[#allocation2 + $0x79] sm:$0xff]  ;;  %v4313_v17 = vld [vmem:[#allocation2 + $0x50] sm:$0xff] }
  0x94   : > { %5632 = vst [vmem:[#allocation31_spill] sm:$0xff] %v4036_v19  ;;  %5633 = vst [vmem:[#allocation32_spill] sm:$0xff] %v4039_v20  ;;  %v4137_v41 = vld [vmem:[#allocation2 + $0x69] sm:$0xff]  ;;  %v4139_v42 = vld [vmem:[#allocation2 + $0x91] sm:$0xff] }
  0x95   : > { %5634 = vst [vmem:[#allocation33_spill] sm:$0xff] %v4042_v21  ;;  %348 = vst.msk [vmem:[#allocation2 + $0xc9] sm:$0xff] %vm254_vm0, %v4036_v19  ;;  %696 = vrot.lane.b32.xlu1 %v4091_v31, %s3685_s21  ;;  %v4305_v19 = vld [vmem:[#allocation2 + $0x60] sm:$0xff]  ;;  %v4317_v15 = vld [vmem:[#allocation2 + $0x78] sm:$0xff] }
  0x96   : > { %351 = vst.msk [vmem:[#allocation2 + $0xf1] sm:$0xff] %vm254_vm0, %v4039_v20  ;;  %350 = vst.msk [vmem:[#allocation2 + $0xe1] sm:$0xff] %vm254_vm0, %v4042_v21  ;;  %702 = vrot.lane.b32.xlu0 %v4093_v32, %s3685_s21  ;;  %v4145_v43 = vld [vmem:[#allocation2 + $0x81] sm:$0xff]  ;;  %v4329_v11 = vld [vmem:[#allocation2 + $0x90] sm:$0xff] }
  0x97   : > { %5635 = vst [vmem:[#allocation34_spill] sm:$0xff] %v4051_v22  ;;  %5636 = vst [vmem:[#allocation35_spill] sm:$0xff] %v4054_v23  ;;  %v4147_v44 = vld [vmem:[#allocation2 + $0xa9] sm:$0xff]  ;;  %v4153_v45 = vld [vmem:[#allocation2 + $0x99] sm:$0xff] }
  0x98   : > { %5637 = vst [vmem:[#allocation36_spill] sm:$0xff] %v4057_v24  ;;  %353 = vst.msk [vmem:[#allocation2 + $0x109] sm:$0xff] %vm254_vm0, %v4051_v22  ;;  %v4293_v20 = vld [vmem:[#allocation2 + $0x48] sm:$0xff]  ;;  %v4337_v9 = vld [vmem:[#allocation2 + $0x80] sm:$0xff] }
  0x99   : > { %352 = vst.msk [vmem:[#allocation2 + $0xf9] sm:$0xff] %vm254_vm0, %v4054_v23  ;;  %355 = vst.msk [vmem:[#allocation2 + $0x121] sm:$0xff] %vm254_vm0, %v4057_v24  ;;  %700 = vrot.lane.b32.xlu1 %v4117_v37, %s3685_s21  ;;  %v413_v46 = vld [vmem:[#allocation2 + $0xc1] sm:$0xff]  ;;  %v4349_v2 = vld [vmem:[#allocation2 + $0x98] sm:$0xff] }
  0x9a   : > { %5638 = vst [vmem:[#allocation37_spill] sm:$0xff] %v4072_v27  ;;  %5639 = vst [vmem:[#allocation38_spill] sm:$0xff] %v4075_v28  ;;  %706 = vrot.lane.b32.xlu0 %v4127_v40, %s3685_s21  ;;  %v4158_v47 = vld [vmem:[#allocation2 + $0xb1] sm:$0xff]  ;;  %v415_v48 = vld [vmem:[#allocation2 + $0xd9] sm:$0xff] }
  0x9b   : > { %354 = vst.msk [vmem:[#allocation2 + $0x111] sm:$0xff] %vm254_vm0, %v4072_v27  ;;  %357 = vst.msk [vmem:[#allocation2 + $0x139] sm:$0xff] %vm254_vm0, %v4075_v28  ;;  %v4273_v27 = vld [vmem:[#allocation2 + $0x18] sm:$0xff]  ;;  %v4289_v23 = vld [vmem:[#allocation2 + $0x20] sm:$0xff] }
  0x9c   : > { %5640 = vst [vmem:[#allocation39_spill] sm:$0xff] %v4096_v33  ;;  %5641 = vst [vmem:[#allocation40_spill] sm:$0xff] %v4099_v34  ;;  %v414_v49 = vld [vmem:[#allocation2 + $0xc9] sm:$0xff] }
  0x9d   : > { %5642 = vst [vmem:[#allocation41_spill] sm:$0xff] %v4102_v35  ;;  %356 = vst.msk [vmem:[#allocation2 + $0x129] sm:$0xff] %vm254_vm0, %v4096_v33  ;;  %704 = vrot.lane.b32.xlu1 %v4137_v41, %s3685_s21  ;;  %v417_v50 = vld [vmem:[#allocation2 + $0xf1] sm:$0xff]  ;;  %v416_v51 = vld [vmem:[#allocation2 + $0xe1] sm:$0xff] }
  0x9e   : > { %359 = vst.msk [vmem:[#allocation2 + $0x151] sm:$0xff] %vm254_vm0, %v4099_v34  ;;  %358 = vst.msk [vmem:[#allocation2 + $0x141] sm:$0xff] %vm254_vm0, %v4102_v35  ;;  %710 = vrot.lane.b32.xlu0 %v4139_v42, %s3685_s21  ;;  %v4325_v13 = vld [vmem:[#allocation2 + $0x68] sm:$0xff] }
  0x9f   : > { %5643 = vst [vmem:[#allocation42_spill] sm:$0xff] %v4113_v36  ;;  %361 = vst.msk [vmem:[#allocation2 + $0x169] sm:$0xff] %vm254_vm0, %v4113_v36  ;;  %v419_v52 = vld [vmem:[#allocation2 + $0x109] sm:$0xff] }
  0xa0   : > { %5644 = vst [vmem:[#allocation43_spill] sm:$0xff] %v4122_v38  ;;  %5645 = vst [vmem:[#allocation44_spill] sm:$0xff] %v4125_v39  ;;  %v418_v53 = vld [vmem:[#allocation2 + $0xf9] sm:$0xff]  ;;  %v421_v54 = vld [vmem:[#allocation2 + $0x121] sm:$0xff] }
  0xa1   : > { %360 = vst.msk [vmem:[#allocation2 + $0x159] sm:$0xff] %vm254_vm0, %v4122_v38  ;;  %362 = vst.msk [vmem:[#allocation2 + $0x171] sm:$0xff] %vm254_vm0, %v4125_v39  ;;  %708 = vrot.lane.b32.xlu1 %v4145_v43, %s3685_s21  ;;  %v4341_v7 = vld [vmem:[#allocation2 + $0xa8] sm:$0xff] }
  0xa2   : > { %714 = vrot.lane.b32.xlu0 %v4147_v44, %s3685_s21  ;;  %v420_v55 = vld [vmem:[#allocation2 + $0x111] sm:$0xff]  ;;  %v423_v56 = vld [vmem:[#allocation2 + $0x139] sm:$0xff]  ;;  %5652 = vst [vmem:[#allocation51_spill] sm:$0xff] %v4329_v11  ;;  %5655 = vst [vmem:[#allocation54_spill] sm:$0xff] %v4341_v7 }
  0xa3   : > { %v452_v36 = vld [vmem:[#allocation2 + $0x112] sm:$0xff]  ;;  %5657 = vst [vmem:[#allocation56_spill] sm:$0xff] %v4349_v2 }
  0xa4   : > { %v422_v57 = vld [vmem:[#allocation2 + $0x129] sm:$0xff] }
  0xa5   : > { %712 = vrot.lane.b32.xlu1 %v4153_v45, %s3685_s21  ;;  %v425_v58 = vld [vmem:[#allocation2 + $0x151] sm:$0xff]  ;;  %v424_v59 = vld [vmem:[#allocation2 + $0x141] sm:$0xff] }
  0xa6   : > { %718 = vrot.lane.b32.xlu0 %v413_v46, %s3685_s21  ;;  %v427_v60 = vld [vmem:[#allocation2 + $0x169] sm:$0xff]  ;;  %v455_v38 = vld [vmem:[#allocation2 + $0x13a] sm:$0xff] }
  0xa7   : > { %v4189_v46 = vld [vmem:[#allocation2 + $0x4a] sm:$0xff]  ;;  %v453_v39 = vld [vmem:[#allocation2 + $0x122] sm:$0xff] }
  0xa8   : > { %v426_v61 = vld [vmem:[#allocation2 + $0x159] sm:$0xff]  ;;  %v428_v63 = vld [vmem:[#allocation2 + $0x171] sm:$0xff] }
  0xa9   : > { %716 = vrot.lane.b32.xlu1 %v4158_v47, %s3685_s21  ;;  %v457_v35 = vld [vmem:[#allocation2 + $0x152] sm:$0xff] }
  0xaa   : > { %722 = vrot.lane.b32.xlu0 %v415_v48, %s3685_s21  ;;  %v4195_v48 = vld [vmem:[#allocation2 + $0x3a] sm:$0xff] }
  0xad   : > { %720 = vrot.lane.b32.xlu1 %v414_v49, %s3685_s21  ;;  %v4197_v49 = vld [vmem:[#allocation2 + $0x62] sm:$0xff] }
  0xae   : > { %726 = vrot.lane.b32.xlu0 %v417_v50, %s3685_s21  ;;  %v4203_v50 = vld [vmem:[#allocation2 + $0x52] sm:$0xff] }
  0xb1   : > { %724 = vrot.lane.b32.xlu1 %v416_v51, %s3685_s21  ;;  %v4205_v51 = vld [vmem:[#allocation2 + $0x7a] sm:$0xff] }
  0xb2   : > { %730 = vrot.lane.b32.xlu0 %v419_v52, %s3685_s21  ;;  %v4211_v52 = vld [vmem:[#allocation2 + $0x6a] sm:$0xff] }
  0xb5   : > { %728 = vrot.lane.b32.xlu1 %v418_v53, %s3685_s21  ;;  %v4213_v53 = vld [vmem:[#allocation2 + $0x92] sm:$0xff] }
  0xb6   : > { %734 = vrot.lane.b32.xlu0 %v421_v54, %s3685_s21  ;;  %v4219_v54 = vld [vmem:[#allocation2 + $0x82] sm:$0xff] }
  0xb9   : > { %732 = vrot.lane.b32.xlu1 %v420_v55, %s3685_s21  ;;  %v4221_v55 = vld [vmem:[#allocation2 + $0xaa] sm:$0xff] }
  0xba   : > { %738 = vrot.lane.b32.xlu0 %v423_v56, %s3685_s21  ;;  %v4227_v56 = vld [vmem:[#allocation2 + $0x9a] sm:$0xff] }
  0xbd   : > { %736 = vrot.lane.b32.xlu1 %v422_v57, %s3685_s21  ;;  %v4229_v57 = vld [vmem:[#allocation2 + $0xc2] sm:$0xff] }
  0xbe   : > { %742 = vrot.lane.b32.xlu0 %v425_v58, %s3685_s21  ;;  %v4235_v58 = vld [vmem:[#allocation2 + $0xb2] sm:$0xff] }
  0xc1   : > { %740 = vrot.lane.b32.xlu1 %v424_v59, %s3685_s21  ;;  %v4237_v59 = vld [vmem:[#allocation2 + $0xda] sm:$0xff] }
  0xc2   : > { %746 = vrot.lane.b32.xlu0 %v427_v60, %s3685_s21  ;;  %v4243_v60 = vld [vmem:[#allocation2 + $0xca] sm:$0xff] }
  0xc5   : > { %744 = vrot.lane.b32.xlu1 %v426_v61, %s3685_s21  ;;  %v449_v61 = vld [vmem:[#allocation2 + $0xf2] sm:$0xff] }
  0xc6   : > { %814 = vrot.lane.b32.xlu0 %v429_v62, %s3686_s23  ;;  %v4248_v62 = vld [vmem:[#allocation2 + $0xe2] sm:$0xff] }
  0xc9   : > { %748 = vrot.lane.b32.xlu1 %v428_v63, %s3685_s21  ;;  %v451_v63 = vld [vmem:[#allocation2 + $0x10a] sm:$0xff]  ;;  %s2975_s21 = scalar_lea.sflag [#allocation5], %s3899_s8 }
  0xca   : > { %818 = vrot.lane.b32.xlu0 %v4177_v0, %s3686_s23 }
  0xcd   : > { %816 = vrot.lane.b32.xlu1 %v430_v1, %s3686_s23  ;;  %v450_v1 = vld [vmem:[#allocation2 + $0xfa] sm:$0xff] }
  0xce   : > { %822 = vrot.lane.b32.xlu0 %v4182_v4, %s3686_s23 }
  0xd1   : > { %820 = vrot.lane.b32.xlu1 %v4187_v5, %s3686_s23 }
  0xd2   : > { %826 = vrot.lane.b32.xlu0 %v4189_v46, %s3686_s23 }
  0xd5   : > { %824 = vrot.lane.b32.xlu1 %v4195_v48, %s3686_s23 }
  0xd6   : > { %830 = vrot.lane.b32.xlu0 %v4197_v49, %s3686_s23 }
  0xd9   : > { %828 = vrot.lane.b32.xlu1 %v4203_v50, %s3686_s23 }
  0xda   : > { %834 = vrot.lane.b32.xlu0 %v4205_v51, %s3686_s23 }
  0xdd   : > { %832 = vrot.lane.b32.xlu1 %v4211_v52, %s3686_s23 }
  0xde   : > { %838 = vrot.lane.b32.xlu0 %v4213_v53, %s3686_s23 }
  0xe1   : > { %836 = vrot.lane.b32.xlu1 %v4219_v54, %s3686_s23 }
  0xe2   : > { %842 = vrot.lane.b32.xlu0 %v4221_v55, %s3686_s23 }
  0xe5   : > { %840 = vrot.lane.b32.xlu1 %v4227_v56, %s3686_s23 }
  0xe6   : > { %846 = vrot.lane.b32.xlu0 %v4229_v57, %s3686_s23 }
  0xe9   : > { %844 = vrot.lane.b32.xlu1 %v4235_v58, %s3686_s23 }
  0xea   : > { %850 = vrot.lane.b32.xlu0 %v4237_v59, %s3686_s23  ;;  %v4255_v34 = vpop.permute.xlu0 %686 }
  0xed   : > { %848 = vrot.lane.b32.xlu1 %v4243_v60, %s3686_s23 }
  0xee   : > { %854 = vrot.lane.b32.xlu0 %v449_v61, %s3686_s23  ;;  %v454_v61 = vld [vmem:[#allocation2 + $0x12a] sm:$0xff]  ;;  %v4259_v28 = vpop.permute.xlu0 %688 }
  0xf1   : > { %852 = vrot.lane.b32.xlu1 %v4248_v62, %s3686_s23 }
  0xf2   : > { %858 = vrot.lane.b32.xlu0 %v451_v63, %s3686_s23  ;;  %v456_v63 = vld [vmem:[#allocation2 + $0x142] sm:$0xff] }
  0xf5   : > { %856 = vrot.lane.b32.xlu1 %v450_v1, %s3686_s23 }
  0xf6   : > { %862 = vrot.lane.b32.xlu0 %v453_v39, %s3686_s23  ;;  %v459_v39 = vld [vmem:[#allocation2 + $0x16a] sm:$0xff] }
  0xf9   : > { %860 = vrot.lane.b32.xlu1 %v452_v36, %s3686_s23  ;;  %v458_v36 = vld [vmem:[#allocation2 + $0x15a] sm:$0xff] }
  0xfa   : > { %866 = vrot.lane.b32.xlu0 %v455_v38, %s3686_s23 }
  0xfd   : > { %864 = vrot.lane.b32.xlu1 %v454_v61, %s3686_s23 }
  0xfe   : > { %870 = vrot.lane.b32.xlu0 %v457_v35, %s3686_s23  ;;  %v460_v35 = vld [vmem:[#allocation2 + $0x172] sm:$0xff] }
  0xff   : > { %v4263_v1 = vpop.permute.xlu1 %690 }
 0x100   : > { %v4265_v33 = vpop.permute.xlu0 %694 }
 0x101   : > { %868 = vrot.lane.b32.xlu1 %v456_v63, %s3686_s23  ;;  %v4282_v63 = vld [vmem:[#allocation2 + $0x30] sm:$0xff] }
 0x102   : > { %874 = vrot.lane.b32.xlu0 %v459_v39, %s3686_s23 }
 0x103   : > { %v4269_v38 = vpop.permute.xlu1 %692 }
 0x104   : > { %v4271_v24 = vpop.permute.xlu0 %698 }
 0x105   : > { %872 = vrot.lane.b32.xlu1 %v458_v36, %s3686_s23 }
 0x106   : > { %942 = vrot.lane.b32.xlu0 %v4273_v27, %s3687_s11 }
 0x107   : > { %v4278_v61 = vpop.permute.xlu1 %696 }
 0x108   : > { %v4280_v22 = vpop.permute.xlu0 %702 }
 0x109   : > { %876 = vrot.lane.b32.xlu1 %v460_v35, %s3686_s23  ;;  %v4301_v35 = vld [vmem:[#allocation2 + $0x38] sm:$0xff] }
 0x10a   : > { %946 = vrot.lane.b32.xlu0 %v4282_v63, %s3687_s11 }
 0x10b   : > { %v4287_v39 = vpop.permute.xlu1 %700 }
 0x10c   : > { %v4291_v36 = vpop.permute.xlu0 %706 }
 0x10d   : > { %5646 = vst [vmem:[#allocation45_spill] sm:$0xff] %v4291_v36  ;;  %944 = vrot.lane.b32.xlu1 %v4289_v23, %s3687_s11 }
 0x10e   : > { %950 = vrot.lane.b32.xlu0 %v4293_v20, %s3687_s11 }
 0x10f   : > { %v4299_v21 = vpop.permute.xlu1 %704 }
 0x110   : > { %v4303_v18 = vpop.permute.xlu0 %710 }
 0x111   : > { %5647 = vst [vmem:[#allocation46_spill] sm:$0xff] %v4303_v18  ;;  %948 = vrot.lane.b32.xlu1 %v4301_v35, %s3687_s11  ;;  %v4359_v18 = vld [vmem:[#allocation2 + $0xb0] sm:$0xff] }
 0x112   : > { %954 = vrot.lane.b32.xlu0 %v4305_v19, %s3687_s11  ;;  %5660 = vst [vmem:[#allocation59_spill] sm:$0xff] %v4359_v18 }
 0x113   : > { %v4311_v16 = vpop.permute.xlu1 %708 }
 0x114   : > { %5648 = vst [vmem:[#allocation47_spill] sm:$0xff] %v4311_v16  ;;  %v4315_v14 = vpop.permute.xlu0 %714 }
 0x115   : > { %5649 = vst [vmem:[#allocation48_spill] sm:$0xff] %v4315_v14  ;;  %952 = vrot.lane.b32.xlu1 %v4313_v17, %s3687_s11  ;;  %v1942_v14 = vld [vmem:[#allocation6 + $0x8] sm:$0xff] }
 0x116   : > { %958 = vrot.lane.b32.xlu0 %v4317_v15, %s3687_s11 }
 0x117   : > { %v4323_v12 = vpop.permute.xlu1 %712 }
 0x118   : > { %5650 = vst [vmem:[#allocation49_spill] sm:$0xff] %v4323_v12  ;;  %v4327_v10 = vpop.permute.xlu0 %718 }
 0x119   : > { %5651 = vst [vmem:[#allocation50_spill] sm:$0xff] %v4327_v10  ;;  %956 = vrot.lane.b32.xlu1 %v4325_v13, %s3687_s11 }
 0x11a   : > { %962 = vrot.lane.b32.xlu0 %v4329_v11, %s3687_s11 }
 0x11b   : > { %v4335_v8 = vpop.permute.xlu1 %716 }
 0x11c   : > { %5653 = vst [vmem:[#allocation52_spill] sm:$0xff] %v4335_v8  ;;  %v4339_v6 = vpop.permute.xlu0 %722  ;;  %v1941_v8 = vld [vmem:[#allocation6] sm:$0xff] }
 0x11d   : > { %5654 = vst [vmem:[#allocation53_spill] sm:$0xff] %v4339_v6  ;;  %960 = vrot.lane.b32.xlu1 %v4337_v9, %s3687_s11  ;;  %v3397_v6 = vpack.c.bf16 %v1942_v14, %v1941_v8  ;;  %v1945_v14 = vld [vmem:[#allocation6 + $0x20] sm:$0xf] }
 0x11e   : > { %966 = vrot.lane.b32.xlu0 %v4341_v7, %s3687_s11 }
 0x11f   : > { %v4347_v10 = vpop.permute.xlu1 %720  ;;  %3398 = vmatprep.subr.bf16.mxu0 %v3397_v6 }
 0x120   : > { %5656 = vst [vmem:[#allocation55_spill] sm:$0xff] %v4347_v10  ;;  %v4351_v3 = vpop.permute.xlu0 %726  ;;  %3400 = vmatpush3.bf16.msra.mxu0 %v3397_v6  ;;  %v1944_v10 = vld [vmem:[#allocation6 + $0x18] sm:$0xff] }
 0x121   : > { %5658 = vst [vmem:[#allocation57_spill] sm:$0xff] %v4351_v3  ;;  %964 = vrot.lane.b32.xlu1 %v4349_v2, %s3687_s11  ;;  %v1943_v3 = vld [vmem:[#allocation6 + $0x10] sm:$0xff] }
 0x122   : > { %1070 = vrot.lane.b32.xlu0 %v4059_v25, %s3688_s12  ;;  %v3401_v36 = vpack.c.bf16 %v1944_v10, %v1943_v3 }
 0x123   : > { %v4357_v12 = vpop.permute.xlu1 %724 }
 0x124   : > { %5659 = vst [vmem:[#allocation58_spill] sm:$0xff] %v4357_v12  ;;  %v4361_v16 = vpop.permute.xlu0 %730  ;;  %3402 = vmatprep.subr.bf16.mxu0 %v3401_v36 }
 0x125   : > { %5661 = vst [vmem:[#allocation60_spill] sm:$0xff] %v4361_v16  ;;  %968 = vrot.lane.b32.xlu1 %v4359_v18, %s3687_s11  ;;  %3404 = vmatpush3.bf16.msra.mxu0 %v3401_v36 }
 0x126   : > { %1198 = vrot.lane.b32.xlu0 %v4177_v0, %s3689_s30  ;;  %3297 = vmatprep.subr.msk.mxu0 %vm2043_vm3, %v1945_v14 }
 0x127   : > { %v4367_v25 = vpop.permute.xlu1 %728 }
 0x128   : > { %5662 = vst [vmem:[#allocation61_spill] sm:$0xff] %v4367_v25  ;;  %v4369_v8 = vpop.permute.xlu0 %734 }
 0x129   : > { %5663 = vst [vmem:[#allocation62_spill] sm:$0xff] %v4369_v8  ;;  %1072 = vrot.lane.b32.xlu1 %v4079_v29, %s3688_s12  ;;  %3298 = vmatpush3.msk.msra.mxu0 %vm2043_vm3, %v1945_v14 }
 0x12a   : > { %1326 = vrot.lane.b32.xlu0 %v4282_v63, %s3690_s6 }
 0x12b   : > { %v4375_v6 = vpop.permute.xlu1 %732 }
 0x12c   : > { %5664 = vst [vmem:[#allocation63_spill] sm:$0xff] %v4375_v6  ;;  %v4377_v16 = vpop.permute.xlu0 %738 }
 0x12d   : > { %5665 = vst [vmem:[#allocation64_spill] sm:$0xff] %v4377_v16  ;;  %1200 = vrot.lane.b32.xlu1 %v4187_v5, %s3689_s30 }
 0x12e   : > { %1454 = vrot.lane.b32.xlu0 %v4061_v26, %s3691_s7 }
 0x12f   : > { %v4385_v3 = vpop.permute.xlu1 %736 }
 0x130   : > { %5666 = vst [vmem:[#allocation65_spill] sm:$0xff] %v4385_v3  ;;  %v4387_v10 = vpop.permute.xlu0 %742 }
 0x131   : > { %5667 = vst [vmem:[#allocation66_spill] sm:$0xff] %v4387_v10  ;;  %1328 = vrot.lane.b32.xlu1 %v4301_v35, %s3690_s6 }
 0x132   : > { %1456 = vrot.lane.b32.xlu0 %v4091_v31, %s3691_s7 }
 0x133   : > { %v4393_v29 = vpop.permute.xlu1 %740 }
 0x134   : > { %5668 = vst [vmem:[#allocation67_spill] sm:$0xff] %v4393_v29  ;;  %v4395_v0 = vpop.permute.xlu0 %746 }
 0x135   : > { %5669 = vst [vmem:[#allocation68_spill] sm:$0xff] %v4395_v0  ;;  %1074 = vrot.lane.b32.xlu1 %v4061_v26, %s3688_s12 }
 0x136   : > { %1076 = vrot.lane.b32.xlu0 %v4091_v31, %s3688_s12 }
 0x137   : > { %v4401_v5 = vpop.permute.xlu1 %744 }
 0x138   : > { %5670 = vst [vmem:[#allocation69_spill] sm:$0xff] %v4401_v5  ;;  %v4403_v36 = vpop.permute.xlu0 %814 }
 0x139   : > { %1582 = vrot.lane.b32.xlu1 %v4182_v4, %s3692_s28 }
 0x13a   : > { %1584 = vrot.lane.b32.xlu0 %v4195_v48, %s3692_s28 }
 0x13b   : > { %v4409_v14 = vpop.permute.xlu1 %748 }
 0x13c   : > { %5671 = vst [vmem:[#allocation70_spill] sm:$0xff] %v4409_v14  ;;  %v4411_v0 = vpop.permute.xlu0 %818 }
 0x13d   : > { %1202 = vrot.lane.b32.xlu1 %v4182_v4, %s3689_s30 }
 0x13e   : > { %1330 = vrot.lane.b32.xlu0 %v4293_v20, %s3690_s6 }
 0x13f   : > { %v4417_v26 = vpop.permute.xlu1 %816 }
 0x140   : > { %v4419_v31 = vpop.permute.xlu0 %822 }
 0x141   : > { %1204 = vrot.lane.b32.xlu1 %v4195_v48, %s3689_s30 }
 0x142   : > { %1458 = vrot.lane.b32.xlu0 %v4085_v30, %s3691_s7 }
 0x143   : > { %v4425_v5 = vpop.permute.xlu1 %820 }
 0x144   : > { %v4427_v14 = vpop.permute.xlu0 %826 }
 0x145   : > { %1332 = vrot.lane.b32.xlu1 %v4313_v17, %s3690_s6 }
 0x146   : > { %1460 = vrot.lane.b32.xlu0 %v4117_v37, %s3691_s7 }
 0x147   : > { %v4433_v4 = vpop.permute.xlu1 %824 }
 0x148   : > { %v4435_v10 = vpop.permute.xlu0 %830 }
 0x149   : > { %1078 = vrot.lane.b32.xlu1 %v4085_v30, %s3688_s12 }
 0x14a   : > { %1080 = vrot.lane.b32.xlu0 %v4117_v37, %s3688_s12 }
 0x14b   : > { %v4441_v48 = vpop.permute.xlu1 %828 }
 0x14c   : > { %v4443_v29 = vpop.permute.xlu0 %834 }
 0x14d   : > { %1586 = vrot.lane.b32.xlu1 %v4189_v46, %s3692_s28 }
 0x14e   : > { %1588 = vrot.lane.b32.xlu0 %v4203_v50, %s3692_s28 }
 0x14f   : > { %v4449_v16 = vpop.permute.xlu1 %832 }
 0x150   : > { %v4451_v3 = vpop.permute.xlu0 %838 }
 0x151   : > { %5672 = vst [vmem:[#allocation71_spill] sm:$0xff] %v4451_v3  ;;  %1206 = vrot.lane.b32.xlu1 %v4189_v46, %s3689_s30 }
 0x152   : > { %1334 = vrot.lane.b32.xlu0 %v4305_v19, %s3690_s6 }
 0x153   : > { %v4457_v30 = vpop.permute.xlu1 %836 }
 0x154   : > { %v4459_v37 = vpop.permute.xlu0 %842 }
 0x155   : > { %5673 = vst [vmem:[#allocation72_spill] sm:$0xff] %v4459_v37  ;;  %1208 = vrot.lane.b32.xlu1 %v4203_v50, %s3689_s30 }
 0x156   : > { %1462 = vrot.lane.b32.xlu0 %v4093_v32, %s3691_s7 }
 0x157   : > { %v4465_v8 = vpop.permute.xlu1 %840 }
 0x158   : > { %5674 = vst [vmem:[#allocation73_spill] sm:$0xff] %v4465_v8  ;;  %v4467_v6 = vpop.permute.xlu0 %846  ;;  %v4596_v8 = vld [vmem:[#allocation2 + $0xc0] sm:$0xff] }
 0x159   : > { %5675 = vst [vmem:[#allocation74_spill] sm:$0xff] %v4467_v6  ;;  %1336 = vrot.lane.b32.xlu1 %v4325_v13, %s3690_s6 }
 0x15a   : > { %1464 = vrot.lane.b32.xlu0 %v4137_v41, %s3691_s7 }
 0x15b   : > { %v4473_v46 = vpop.permute.xlu1 %844 }
 0x15c   : > { %5676 = vst [vmem:[#allocation75_spill] sm:$0xff] %v4473_v46  ;;  %v4475_v25 = vpop.permute.xlu0 %850 }
 0x15d   : > { %5677 = vst [vmem:[#allocation76_spill] sm:$0xff] %v4475_v25  ;;  %1082 = vrot.lane.b32.xlu1 %v4093_v32, %s3688_s12 }
 0x15e   : > { %1084 = vrot.lane.b32.xlu0 %v4137_v41, %s3688_s12 }
 0x15f   : > { %v4481_v50 = vpop.permute.xlu1 %848 }
 0x160   : > { %5678 = vst [vmem:[#allocation77_spill] sm:$0xff] %v4481_v50  ;;  %v4483_v12 = vpop.permute.xlu0 %854 }
 0x161   : > { %5679 = vst [vmem:[#allocation78_spill] sm:$0xff] %v4483_v12  ;;  %1590 = vrot.lane.b32.xlu1 %v4197_v49, %s3692_s28 }
 0x162   : > { %1592 = vrot.lane.b32.xlu0 %v4211_v52, %s3692_s28 }
 0x163   : > { %v4489_v6 = vpop.permute.xlu1 %852 }
 0x164   : > { %5680 = vst [vmem:[#allocation79_spill] sm:$0xff] %v4489_v6  ;;  %v4491_v46 = vpop.permute.xlu0 %858 }
 0x165   : > { %5681 = vst [vmem:[#allocation80_spill] sm:$0xff] %v4491_v46  ;;  %1210 = vrot.lane.b32.xlu1 %v4197_v49, %s3689_s30 }
 0x166   : > { %1338 = vrot.lane.b32.xlu0 %v4317_v15, %s3690_s6 }
 0x167   : > { %v4497_v32 = vpop.permute.xlu1 %856 }
 0x168   : > { %5682 = vst [vmem:[#allocation81_spill] sm:$0xff] %v4497_v32  ;;  %v4499_v41 = vpop.permute.xlu0 %862 }
 0x169   : > { %5683 = vst [vmem:[#allocation82_spill] sm:$0xff] %v4499_v41  ;;  %1212 = vrot.lane.b32.xlu1 %v4211_v52, %s3689_s30 }
 0x16a   : > { %1466 = vrot.lane.b32.xlu0 %v4127_v40, %s3691_s7 }
 0x16b   : > { %v4505_v12 = vpop.permute.xlu1 %860 }
 0x16c   : > { %5684 = vst [vmem:[#allocation83_spill] sm:$0xff] %v4505_v12  ;;  %v4507_v6 = vpop.permute.xlu0 %866 }
 0x16d   : > { %5685 = vst [vmem:[#allocation84_spill] sm:$0xff] %v4507_v6  ;;  %1340 = vrot.lane.b32.xlu1 %v4337_v9, %s3690_s6 }
 0x16e   : > { %1468 = vrot.lane.b32.xlu0 %v4145_v43, %s3691_s7 }
 0x16f   : > { %v4513_v49 = vpop.permute.xlu1 %864 }
 0x170   : > { %5686 = vst [vmem:[#allocation85_spill] sm:$0xff] %v4513_v49  ;;  %v4515_v46 = vpop.permute.xlu0 %870 }
 0x171   : > { %5687 = vst [vmem:[#allocation86_spill] sm:$0xff] %v4515_v46  ;;  %1086 = vrot.lane.b32.xlu1 %v4127_v40, %s3688_s12 }
 0x172   : > { %1088 = vrot.lane.b32.xlu0 %v4145_v43, %s3688_s12 }
 0x173   : > { %v4521_v52 = vpop.permute.xlu1 %868 }
 0x174   : > { %5688 = vst [vmem:[#allocation87_spill] sm:$0xff] %v4521_v52  ;;  %v4523_v41 = vpop.permute.xlu0 %874 }
 0x175   : > { %5689 = vst [vmem:[#allocation88_spill] sm:$0xff] %v4523_v41  ;;  %1594 = vrot.lane.b32.xlu1 %v4205_v51, %s3692_s28 }
 0x176   : > { %1596 = vrot.lane.b32.xlu0 %v4219_v54, %s3692_s28 }
 0x177   : > { %v4529_v6 = vpop.permute.xlu1 %872 }
 0x178   : > { %5690 = vst [vmem:[#allocation89_spill] sm:$0xff] %v4529_v6  ;;  %v943_v49 = vpop.permute.xlu0 %942 }
 0x179   : > { %1214 = vrot.lane.b32.xlu1 %v4205_v51, %s3689_s30 }
 0x17a   : > { %1342 = vrot.lane.b32.xlu0 %v4329_v11, %s3690_s6  ;;  %v4606_v11 = vld [vmem:[#allocation2 + $0xc8] sm:$0xff] }
 0x17b   : > { %v4535_v40 = vpop.permute.xlu1 %876 }
 0x17c   : > { %5691 = vst [vmem:[#allocation90_spill] sm:$0xff] %v4535_v40  ;;  %v4537_v43 = vpop.permute.xlu0 %946 }
 0x17d   : > { %1216 = vrot.lane.b32.xlu1 %v4219_v54, %s3689_s30 }
 0x17e   : > { %1470 = vrot.lane.b32.xlu0 %v4139_v42, %s3691_s7 }
 0x17f   : > { %v945_v41 = vpop.permute.xlu1 %944 }
 0x180   : > { %v4543_v46 = vpop.permute.xlu0 %950 }
 0x181   : > { %1344 = vrot.lane.b32.xlu1 %v4349_v2, %s3690_s6 }
 0x182   : > { %1472 = vrot.lane.b32.xlu0 %v4153_v45, %s3691_s7 }
 0x183   : > { %v4549_v51 = vpop.permute.xlu1 %948 }
 0x184   : > { %v4551_v40 = vpop.permute.xlu0 %954 }
 0x185   : > { %1090 = vrot.lane.b32.xlu1 %v4139_v42, %s3688_s12 }
 0x186   : > { %1092 = vrot.lane.b32.xlu0 %v4153_v45, %s3688_s12 }
 0x187   : > { %v4557_v54 = vpop.permute.xlu1 %952 }
 0x188   : > { %v4559_v6 = vpop.permute.xlu0 %958 }
 0x189   : > { %1598 = vrot.lane.b32.xlu1 %v4213_v53, %s3692_s28 }
 0x18a   : > { %1600 = vrot.lane.b32.xlu0 %v4227_v56, %s3692_s28 }
 0x18b   : > { %v4565_v52 = vpop.permute.xlu1 %956 }
 0x18c   : > { %v4567_v12 = vpop.permute.xlu0 %962 }
 0x18d   : > { %5692 = vst [vmem:[#allocation91_spill] sm:$0xff] %v4567_v12  ;;  %1218 = vrot.lane.b32.xlu1 %v4213_v53, %s3689_s30  ;;  %v505_v53 = vld [vmem:[#allocation2 + $0xa9] sm:$0xff] }
 0x18e   : > { %1346 = vrot.lane.b32.xlu0 %v4341_v7, %s3690_s6 }
 0x18f   : > { %v4573_v42 = vpop.permute.xlu1 %960 }
 0x190   : > { %v4575_v45 = vpop.permute.xlu0 %966 }
 0x191   : > { %5693 = vst [vmem:[#allocation92_spill] sm:$0xff] %v4575_v45  ;;  %1220 = vrot.lane.b32.xlu1 %v4227_v56, %s3689_s30  ;;  %v366_v45 = vld [vmem:[#allocation2 + $0x8] sm:$0xff] }
 0x192   : > { %1474 = vrot.lane.b32.xlu0 %v4147_v44, %s3691_s7 }
 0x193   : > { %v4581_v32 = vpop.permute.xlu1 %964 }
 0x194   : > { %5694 = vst [vmem:[#allocation93_spill] sm:$0xff] %v4581_v32  ;;  %v1071_v25 = vpop.permute.xlu0 %1070 }
 0x195   : > { %1348 = vrot.lane.b32.xlu1 %v4359_v18, %s3690_s6 }
 0x196   : > { %1476 = vrot.lane.b32.xlu0 %v4158_v47, %s3691_s7 }
 0x197   : > { %v4587_v50 = vpop.permute.xlu1 %968 }
 0x198   : > { %5695 = vst [vmem:[#allocation94_spill] sm:$0xff] %v4587_v50  ;;  %v1199_v37 = vpop.permute.xlu0 %1198  ;;  %v1679_v50 = vsel %vm254_vm0, %v366_v45, %v4259_v28 }
 0x199   : > { %1094 = vrot.lane.b32.xlu1 %v505_v53, %s3688_s12  ;;  %v365_v53 = vld [vmem:[#allocation2] sm:$0xff]  ;;  %v1712_v32 = vsel %vm1710_vm4, %v1679_v50, %v4417_v26 }
 0x19a   : > { %1096 = vrot.lane.b32.xlu0 %v4158_v47, %s3688_s12  ;;  %v1678_v2 = vsel %vm254_vm0, %v365_v53, %v4255_v34  ;;  %v1745_v12 = vsel %vm1743_vm5, %v1712_v32, %v945_v41  ;;  %v603_v41 = vld [vmem:[#allocation2 + $0xc9] sm:$0xff] }
 0x19b   : > { %v1073_v56 = vpop.permute.xlu1 %1072 }
 0x19c   : > { %v1327_v44 = vpop.permute.xlu0 %1326  ;;  %v1778_v34 = vsel %vm1776_vm6, %v1745_v12, %v1073_v56  ;;  %v602_v12 = vld [vmem:[#allocation2 + $0xc1] sm:$0xff] }
 0x19d   : > { %1602 = vrot.lane.b32.xlu1 %v4221_v55, %s3692_s28 }
 0x19e   : > { %1604 = vrot.lane.b32.xlu0 %v4235_v58, %s3692_s28 }
 0x19f   : > { %v1201_v18 = vpop.permute.xlu1 %1200 }
 0x1a0   : > { %v1455_v7 = vpop.permute.xlu0 %1454  ;;  %v1811_v50 = vsel %vm1809_vm7, %v1778_v34, %v1201_v18  ;;  %v1681_v34 = vsel %vm254_vm0, %v4289_v23, %v4269_v38 }
 0x1a1   : > { %1222 = vrot.lane.b32.xlu1 %v4221_v55, %s3689_s30  ;;  %v1711_v55 = vsel %vm1710_vm4, %v1678_v2, %v4403_v36 }
 0x1a2   : > { %1350 = vrot.lane.b32.xlu0 %v4596_v8, %s3690_s6  ;;  %v1744_v28 = vsel %vm1743_vm5, %v1711_v55, %v943_v49  ;;  %v1680_v55 = vsel %vm254_vm0, %v4273_v27, %v4263_v1 }
 0x1a3   : > { %v1329_v47 = vpop.permute.xlu1 %1328  ;;  %v1777_v26 = vsel %vm1776_vm6, %v1744_v28, %v1071_v25 }
 0x1a4   : > { %v1457_v3 = vpop.permute.xlu0 %1456  ;;  %v1810_v2 = vsel %vm1809_vm7, %v1777_v26, %v1199_v37  ;;  %v1844_v36 = vsel %vm1842_vm8, %v1811_v50, %v1329_v47  ;;  %v1713_v26 = vsel %vm1710_vm4, %v1680_v55, %v4411_v0  ;;  %v1683_v55 = vsel %vm254_vm0, %v4301_v35, %v4278_v61 }
 0x1a5   : > { %1224 = vrot.lane.b32.xlu1 %v4235_v58, %s3689_s30  ;;  %v1843_v32 = vsel %vm1842_vm8, %v1810_v2, %v1327_v44  ;;  %v1877_v49 = vsel %vm1875_vm9, %v1844_v36, %v1457_v3  ;;  %v4650_v2 = vld [vmem:[#allocation2 + $0xd8] sm:$0xff]  ;;  %v1714_v36 = vsel %vm1710_vm4, %v1681_v34, %v4425_v5 }
 0x1a6   : > { %1352 = vrot.lane.b32.xlu0 %v4606_v11, %s3690_s6  ;;  %v1876_v25 = vsel %vm1875_vm9, %v1843_v32, %v1455_v7  ;;  %v1746_v32 = vsel %vm1743_vm5, %v1713_v26, %v4537_v43  ;;  %v1747_v27 = vsel %vm1743_vm5, %v1714_v36, %v4549_v51  ;;  %v4666_v43 = vld [vmem:[#allocation2 + $0xe0] sm:$0xff]  ;;  %v1716_v26 = vsel %vm1710_vm4, %v1683_v55, %v4433_v4 }
 0x1a7   : > { %v1075_v45 = vpop.permute.xlu1 %1074 }
 0x1a8   : > { %v1077_v58 = vpop.permute.xlu0 %1076  ;;  %v1779_v23 = vsel %vm1776_vm6, %v1746_v32, %v1075_v45 }
 0x1a9   : > { %970 = vrot.lane.b32.xlu1 %v4596_v8, %s3687_s11  ;;  %v1780_v1 = vsel %vm1776_vm6, %v1747_v27, %v1077_v58 }
 0x1aa   : > { %972 = vrot.lane.b32.xlu0 %v4606_v11, %s3687_s11 }
 0x1ab   : > { %v1583_v18 = vpop.permute.xlu1 %1582 }
 0x1ac   : > { %v1585_v37 = vpop.permute.xlu0 %1584  ;;  %v1909_v56 = vsel %vm1908_vm10, %v1876_v25, %v1583_v18 }
 0x1ad   : > { %v1910_v53 = vsel %vm1908_vm10, %v1877_v49, %v1585_v37  ;;  %1478 = vrot.lane.b32.xlu1 %v602_v12, %s3691_s7  ;;  %3299 = vmatprep.mubr.msk.f32.mxu0 %vm1946_vm11, %v1909_v56  ;;  %v605_v56 = vld [vmem:[#allocation2 + $0xe1] sm:$0xff] }
 0x1ae   : > { %1480 = vrot.lane.b32.xlu0 %v603_v41, %s3691_s7  ;;  %3300 = vmatmul.mubr.msk.f32.vlgmr.msra.gmra.mrb[0].mxu0 %vm1946_vm11, %v1910_v53 }
 0x1af   : > { %v1203_v44 = vpop.permute.xlu1 %1202 }
 0x1b0   : > { %v1331_v47 = vpop.permute.xlu0 %1330  ;;  %v1812_v38 = vsel %vm1809_vm7, %v1779_v23, %v1203_v44 }
 0x1b1   : > { %1098 = vrot.lane.b32.xlu1 %v602_v12, %s3688_s12  ;;  %v1845_v51 = vsel %vm1842_vm8, %v1812_v38, %v1331_v47 }
 0x1b2   : > { %1100 = vrot.lane.b32.xlu0 %v603_v41, %s3688_s12 }
 0x1b3   : > { %v1205_v7 = vpop.permute.xlu1 %1204 }
 0x1b4   : > { %v1459_v3 = vpop.permute.xlu0 %1458  ;;  %v1813_v5 = vsel %vm1809_vm7, %v1780_v1, %v1205_v7  ;;  %v1682_v7 = vsel %vm254_vm0, %v4282_v63, %v4265_v33  ;;  %v1749_v33 = vsel %vm1743_vm5, %v1716_v26, %v4557_v54 }
 0x1b5   : > { %1606 = vrot.lane.b32.xlu1 %v4229_v57, %s3692_s28  ;;  %v1878_v45 = vsel %vm1875_vm9, %v1845_v51, %v1459_v3  ;;  %v4733_v51 = vld [vmem:[%s3905_s25 + $0xf0] sm:$0xff] }
 0x1b6   : > { %1608 = vrot.lane.b32.xlu0 %v4243_v60, %s3692_s28  ;;  %363 = vst.msk [vmem:[#allocation2 + $0x181] sm:$0xff] %vm254_vm0, %v4733_v51 }
 0x1b7   : > { %v1333_v28 = vpop.permute.xlu1 %1332 }
 0x1b8   : > { %v1461_v50 = vpop.permute.xlu0 %1460 }
 0x1b9   : > { %1226 = vrot.lane.b32.xlu1 %v4229_v57, %s3689_s30  ;;  %v1846_v57 = vsel %vm1842_vm8, %v1813_v5, %v1333_v28  ;;  %v1715_v28 = vsel %vm1710_vm4, %v1682_v7, %v4419_v31  ;;  %v4721_v5 = vld [vmem:[#allocation2 + $0xf8] sm:$0xff] }
 0x1ba   : > { %1354 = vrot.lane.b32.xlu0 %v4650_v2, %s3690_s6  ;;  %v1879_v25 = vsel %vm1875_vm9, %v1846_v57, %v1461_v50  ;;  %v1748_v50 = vsel %vm1743_vm5, %v1715_v28, %v4543_v46  ;;  %v4710_v46 = vld [vmem:[#allocation2 + $0xf0] sm:$0xff]  ;;  %v639_v7 = vld [vmem:[#allocation2 + $0xfa] sm:$0xff] }
 0x1bb   : > { %v1079_v0 = vpop.permute.xlu1 %1078 }
 0x1bc   : > { %v1081_v12 = vpop.permute.xlu0 %1080  ;;  %v1781_v63 = vsel %vm1776_vm6, %v1748_v50, %v1079_v0 }
 0x1bd   : > { %1228 = vrot.lane.b32.xlu1 %v4243_v60, %s3689_s30  ;;  %v604_v60 = vld [vmem:[#allocation2 + $0xd9] sm:$0xff]  ;;  %v1782_v61 = vsel %vm1776_vm6, %v1749_v33, %v1081_v12  ;;  %v4773_v33 = vld [vmem:[#allocation2 + $0x108] sm:$0xff] }
 0x1be   : > { %1356 = vrot.lane.b32.xlu0 %v4666_v43, %s3690_s6 }
 0x1bf   : > { %v1587_v58 = vpop.permute.xlu1 %1586 }
 0x1c0   : > { %v1911_v18 = vsel %vm1908_vm10, %v1878_v45, %v1587_v58  ;;  %v1589_v41 = vpop.permute.xlu0 %1588  ;;  %v606_v45 = vld [vmem:[#allocation2 + $0xf1] sm:$0xff]  ;;  %v607_v58 = vld [vmem:[#allocation2 + $0xf9] sm:$0xff] }
 0x1c1   : > { %v1912_v49 = vsel %vm1908_vm10, %v1879_v25, %v1589_v41  ;;  %974 = vrot.lane.b32.xlu1 %v4650_v2, %s3687_s11  ;;  %3302 = vmatprep.mubr.msk.f32.mxu0 %vm1946_vm11, %v1911_v18  ;;  %v4741_v18 = vld [vmem:[%s3905_s25 + $0xf8] sm:$0xff]  ;;  %v1684_v41 = vsel %vm254_vm0, %v4293_v20, %v4271_v24  ;;  %s5476_s25 = scalar_lea.hbm %s5569_s3, %s3218_s5 }
 0x1c2   : > { %976 = vrot.lane.b32.xlu0 %v4666_v43, %s3687_s11  ;;  %3303 = vmatmul.mubr.msk.f32.gmra.mrb[2].mxu0 %vm1946_vm11, %v1912_v49  ;;  %364 = vst.msk [vmem:[#allocation2 + $0x189] sm:$0xff] %vm254_vm0, %v4741_v18 }
 0x1c3   : > { %v1207_v37 = vpop.permute.xlu1 %1206 }
 0x1c4   : > { %v1335_v53 = vpop.permute.xlu0 %1334  ;;  %v1814_v35 = vsel %vm1809_vm7, %v1781_v63, %v1207_v37  ;;  %v1717_v37 = vsel %vm1710_vm4, %v1684_v41, %v4427_v14 }
 0x1c5   : > { %1482 = vrot.lane.b32.xlu1 %v604_v60, %s3691_s7  ;;  %v1847_v54 = vsel %vm1842_vm8, %v1814_v35, %v1335_v53 }
 0x1c6   : > { %1484 = vrot.lane.b32.xlu0 %v605_v56, %s3691_s7 }
 0x1c7   : > { %v1209_v44 = vpop.permute.xlu1 %1208 }
 0x1c8   : > { %v1463_v47 = vpop.permute.xlu0 %1462  ;;  %v1815_v4 = vsel %vm1809_vm7, %v1782_v61, %v1209_v44  ;;  %v1750_v44 = vsel %vm1743_vm5, %v1717_v37, %v4551_v40 }
 0x1c9   : > { %1102 = vrot.lane.b32.xlu1 %v604_v60, %s3688_s12  ;;  %v1880_v27 = vsel %vm1875_vm9, %v1847_v54, %v1463_v47  ;;  %v1685_v60 = vsel %vm254_vm0, %v4313_v17, %v4287_v39  ;;  %v638_v17 = vld [vmem:[#allocation2 + $0xf2] sm:$0xff]  ;;  %v1686_v54 = vsel %vm254_vm0, %v4305_v19, %v4280_v22 }
 0x1ca   : > { %1104 = vrot.lane.b32.xlu0 %v605_v56, %s3688_s12  ;;  %v1718_v53 = vsel %vm1710_vm4, %v1685_v60, %v4441_v48 }
 0x1cb   : > { %v1337_v3 = vpop.permute.xlu1 %1336  ;;  %v1751_v20 = vsel %vm1743_vm5, %v1718_v53, %v4565_v52 }
 0x1cc   : > { %v1465_v34 = vpop.permute.xlu0 %1464  ;;  %v1848_v32 = vsel %vm1842_vm8, %v1815_v4, %v1337_v3 }
 0x1cd   : > { %1610 = vrot.lane.b32.xlu1 %v4237_v59, %s3692_s28  ;;  %v1881_v1 = vsel %vm1875_vm9, %v1848_v32, %v1465_v34  ;;  %v608_v32 = vld [vmem:[#allocation2 + $0x109] sm:$0xff] }
 0x1ce   : > { %1612 = vrot.lane.b32.xlu0 %v4248_v62, %s3692_s28 }
 0x1cf   : > { %v1083_v31 = vpop.permute.xlu1 %1082 }
 0x1d0   : > { %v1085_v36 = vpop.permute.xlu0 %1084  ;;  %v1783_v24 = vsel %vm1776_vm6, %v1750_v44, %v1083_v31  ;;  %v4781_v31 = vld [vmem:[#allocation2 + $0x110] sm:$0xff]  ;;  %v4822_v44 = vld [vmem:[#allocation2 + $0x120] sm:$0xff] }
 0x1d1   : > { %1230 = vrot.lane.b32.xlu1 %v4237_v59, %s3689_s30  ;;  %v1784_v39 = vsel %vm1776_vm6, %v1751_v20, %v1085_v36 }
 0x1d2   : > { %1358 = vrot.lane.b32.xlu0 %v4710_v46, %s3690_s6 }
 0x1d3   : > { %v1591_v23 = vpop.permute.xlu1 %1590 }
 0x1d4   : > { %v1913_v38 = vsel %vm1908_vm10, %v1880_v27, %v1591_v23  ;;  %v1593_v0 = vpop.permute.xlu0 %1592  ;;  %v609_v23 = vld [vmem:[#allocation2 + $0x111] sm:$0xff] }
 0x1d5   : > { %v1914_v12 = vsel %vm1908_vm10, %v1881_v1, %v1593_v0  ;;  %1232 = vrot.lane.b32.xlu1 %v4248_v62, %s3689_s30  ;;  %3305 = vmatprep.mubr.msk.f32.mxu0 %vm1946_vm11, %v1913_v38  ;;  %v1687_v1 = vsel %vm254_vm0, %v4325_v13, %v4299_v21  ;;  %v1719_v38 = vsel %vm1710_vm4, %v1686_v54, %v4435_v10 }
 0x1d6   : > { %1360 = vrot.lane.b32.xlu0 %v4721_v5, %s3690_s6  ;;  %3306 = vmatmul.mubr.msk.f32.gmra.mrb[4].mxu0 %vm1946_vm11, %v1914_v12  ;;  %v1720_v12 = vsel %vm1710_vm4, %v1687_v1, %v4449_v16 }
 0x1d7   : > { %v1211_v59 = vpop.permute.xlu1 %1210  ;;  %v1753_v19 = vsel %vm1743_vm5, %v1720_v12, %v4573_v42  ;;  %v640_v42 = vld [vmem:[#allocation2 + $0x10a] sm:$0xff] }
 0x1d8   : > { %v1339_v57 = vpop.permute.xlu0 %1338  ;;  %v1816_v14 = vsel %vm1809_vm7, %v1783_v24, %v1211_v59  ;;  %v1752_v59 = vsel %vm1743_vm5, %v1719_v38, %v4559_v6 }
 0x1d9   : > { %978 = vrot.lane.b32.xlu1 %v4710_v46, %s3687_s11  ;;  %v1849_v52 = vsel %vm1842_vm8, %v1816_v14, %v1339_v57 }
 0x1da   : > { %980 = vrot.lane.b32.xlu0 %v4721_v5, %s3687_s11 }
 0x1db   : > { %v1213_v62 = vpop.permute.xlu1 %1212 }
 0x1dc   : > { %v1467_v25 = vpop.permute.xlu0 %1466  ;;  %v1817_v48 = vsel %vm1809_vm7, %v1784_v39, %v1213_v62  ;;  %v5696_v39 = vld [vmem:[#allocation45_spill] sm:$0xff] }
 0x1dd   : > { %1486 = vrot.lane.b32.xlu1 %v606_v45, %s3691_s7  ;;  %v1882_v55 = vsel %vm1875_vm9, %v1849_v52, %v1467_v25  ;;  %v641_v25 = vld [vmem:[#allocation2 + $0x112] sm:$0xff]  ;;  %v1688_v14 = vsel %vm254_vm0, %v4317_v15, %v5696_v39 }
 0x1de   : > { %1488 = vrot.lane.b32.xlu0 %v607_v58, %s3691_s7 }
 0x1df   : > { %v1341_v49 = vpop.permute.xlu1 %1340 }
 0x1e0   : > { %v1469_v56 = vpop.permute.xlu0 %1468  ;;  %v1850_v40 = vsel %vm1842_vm8, %v1817_v48, %v1341_v49 }
 0x1e1   : > { %1106 = vrot.lane.b32.xlu1 %v606_v45, %s3688_s12  ;;  %v1883_v34 = vsel %vm1875_vm9, %v1850_v40, %v1469_v56 }
 0x1e2   : > { %1108 = vrot.lane.b32.xlu0 %v607_v58, %s3688_s12 }
 0x1e3   : > { %v1087_v47 = vpop.permute.xlu1 %1086 }
 0x1e4   : > { %v1089_v3 = vpop.permute.xlu0 %1088  ;;  %v1785_v22 = vsel %vm1776_vm6, %v1752_v59, %v1087_v47  ;;  %v643_v59 = vld [vmem:[#allocation2 + $0x12a] sm:$0xff] }
 0x1e5   : > { %1614 = vrot.lane.b32.xlu1 %v638_v17, %s3692_s28  ;;  %v1786_v13 = vsel %vm1776_vm6, %v1753_v19, %v1089_v3  ;;  %v1721_v3 = vsel %vm1710_vm4, %v1688_v14, %v4443_v29  ;;  %v5707_v14 = vld [vmem:[#allocation94_spill] sm:$0xff] }
 0x1e6   : > { %1616 = vrot.lane.b32.xlu0 %v639_v7, %s3692_s28 }
 0x1e7   : > { %v1595_v28 = vpop.permute.xlu1 %1594 }
 0x1e8   : > { %v1915_v26 = vsel %vm1908_vm10, %v1882_v55, %v1595_v28  ;;  %v1597_v50 = vpop.permute.xlu0 %1596  ;;  %v5698_v55 = vld [vmem:[#allocation91_spill] sm:$0xff] }
 0x1e9   : > { %v1916_v63 = vsel %vm1908_vm10, %v1883_v34, %v1597_v50  ;;  %1234 = vrot.lane.b32.xlu1 %v638_v17, %s3689_s30  ;;  %3308 = vmatprep.mubr.msk.f32.mxu0 %vm1946_vm11, %v1915_v26  ;;  %v4827_v17 = vld [vmem:[#allocation2 + $0x128] sm:$0xff]  ;;  %v1754_v28 = vsel %vm1743_vm5, %v1721_v3, %v5698_v55 }
 0x1ea   : > { %1362 = vrot.lane.b32.xlu0 %v4773_v33, %s3690_s6  ;;  %3309 = vmatmul.mubr.msk.f32.gmra.mrb[6].mxu0 %vm1946_vm11, %v1916_v63  ;;  %v5699_v34 = vld [vmem:[#allocation93_spill] sm:$0xff]  ;;  %v613_v55 = vld [vmem:[#allocation2 + $0x141] sm:$0xff] }
 0x1eb   : > { %v1215_v61 = vpop.permute.xlu1 %1214  ;;  %v611_v63 = vld [vmem:[#allocation2 + $0x129] sm:$0xff] }
 0x1ec   : > { %v1343_v35 = vpop.permute.xlu0 %1342  ;;  %v1818_v21 = vsel %vm1809_vm7, %v1785_v22, %v1215_v61 }
 0x1ed   : > { %1236 = vrot.lane.b32.xlu1 %v639_v7, %s3689_s30  ;;  %v1851_v6 = vsel %vm1842_vm8, %v1818_v21, %v1343_v35  ;;  %v5697_v7 = vld [vmem:[#allocation47_spill] sm:$0xff] }
 0x1ee   : > { %1364 = vrot.lane.b32.xlu0 %v4781_v31, %s3690_s6  ;;  %v1689_v48 = vsel %vm254_vm0, %v4337_v9, %v5697_v7  ;;  %v610_v9 = vld [vmem:[#allocation2 + $0x121] sm:$0xff] }
 0x1ef   : > { %v1217_v4 = vpop.permute.xlu1 %1216  ;;  %v1722_v52 = vsel %vm1710_vm4, %v1689_v48, %v4457_v30  ;;  %v612_v48 = vld [vmem:[#allocation2 + $0x139] sm:$0xff] }
 0x1f0   : > { %v1471_v36 = vpop.permute.xlu0 %1470  ;;  %v1819_v57 = vsel %vm1809_vm7, %v1786_v13, %v1217_v4  ;;  %v1755_v15 = vsel %vm1743_vm5, %v1722_v52, %v5699_v34  ;;  %v580_v13 = vld [vmem:[#allocation2 + $0x138] sm:$0xff] }
 0x1f1   : > { %982 = vrot.lane.b32.xlu1 %v4773_v33, %s3687_s11  ;;  %v1884_v62 = vsel %vm1875_vm9, %v1851_v6, %v1471_v36  ;;  %v5701_v6 = vld [vmem:[#allocation51_spill] sm:$0xff] }
 0x1f2   : > { %984 = vrot.lane.b32.xlu0 %v4781_v31, %s3687_s11 }
 0x1f3   : > { %v1345_v27 = vpop.permute.xlu1 %1344 }
 0x1f4   : > { %v1473_v0 = vpop.permute.xlu0 %1472  ;;  %v1852_v45 = vsel %vm1842_vm8, %v1819_v57, %v1345_v27 }
 0x1f5   : > { %1490 = vrot.lane.b32.xlu1 %v608_v32, %s3691_s7  ;;  %v1885_v41 = vsel %vm1875_vm9, %v1852_v45, %v1473_v0  ;;  %v642_v0 = vld [vmem:[#allocation2 + $0x122] sm:$0xff]  ;;  %v5700_v45 = vld [vmem:[#allocation46_spill] sm:$0xff] }
 0x1f6   : > { %1492 = vrot.lane.b32.xlu0 %v609_v23, %s3691_s7 }
 0x1f7   : > { %v1091_v10 = vpop.permute.xlu1 %1090 }
 0x1f8   : > { %v1093_v16 = vpop.permute.xlu0 %1092  ;;  %v1787_v26 = vsel %vm1776_vm6, %v1754_v28, %v1091_v10 }
 0x1f9   : > { %1110 = vrot.lane.b32.xlu1 %v608_v32, %s3688_s12  ;;  %v1788_v29 = vsel %vm1776_vm6, %v1755_v15, %v1093_v16  ;;  %v4874_v16 = vld [vmem:[#allocation2 + $0x140] sm:$0xff] }
 0x1fa   : > { %1112 = vrot.lane.b32.xlu0 %v609_v23, %s3688_s12 }
 0x1fb   : > { %v1599_v58 = vpop.permute.xlu1 %1598 }
 0x1fc   : > { %v1917_v49 = vsel %vm1908_vm10, %v1884_v62, %v1599_v58  ;;  %v1601_v60 = vpop.permute.xlu0 %1600  ;;  %v486_v58 = vld [vmem:[#allocation2 + $0x140] sm:$0xff] }
 0x1fd   : > { %v1918_v37 = vsel %vm1908_vm10, %v1885_v41, %v1601_v60  ;;  %1618 = vrot.lane.b32.xlu1 %v640_v42, %s3692_s28  ;;  %3311 = vmatprep.mubr.msk.f32.mxu0 %vm1946_vm11, %v1917_v49  ;;  %v5703_v41 = vld [vmem:[#allocation56_spill] sm:$0xff]  ;;  %v5704_v60 = vld [vmem:[#allocation71_spill] sm:$0xff] }
 0x1fe   : > { %1620 = vrot.lane.b32.xlu0 %v641_v25, %s3692_s28  ;;  %3312 = vmatmul.mubr.msk.f32.gmra.mrb[8].mxu0 %vm1946_vm11, %v1918_v37 }
 0x1ff   : > { %v1219_v56 = vpop.permute.xlu1 %1218 }
 0x200   : > { %v1347_v53 = vpop.permute.xlu0 %1346  ;;  %v1820_v50 = vsel %vm1809_vm7, %v1787_v26, %v1219_v56 }
 0x201   : > { %1238 = vrot.lane.b32.xlu1 %v640_v42, %s3689_s30  ;;  %v1853_v36 = vsel %vm1842_vm8, %v1820_v50, %v1347_v53  ;;  %v1690_v42 = vsel %vm254_vm0, %v5701_v6, %v5700_v45  ;;  %v5705_v53 = vld [vmem:[#allocation73_spill] sm:$0xff]  ;;  %v5711_v45 = vld [vmem:[#allocation59_spill] sm:$0xff] }
 0x202   : > { %1366 = vrot.lane.b32.xlu0 %v4822_v44, %s3690_s6  ;;  %v1723_v37 = vsel %vm1710_vm4, %v1690_v42, %v5704_v60  ;;  %v5712_v42 = vld [vmem:[#allocation72_spill] sm:$0xff] }
 0x203   : > { %v1221_v20 = vpop.permute.xlu1 %1220 }
 0x204   : > { %v1475_v24 = vpop.permute.xlu0 %1474  ;;  %v1821_v61 = vsel %vm1809_vm7, %v1788_v29, %v1221_v20 }
 0x205   : > { %1240 = vrot.lane.b32.xlu1 %v641_v25, %s3689_s30  ;;  %v1886_v32 = vsel %vm1875_vm9, %v1853_v36, %v1475_v24  ;;  %v5702_v25 = vld [vmem:[#allocation49_spill] sm:$0xff]  ;;  %v5706_v24 = vld [vmem:[#allocation92_spill] sm:$0xff] }
 0x206   : > { %1368 = vrot.lane.b32.xlu0 %v4827_v17, %s3690_s6  ;;  %v1691_v49 = vsel %vm254_vm0, %v5703_v41, %v5702_v25  ;;  %v1756_v39 = vsel %vm1743_vm5, %v1723_v37, %v5706_v24  ;;  %v645_v36 = vld [vmem:[#allocation2 + $0x142] sm:$0xff]  ;;  %v5713_v25 = vld [vmem:[#allocation17_spill] sm:$0xff] }
 0x207   : > { %v1349_v47 = vpop.permute.xlu1 %1348  ;;  %v1724_v20 = vsel %vm1710_vm4, %v1691_v49, %v5705_v53  ;;  %v5714_v41 = vld [vmem:[#allocation75_spill] sm:$0xff]  ;;  %v5715_v37 = vld [vmem:[#allocation16_spill] sm:$0xff] }
 0x208   : > { %v1477_v40 = vpop.permute.xlu0 %1476  ;;  %v1854_v4 = vsel %vm1842_vm8, %v1821_v61, %v1349_v47  ;;  %v1757_v47 = vsel %vm1743_vm5, %v1724_v20, %v5707_v14  ;;  %v614_v20 = vld [vmem:[#allocation2 + $0x151] sm:$0xff] }
 0x209   : > { %986 = vrot.lane.b32.xlu1 %v4822_v44, %s3687_s11  ;;  %v1887_v27 = vsel %vm1875_vm9, %v1854_v4, %v1477_v40 }
 0x20a   : > { %988 = vrot.lane.b32.xlu0 %v4827_v17, %s3687_s11 }
 0x20b   : > { %v1095_v30 = vpop.permute.xlu1 %1094 }
 0x20c   : > { %v1097_v35 = vpop.permute.xlu0 %1096  ;;  %v1789_v7 = vsel %vm1776_vm6, %v1756_v39, %v1095_v30 }
 0x20d   : > { %1494 = vrot.lane.b32.xlu1 %v610_v9, %s3691_s7  ;;  %v1790_v3 = vsel %vm1776_vm6, %v1757_v47, %v1097_v35  ;;  %v644_v35 = vld [vmem:[#allocation2 + $0x13a] sm:$0xff] }
 0x20e   : > { %1496 = vrot.lane.b32.xlu0 %v611_v63, %s3691_s7  ;;  %v615_v47 = vld [vmem:[#allocation2 + $0x159] sm:$0xff] }
 0x20f   : > { %v1603_v54 = vpop.permute.xlu1 %1602 }
 0x210   : > { %v1919_v23 = vsel %vm1908_vm10, %v1886_v32, %v1603_v54  ;;  %v1605_v1 = vpop.permute.xlu0 %1604 }
 0x211   : > { %v1920_v38 = vsel %vm1908_vm10, %v1887_v27, %v1605_v1  ;;  %1114 = vrot.lane.b32.xlu1 %v610_v9, %s3688_s12  ;;  %3314 = vmatprep.mubr.msk.f32.mxu0 %vm1946_vm11, %v1919_v23  ;;  %v582_v27 = vld [vmem:[#allocation2 + $0x150] sm:$0xff] }
 0x212   : > { %1116 = vrot.lane.b32.xlu0 %v611_v63, %s3688_s12  ;;  %3315 = vmatmul.mubr.msk.f32.gmra.mrb[10].mxu0 %vm1946_vm11, %v1920_v38  ;;  %v583_v38 = vld [vmem:[#allocation2 + $0x158] sm:$0xff] }
 0x213   : > { %v1223_v12 = vpop.permute.xlu1 %1222 }
 0x214   : > { %v1351_v19 = vpop.permute.xlu0 %1350  ;;  %v1822_v40 = vsel %vm1809_vm7, %v1789_v7, %v1223_v12  ;;  %v2272_v12 = vld [vmem:[#allocation8] sm:$0xf] }
 0x215   : > { %1622 = vrot.lane.b32.xlu1 %v642_v0, %s3692_s28  ;;  %v1855_v15 = vsel %vm1842_vm8, %v1822_v40, %v1351_v19  ;;  %3347 = vmatprep.subr.msk.mxu1 %vm2043_vm3, %v2272_v12  ;;  %v5709_v19 = vld [vmem:[#allocation54_spill] sm:$0xff] }
 0x216   : > { %1624 = vrot.lane.b32.xlu0 %v643_v59, %s3692_s28  ;;  %3348 = vmatpush3.msk.msra.mxu1 %vm2043_vm3, %v2272_v12  ;;  %v585_v12 = vld [vmem:[#allocation2 + $0x170] sm:$0xff] }
 0x217   : > { %v1225_v22 = vpop.permute.xlu1 %1224  ;;  %3350 = vmatmul.mubr.msk.f32.vlgmr.msra.gmra.mrb[0].mxu1 %vm254_vm0, %v5713_v25 }
 0x218   : > { %v1353_v21 = vpop.permute.xlu0 %1352  ;;  %v1823_v28 = vsel %vm1809_vm7, %v1790_v3, %v1225_v22  ;;  %3352 = vmatprep.mubr.msk.f32.mxu1 %vm254_vm0, %v5715_v37 }
 0x219   : > { %1242 = vrot.lane.b32.xlu1 %v642_v0, %s3689_s30  ;;  %v1856_v26 = vsel %vm1842_vm8, %v1823_v28, %v1353_v21  ;;  %v5710_v21 = vld [vmem:[#allocation52_spill] sm:$0xff] }
 0x21a   : > { %1370 = vrot.lane.b32.xlu0 %v580_v13, %s3690_s6  ;;  %v1693_v6 = vsel %vm254_vm0, %v5711_v45, %v5710_v21 }
 0x21b   : > { %v4870_v10 = vpop.permute.xlu1 %970  ;;  %v1726_v49 = vsel %vm1710_vm4, %v1693_v6, %v5714_v41  ;;  %v5727_v6 = vld [vmem:[#allocation55_spill] sm:$0xff]  ;;  %v5729_v41 = vld [vmem:[#allocation29_spill] sm:$0xff] }
 0x21c   : > { %v4872_v57 = vpop.permute.xlu0 %972 }
 0x21d   : > { %1244 = vrot.lane.b32.xlu1 %v643_v59, %s3689_s30  ;;  %v5708_v59 = vld [vmem:[#allocation48_spill] sm:$0xff] }
 0x21e   : > { %1372 = vrot.lane.b32.xlu0 %v4874_v16, %s3690_s6  ;;  %v1692_v22 = vsel %vm254_vm0, %v5709_v19, %v5708_v59  ;;  %v5724_v19 = vld [vmem:[#allocation27_spill] sm:$0xff] }
 0x21f   : > { %v1479_v62 = vpop.permute.xlu1 %1478 }
 0x220   : > { %v1481_v56 = vpop.permute.xlu0 %1480  ;;  %v1888_v9 = vsel %vm1875_vm9, %v1855_v15, %v1479_v62  ;;  %v1725_v62 = vsel %vm1710_vm4, %v1692_v22, %v5712_v42  ;;  %v5725_v22 = vld [vmem:[#allocation26_spill] sm:$0xff]  ;;  %v1695_v42 = vsel %vm254_vm0, %v4606_v11, %v5727_v6 }
 0x221   : > { %990 = vrot.lane.b32.xlu1 %v580_v13, %s3687_s11  ;;  %v1889_v50 = vsel %vm1875_vm9, %v1856_v26, %v1481_v56  ;;  %v1758_v60 = vsel %vm1743_vm5, %v1725_v62, %v4870_v10  ;;  %v1759_v56 = vsel %vm1743_vm5, %v1726_v49, %v4872_v57  ;;  %v5717_v57 = vld [vmem:[#allocation18_spill] sm:$0xff]  ;;  %v5718_v26 = vld [vmem:[#allocation21_spill] sm:$0xff] }
 0x222   : > { %992 = vrot.lane.b32.xlu0 %v486_v58, %s3687_s11  ;;  %v5728_v62 = vld [vmem:[#allocation74_spill] sm:$0xff]  ;;  %v5730_v49 = vld [vmem:[#allocation77_spill] sm:$0xff] }
 0x223   : > { %v1099_v52 = vpop.permute.xlu1 %1098 }
 0x224   : > { %v1101_v34 = vpop.permute.xlu0 %1100  ;;  %v1791_v53 = vsel %vm1776_vm6, %v1758_v60, %v1099_v52  ;;  %v1728_v60 = vsel %vm1710_vm4, %v1695_v42, %v5730_v49  ;;  %v5744_v42 = vld [vmem:[#allocation76_spill] sm:$0xff] }
 0x225   : > { %1498 = vrot.lane.b32.xlu1 %v612_v48, %s3691_s7  ;;  %v1792_v24 = vsel %vm1776_vm6, %v1759_v56, %v1101_v34 }
 0x226   : > { %1500 = vrot.lane.b32.xlu0 %v613_v55, %s3691_s7 }
 0x227   : > { %v1607_v29 = vpop.permute.xlu1 %1606 }
 0x228   : > { %v1921_v30 = vsel %vm1908_vm10, %v1888_v9, %v1607_v29  ;;  %v1609_v63 = vpop.permute.xlu0 %1608  ;;  %v646_v29 = vld [vmem:[#allocation2 + $0x152] sm:$0xff] }
 0x229   : > { %v1922_v61 = vsel %vm1908_vm10, %v1889_v50, %v1609_v63  ;;  %1118 = vrot.lane.b32.xlu1 %v612_v48, %s3688_s12  ;;  %3317 = vmatprep.mubr.msk.f32.mxu0 %vm1946_vm11, %v1921_v30  ;;  %v5716_v48 = vld [vmem:[#allocation19_spill] sm:$0xff]  ;;  %v5719_v63 = vld [vmem:[#allocation20_spill] sm:$0xff] }
 0x22a   : > { %1120 = vrot.lane.b32.xlu0 %v613_v55, %s3688_s12  ;;  %3318 = vmatmul.mubr.msk.f32.gmra.mrb[12].mxu0 %vm1946_vm11, %v1922_v61  ;;  %v647_v30 = vld [vmem:[#allocation2 + $0x15a] sm:$0xff] }
 0x22b   : > { %v1227_v4 = vpop.permute.xlu1 %1226  ;;  %3353 = vmatmul.mubr.msk.f32.gmra.mrb[2].mxu1 %vm254_vm0, %v5716_v48  ;;  %v5732_v48 = vld [vmem:[#allocation31_spill] sm:$0xff] }
 0x22c   : > { %v1355_v32 = vpop.permute.xlu0 %1354  ;;  %v1824_v39 = vsel %vm1809_vm7, %v1791_v53, %v1227_v4  ;;  %3355 = vmatprep.mubr.msk.f32.mxu1 %vm254_vm0, %v5717_v57  ;;  %v5721_v4 = vld [vmem:[#allocation22_spill] sm:$0xff]  ;;  %v616_v53 = vld [vmem:[#allocation2 + $0x169] sm:$0xff] }
 0x22d   : > { %1626 = vrot.lane.b32.xlu1 %v644_v35, %s3692_s28  ;;  %v1857_v3 = vsel %vm1842_vm8, %v1824_v39, %v1355_v32  ;;  %v584_v32 = vld [vmem:[#allocation2 + $0x168] sm:$0xff] }
 0x22e   : > { %1628 = vrot.lane.b32.xlu0 %v645_v36, %s3692_s28 }
 0x22f   : > { %v1229_v54 = vpop.permute.xlu1 %1228  ;;  %3356 = vmatmul.mubr.msk.f32.gmra.mrb[4].mxu1 %vm254_vm0, %v5718_v26 }
 0x230   : > { %v1357_v23 = vpop.permute.xlu0 %1356  ;;  %v1825_v10 = vsel %vm1809_vm7, %v1792_v24, %v1229_v54  ;;  %3358 = vmatprep.mubr.msk.f32.mxu1 %vm254_vm0, %v5719_v63  ;;  %v5737_v63 = vld [vmem:[#allocation34_spill] sm:$0xff] }
 0x231   : > { %1246 = vrot.lane.b32.xlu1 %v644_v35, %s3689_s30  ;;  %v1858_v40 = vsel %vm1842_vm8, %v1825_v10, %v1357_v23  ;;  %v5720_v35 = vld [vmem:[#allocation23_spill] sm:$0xff]  ;;  %v5723_v23 = vld [vmem:[#allocation24_spill] sm:$0xff] }
 0x232   : > { %1374 = vrot.lane.b32.xlu0 %v582_v27, %s3690_s6 }
 0x233   : > { %v4915_v1 = vpop.permute.xlu1 %974  ;;  %3359 = vmatmul.mubr.msk.f32.gmra.mrb[6].mxu1 %vm254_vm0, %v5720_v35  ;;  %v586_v35 = vld [vmem:[#allocation2 + $0x180] sm:$0xff] }
 0x234   : > { %v4917_v0 = vpop.permute.xlu0 %976  ;;  %3361 = vmatprep.mubr.msk.f32.mxu1 %vm254_vm0, %v5721_v4 }
 0x235   : > { %1248 = vrot.lane.b32.xlu1 %v645_v36, %s3689_s30  ;;  %v1761_v11 = vsel %vm1743_vm5, %v1728_v60, %v4917_v0  ;;  %v5733_v0 = vld [vmem:[#allocation30_spill] sm:$0xff] }
 0x236   : > { %1376 = vrot.lane.b32.xlu0 %v583_v38, %s3690_s6 }
 0x237   : > { %v1483_v13 = vpop.permute.xlu1 %1482 }
 0x238   : > { %v1485_v58 = vpop.permute.xlu0 %1484  ;;  %v1890_v52 = vsel %vm1875_vm9, %v1857_v3, %v1483_v13  ;;  %v5726_v13 = vld [vmem:[#allocation50_spill] sm:$0xff] }
 0x239   : > { %994 = vrot.lane.b32.xlu1 %v582_v27, %s3687_s11  ;;  %v1891_v28 = vsel %vm1875_vm9, %v1858_v40, %v1485_v58  ;;  %v5722_v27 = vld [vmem:[#allocation25_spill] sm:$0xff]  ;;  %v1694_v21 = vsel %vm254_vm0, %v4596_v8, %v5726_v13  ;;  %v5731_v8 = vld [vmem:[#allocation28_spill] sm:$0xff] }
 0x23a   : > { %996 = vrot.lane.b32.xlu0 %v583_v38, %s3687_s11  ;;  %3362 = vmatmul.mubr.msk.f32.gmra.mrb[8].mxu1 %vm254_vm0, %v5722_v27  ;;  %v1727_v58 = vsel %vm1710_vm4, %v1694_v21, %v5728_v62  ;;  %v587_v27 = vld [vmem:[#allocation2 + $0x188] sm:$0xff] }
 0x23b   : > { %v1103_v14 = vpop.permute.xlu1 %1102  ;;  %3364 = vmatprep.mubr.msk.f32.mxu1 %vm254_vm0, %v5723_v23  ;;  %v1760_v37 = vsel %vm1743_vm5, %v1727_v58, %v4915_v1 }
 0x23c   : > { %v1105_v7 = vpop.permute.xlu0 %1104  ;;  %v1793_v56 = vsel %vm1776_vm6, %v1760_v37, %v1103_v14 }
 0x23d   : > { %1502 = vrot.lane.b32.xlu1 %v614_v20, %s3691_s7 }
 0x23e   : > { %1504 = vrot.lane.b32.xlu0 %v615_v47, %s3691_s7  ;;  %3365 = vmatmul.mubr.msk.f32.gmra.mrb[10].mxu1 %vm254_vm0, %v5724_v19  ;;  %v5741_v19 = vld [vmem:[#allocation38_spill] sm:$0xff] }
 0x23f   : > { %v1611_v55 = vpop.permute.xlu1 %1610  ;;  %3367 = vmatprep.mubr.msk.f32.mxu1 %vm254_vm0, %v5725_v22  ;;  %v5742_v22 = vld [vmem:[#allocation53_spill] sm:$0xff] }
 0x240   : > { %v1923_v34 = vsel %vm1908_vm10, %v1890_v52, %v1611_v55  ;;  %v1613_v15 = vpop.permute.xlu0 %1612  ;;  %v1696_v13 = vsel %vm254_vm0, %v4650_v2, %v5742_v22  ;;  %v5747_v2 = vld [vmem:[#allocation40_spill] sm:$0xff] }
 0x241   : > { %v1924_v9 = vsel %vm1908_vm10, %v1891_v28, %v1613_v15  ;;  %1122 = vrot.lane.b32.xlu1 %v614_v20, %s3688_s12  ;;  %3320 = vmatprep.mubr.msk.f32.mxu0 %vm1946_vm11, %v1923_v34  ;;  %v1794_v20 = vsel %vm1776_vm6, %v1761_v11, %v1105_v7  ;;  %v5734_v28 = vld [vmem:[#allocation33_spill] sm:$0xff]  ;;  %v1729_v62 = vsel %vm1710_vm4, %v1696_v13, %v5744_v42 }
 0x242   : > { %1124 = vrot.lane.b32.xlu0 %v615_v47, %s3688_s12  ;;  %3321 = vmatmul.mubr.msk.f32.gmra.mrb[14].mxu0 %vm1946_vm11, %v1924_v9  ;;  %v617_v47 = vld [vmem:[#allocation2 + $0x171] sm:$0xff] }
 0x243   : > { %v1231_v50 = vpop.permute.xlu1 %1230  ;;  %3368 = vmatmul.mubr.msk.f32.gmra.mrb[12].mxu1 %vm254_vm0, %v5729_v41  ;;  %v648_v15 = vld [vmem:[#allocation2 + $0x16a] sm:$0xff]  ;;  %v649_v9 = vld [vmem:[#allocation2 + $0x172] sm:$0xff]  ;;  %v5746_v41 = vld [vmem:[#allocation79_spill] sm:$0xff] }
 0x244   : > { %v1359_v61 = vpop.permute.xlu0 %1358  ;;  %3370 = vmatprep.mubr.msk.f32.mxu1 %vm254_vm0, %v5731_v8  ;;  %v1826_v24 = vsel %vm1809_vm7, %v1793_v56, %v1231_v50  ;;  %v618_v8 = vld [vmem:[#allocation2 + $0x181] sm:$0xff] }
 0x245   : > { %1630 = vrot.lane.b32.xlu1 %v646_v29, %s3692_s28  ;;  %v1859_v14 = vsel %vm1842_vm8, %v1826_v24, %v1359_v61 }
 0x246   : > { %1632 = vrot.lane.b32.xlu0 %v647_v30, %s3692_s28 }
 0x247   : > { %v1233_v36 = vpop.permute.xlu1 %1232  ;;  %3371 = vmatmul.mubr.msk.f32.gmra.mrb[14].mxu1 %vm254_vm0, %v5732_v48 }
 0x248   : > { %v1361_v54 = vpop.permute.xlu0 %1360  ;;  %v1827_v1 = vsel %vm1809_vm7, %v1794_v20, %v1233_v36  ;;  %3373 = vmatprep.mubr.msk.f32.mxu1 %vm254_vm0, %v5733_v0  ;;  %v5738_v36 = vld [vmem:[#allocation37_spill] sm:$0xff] }
 0x249   : > { %1250 = vrot.lane.b32.xlu1 %v646_v29, %s3689_s30  ;;  %v1860_v7 = vsel %vm1842_vm8, %v1827_v1, %v1361_v54  ;;  %v5735_v29 = vld [vmem:[#allocation32_spill] sm:$0xff] }
 0x24a   : > { %1378 = vrot.lane.b32.xlu0 %v584_v32, %s3690_s6  ;;  %v619_v20 = vld [vmem:[#allocation2 + $0x189] sm:$0xff] }
 0x24b   : > { %v4979_v38 = vpop.permute.xlu1 %978  ;;  %3374 = vmatmul.mubr.msk.f32.gmra.mrb[16].mxu1 %vm254_vm0, %v5734_v28 }
 0x24c   : > { %v4981_v59 = vpop.permute.xlu0 %980  ;;  %3376 = vmatprep.mubr.msk.f32.mxu1 %vm254_vm0, %v5735_v29  ;;  %v1762_v60 = vsel %vm1743_vm5, %v1729_v62, %v4979_v38  ;;  %v620_v29 = vld [vmem:[#allocation2 + $0x199] sm:$0xff] }
 0x24d   : > { %1252 = vrot.lane.b32.xlu1 %v647_v30, %s3689_s30  ;;  %v5736_v30 = vld [vmem:[#allocation35_spill] sm:$0xff] }
 0x24e   : > { %1380 = vrot.lane.b32.xlu0 %v585_v12, %s3690_s6 }
 0x24f   : > { %v1487_v45 = vpop.permute.xlu1 %1486  ;;  %3377 = vmatmul.mubr.msk.f32.gmra.mrb[18].mxu1 %vm254_vm0, %v5736_v30 }
 0x250   : > { %v1489_v25 = vpop.permute.xlu0 %1488  ;;  %v1892_v57 = vsel %vm1875_vm9, %v1859_v14, %v1487_v45  ;;  %3379 = vmatprep.mubr.msk.f32.mxu1 %vm254_vm0, %v5737_v63  ;;  %v5743_v45 = vld [vmem:[#allocation58_spill] sm:$0xff] }
 0x251   : > { %998 = vrot.lane.b32.xlu1 %v584_v32, %s3687_s11  ;;  %v1893_v40 = vsel %vm1875_vm9, %v1860_v7, %v1489_v25  ;;  %v5739_v32 = vld [vmem:[#allocation36_spill] sm:$0xff]  ;;  %v1697_v6 = vsel %vm254_vm0, %v4666_v43, %v5743_v45  ;;  %v5745_v25 = vld [vmem:[#allocation41_spill] sm:$0xff] }
 0x252   : > { %1000 = vrot.lane.b32.xlu0 %v585_v12, %s3687_s11  ;;  %v5740_v12 = vld [vmem:[#allocation39_spill] sm:$0xff]  ;;  %v1730_v49 = vsel %vm1710_vm4, %v1697_v6, %v5746_v41 }
 0x253   : > { %v1107_v39 = vpop.permute.xlu1 %1106  ;;  %3380 = vmatmul.mubr.msk.f32.gmra.mrb[20].mxu1 %vm254_vm0, %v5738_v36  ;;  %v1763_v43 = vsel %vm1743_vm5, %v1730_v49, %v4981_v59  ;;  %v5749_v59 = vld [vmem:[#allocation42_spill] sm:$0xff]  ;;  %v621_v6 = vld [vmem:[#allocation2 + $0x1a1] sm:$0xff] }
 0x254   : > { %v1109_v10 = vpop.permute.xlu0 %1108  ;;  %3382 = vmatprep.mubr.msk.f32.mxu1 %vm254_vm0, %v5739_v32  ;;  %v1795_v37 = vsel %vm1776_vm6, %v1762_v60, %v1107_v39  ;;  %v5753_v36 = vld [vmem:[#allocation78_spill] sm:$0xff] }
 0x255   : > { %1506 = vrot.lane.b32.xlu1 %v616_v53, %s3691_s7  ;;  %v1796_v11 = vsel %vm1776_vm6, %v1763_v43, %v1109_v10 }
 0x256   : > { %1508 = vrot.lane.b32.xlu0 %v617_v47, %s3691_s7 }
 0x257   : > { %v1615_v3 = vpop.permute.xlu1 %1614  ;;  %3383 = vmatmul.mubr.msk.f32.gmra.mrb[22].mxu1 %vm254_vm0, %v5740_v12  ;;  %v5754_v12 = vld [vmem:[#allocation81_spill] sm:$0xff] }
 0x258   : > { %v1925_v52 = vsel %vm1908_vm10, %v1892_v57, %v1615_v3  ;;  %v1617_v55 = vpop.permute.xlu0 %1616  ;;  %3385 = vmatprep.mubr.msk.f32.mxu1 %vm254_vm0, %v5741_v19  ;;  %v5750_v57 = vld [vmem:[#allocation44_spill] sm:$0xff] }
 0x259   : > { %v1926_v34 = vsel %vm1908_vm10, %v1893_v40, %v1617_v55  ;;  %1126 = vrot.lane.b32.xlu1 %v616_v53, %s3688_s12  ;;  %3323 = vmatprep.mubr.msk.f32.mxu0 %vm1946_vm11, %v1925_v52  ;;  %v650_v40 = vld [vmem:[#allocation2 + $0x182] sm:$0xff]  ;;  %v651_v55 = vld [vmem:[#allocation2 + $0x18a] sm:$0xff] }
 0x25a   : > { %1128 = vrot.lane.b32.xlu0 %v617_v47, %s3688_s12  ;;  %3324 = vmatmul.mubr.msk.f32.gmra.mrb[16].mxu0 %vm1946_vm11, %v1926_v34  ;;  %v5748_v47 = vld [vmem:[#allocation43_spill] sm:$0xff] }
 0x25b   : > { %v1235_v26 = vpop.permute.xlu1 %1234  ;;  %3386 = vmatmul.mubr.msk.f32.gmra.mrb[24].mxu1 %vm254_vm0, %v5745_v25 }
 0x25c   : > { %v1363_v50 = vpop.permute.xlu0 %1362  ;;  %3388 = vmatprep.mubr.msk.f32.mxu1 %vm254_vm0, %v5747_v2  ;;  %v1828_v56 = vsel %vm1809_vm7, %v1795_v37, %v1235_v26 }
 0x25d   : > { %1634 = vrot.lane.b32.xlu1 %v648_v15, %s3692_s28  ;;  %v1861_v39 = vsel %vm1842_vm8, %v1828_v56, %v1363_v50 }
 0x25e   : > { %1636 = vrot.lane.b32.xlu0 %v649_v9, %s3692_s28 }
 0x25f   : > { %v1237_v61 = vpop.permute.xlu1 %1236  ;;  %3389 = vmatmul.mubr.msk.f32.gmra.mrb[26].mxu1 %vm254_vm0, %v5748_v47 }
 0x260   : > { %v1365_v4 = vpop.permute.xlu0 %1364  ;;  %v1829_v38 = vsel %vm1809_vm7, %v1796_v11, %v1237_v61  ;;  %3391 = vmatprep.mubr.msk.f32.mxu1 %vm254_vm0, %v5749_v59  ;;  %v652_v61 = vld [vmem:[#allocation2 + $0x19a] sm:$0xff]  ;;  %v653_v11 = vld [vmem:[#allocation2 + $0x1a2] sm:$0xff] }
 0x261   : > { %1254 = vrot.lane.b32.xlu1 %v648_v15, %s3689_s30  ;;  %v1862_v1 = vsel %vm1842_vm8, %v1829_v38, %v1365_v4  ;;  %v588_v15 = vld [vmem:[#allocation2 + $0x198] sm:$0xff] }
 0x262   : > { %1382 = vrot.lane.b32.xlu0 %v586_v35, %s3690_s6 }
 0x263   : > { %v5045_v54 = vpop.permute.xlu1 %982  ;;  %3392 = vmatmul.mubr.msk.f32.gmra.mrb[28].mxu1 %vm254_vm0, %v5750_v57 }
 0x264   : > { %v5047_v23 = vpop.permute.xlu0 %984  ;;  %3394 = vmatprep.mubr.msk.f32.mxu1 %vm254_vm0, %v4733_v51  ;;  %v589_v51 = vld [vmem:[#allocation2 + $0x1a0] sm:$0xff] }
 0x265   : > { %1256 = vrot.lane.b32.xlu1 %v649_v9, %s3689_s30 }
 0x266   : > { %1384 = vrot.lane.b32.xlu0 %v587_v27, %s3690_s6 }
 0x267   : > { %v1491_v21 = vpop.permute.xlu1 %1490  ;;  %3395 = vmatmul.mubr.msk.f32.gmra.mrb[30].mxu1 %vm254_vm0, %v4741_v18  ;;  %v5751_v18 = vld [vmem:[#allocation57_spill] sm:$0xff] }
 0x268   : > { %v1493_v58 = vpop.permute.xlu0 %1492  ;;  %v1894_v10 = vsel %vm1875_vm9, %v1861_v39, %v1491_v21  ;;  %v1698_v30 = vsel %vm254_vm0, %v4710_v46, %v5751_v18 }
 0x269   : > { %1002 = vrot.lane.b32.xlu1 %v586_v35, %s3687_s11  ;;  %v1895_v0 = vsel %vm1875_vm9, %v1862_v1, %v1493_v58  ;;  %v5752_v35 = vld [vmem:[#allocation61_spill] sm:$0xff]  ;;  %v1731_v32 = vsel %vm1710_vm4, %v1698_v30, %v5753_v36 }
 0x26a   : > { %1004 = vrot.lane.b32.xlu0 %v587_v27, %s3687_s11  ;;  %v1699_v4 = vsel %vm254_vm0, %v4721_v5, %v5752_v35  ;;  %v1764_v22 = vsel %vm1743_vm5, %v1731_v32, %v5045_v54  ;;  %s3575_s11 = scalar_lea.vmem %s5478_s26, 4096 }
 0x26b   : > { %v1111_v53 = vpop.permute.xlu1 %1110  ;;  %v1732_v19 = vsel %vm1710_vm4, %v1699_v4, %v5754_v12  ;;  %p3576_p11 = scmp.ne.s32.totalorder %s5478_s26, %s3575_s11 }
 0x26c   : > { %v1113_v24 = vpop.permute.xlu0 %1112  ;;  %v1765_v46 = vsel %vm1743_vm5, %v1732_v19, %v5047_v23  ;;  %v1797_v21 = vsel %vm1776_vm6, %v1764_v22, %v1111_v53 }
 0x26d   : > { %1510 = vrot.lane.b32.xlu1 %v618_v8, %s3691_s7  ;;  %v1798_v42 = vsel %vm1776_vm6, %v1765_v46, %v1113_v24  ;;  %p3577_p2 = pnand %p3576_p11, %p5775_p0 }
 0x26e   : > { %1512 = vrot.lane.b32.xlu0 %v619_v20, %s3691_s7 }
 0x26f   : > { %v1619_v48 = vpop.permute.xlu1 %1618  ;;  %p3578_p3 = pneg %p3577_p2 }
 0x270   : > { %v1927_v14 = vsel %vm1908_vm10, %v1894_v10, %v1619_v48  ;;  %v1621_v7 = vpop.permute.xlu0 %1620 }
 0x271   : > { %v1928_v3 = vsel %vm1908_vm10, %v1895_v0, %v1621_v7  ;;  %1130 = vrot.lane.b32.xlu1 %v618_v8, %s3688_s12  ;;  %3326 = vmatprep.mubr.msk.f32.mxu0 %vm1946_vm11, %v1927_v14 }
 0x272   : > { %1132 = vrot.lane.b32.xlu0 %v619_v20, %s3688_s12  ;;  %3327 = vmatmul.mubr.msk.f32.gmra.mrb[18].mxu0 %vm1946_vm11, %v1928_v3  ;;  %v5755_v3 = vld [vmem:[#allocation60_spill] sm:$0xff]  ;;  %s3693_s12 = smov [#allocation9]  }
 0x273   : > { %v1239_v52 = vpop.permute.xlu1 %1238 }
 0x274   : > { %v1367_v28 = vpop.permute.xlu0 %1366  ;;  %v1830_v23 = vsel %vm1809_vm7, %v1797_v21, %v1239_v52 }
 0x275   : > { %1638 = vrot.lane.b32.xlu1 %v650_v40, %s3692_s28  ;;  %v1863_v37 = vsel %vm1842_vm8, %v1830_v23, %v1367_v28 }
 0x276   : > { %1640 = vrot.lane.b32.xlu0 %v651_v55, %s3692_s28 }
 0x277   : > { %v1241_v34 = vpop.permute.xlu1 %1240 }
 0x278   : > { %v1369_v26 = vpop.permute.xlu0 %1368  ;;  %v1831_v41 = vsel %vm1809_vm7, %v1798_v42, %v1241_v34 }
 0x279   : > { %1258 = vrot.lane.b32.xlu1 %v650_v40, %s3689_s30  ;;  %v1864_v56 = vsel %vm1842_vm8, %v1831_v41, %v1369_v26  ;;  %v1700_v40 = vsel %vm254_vm0, %v4773_v33, %v5755_v3 }
 0x27a   : > { %1386 = vrot.lane.b32.xlu0 %v588_v15, %s3690_s6  ;;  %v5756_v15 = vld [vmem:[#allocation63_spill] sm:$0xff] }
 0x27b   : > { %v5105_v9 = vpop.permute.xlu1 %986  ;;  %v1701_v26 = vsel %vm254_vm0, %v4781_v31, %v5756_v15 }
 0x27c   : > { %v5107_v50 = vpop.permute.xlu0 %988 }
 0x27d   : > { %1260 = vrot.lane.b32.xlu1 %v651_v55, %s3689_s30  ;;  %s3579_s30 = sshll.u32 %s3693_s12, 4  ;;  %s3580_s30 = int_to_ptr.vmem [resolvable:$false] %s3579_s30 }
 0x27e   : > { %1514 = vrot.lane.b32.xlu0 %v620_v29, %s3691_s7  ;;  %v5757_v29 = vld [vmem:[#allocation80_spill] sm:$0xff]  ;;  %p3582_p7 = scmp.lt.s32.totalorder %s5478_s26, %s3580_s30 }
 0x27f   : > { %v1495_v63 = vpop.permute.xlu1 %1494 }
 0x280   : > { %v1497_v27 = vpop.permute.xlu0 %1496  ;;  %v1896_v53 = vsel %vm1875_vm9, %v1863_v37, %v1495_v63  ;;  %v5758_v63 = vld [vmem:[#allocation83_spill] sm:$0xff] }
 0x281   : > { %1388 = vrot.lane.b32.xlu1 %v589_v51, %s3690_s6  ;;  %v3301_v13 = vpop.f32.mrb[0].mxu0  ;;  %v1897_v38 = vsel %vm1875_vm9, %v1864_v56, %v1497_v27  ;;  %v1733_v51 = vsel %vm1710_vm4, %v1700_v40, %v5757_v29  ;;  %s3581_s6 = scalar_lea.vmem %s3580_s30, 8192 }
 0x282   : > { %v2598_v5 = vsel %vm1710_vm4, %v3301_v13, 0.0  ;;  %v2669_v45 = vmul.f32 %v3301_v13, %v3301_v13  ;;  %2943 = vst.msk [vmem:[%s5130_s27 + $0x8] sm:$0xff] %vm1710_vm4, %v3301_v13  ;;  %1642 = vrot.lane.b32.xlu0 %v652_v61, %s3692_s28  ;;  %v2113_v54 = vpop.f32.mrb[1].mxu0  ;;  %v1734_v61 = vsel %vm1710_vm4, %v1701_v26, %v5758_v63  ;;  %v1766_v33 = vsel %vm1743_vm5, %v1733_v51, %v5105_v9  ;;  %p3583_p9 = scmp.lt.s32.totalorder %s3581_s6, %s3575_s11 }
 0x283   : > { %v2597_v62 = vsel %vm1710_vm4, %v2113_v54, 0.0  ;;  %v2668_v58 = vmul.f32 %v2113_v54, %v2113_v54  ;;  %2942 = vst.msk [vmem:[%s5130_s27] sm:$0xff] %vm1710_vm4, %v2113_v54  ;;  %v1115_v25 = vpop.permute.xlu1 %1114  ;;  %v1767_v36 = vsel %vm1743_vm5, %v1734_v61, %v5107_v50 }
 0x284   : > { %v2701_v49 = vsel %vm1710_vm4, %v2669_v45, 0.0  ;;  %v2599_v60 = vadd.f32 %v2598_v5, %v2597_v62  ;;  %v1117_v2 = vpop.permute.xlu0 %1116  ;;  %v1799_v31 = vsel %vm1776_vm6, %v1766_v33, %v1115_v25  ;;  %p3584_p12 = por %p3583_p9, %p3582_p7 }
 0x285   : > { %v2700_v43 = vsel %vm1710_vm4, %v2668_v58, 0.0  ;;  %1516 = vrot.lane.b32.xlu1 %v621_v6, %s3691_s7  ;;  %v1800_v12 = vsel %vm1776_vm6, %v1767_v36, %v1117_v2 }
 0x286   : > { %v2702_v8 = vadd.f32 %v2701_v49, %v2700_v43  ;;  %p3585_p1 = pnand %p3584_p12, %p3578_p3 }
 0x287   : > { %v1623_v20 = vpop.permute.xlu1 %1622 }
 0x288   : > { %v1929_v24 = vsel %vm1908_vm10, %v1896_v53, %v1623_v20  ;;  %v1625_v47 = vpop.permute.xlu0 %1624 }
 0x289   : > { %v1930_v59 = vsel %vm1908_vm10, %v1897_v38, %v1625_v47  ;;  %1644 = vrot.lane.b32.xlu1 %v653_v11, %s3692_s28  ;;  %3329 = vmatprep.mubr.msk.f32.mxu0 %vm1946_vm11, %v1929_v24 }
 0x28a   : > { %3330 = vmatmul.mubr.msk.f32.gmra.mrb[20].mxu0 %vm1946_vm11, %v1930_v59  ;;  %v5759_v59 = vld [vmem:[#allocation62_spill] sm:$0xff] }
 0x28b   : > { %v1243_v39 = vpop.permute.xlu1 %1242 }
 0x28c   : > { %v1371_v1 = vpop.permute.xlu0 %1370  ;;  %v1832_v19 = vsel %vm1809_vm7, %v1799_v31, %v1243_v39  ;;  %v1702_v39 = vsel %vm254_vm0, %v4822_v44, %v5759_v59 }
 0x28d   : > { %v1865_v5 = vsel %vm1842_vm8, %v1832_v19, %v1371_v1 }
 0x28f   : > { %v1245_v10 = vpop.permute.xlu1 %1244 }
 0x290   : > { %v1373_v48 = vpop.permute.xlu0 %1372  ;;  %v1833_v9 = vsel %vm1809_vm7, %v1800_v12, %v1245_v10 }
 0x291   : > { %v1866_v50 = vsel %vm1842_vm8, %v1833_v9, %v1373_v48  ;;  %v5760_v48 = vld [vmem:[#allocation65_spill] sm:$0xff] }
 0x293   : > { %v5153_v0 = vpop.permute.xlu1 %990 }
 0x294   : > { %v5155_v14 = vpop.permute.xlu0 %992 }
 0x295   : > { %v3304_v7 = vpop.f32.mrb[2].mxu0 }
 0x296   : > { %2945 = vst.msk [vmem:[%s5130_s27 + $0x18] sm:$0xff] %vm1710_vm4, %v3304_v7  ;;  %v2123_v57 = vpop.f32.mrb[3].mxu0  ;;  %v2671_v52 = vmul.f32 %v3304_v7, %v3304_v7  ;;  %v2602_v35 = vsel %vm1710_vm4, %v3304_v7, 0.0  ;;  %v1703_v7 = vsel %vm254_vm0, %v4827_v17, %v5760_v48 }
 0x297   : > { %v2600_v55 = vsel %vm1710_vm4, %v2123_v57, 0.0  ;;  %v2670_v28 = vmul.f32 %v2123_v57, %v2123_v57  ;;  %2944 = vst.msk [vmem:[%s5130_s27 + $0x10] sm:$0xff] %vm1710_vm4, %v2123_v57  ;;  %v1499_v34 = vpop.permute.xlu1 %1498  ;;  %v5761_v57 = vld [vmem:[#allocation82_spill] sm:$0xff] }
 0x298   : > { %v2601_v18 = vadd.f32 %v2600_v55, %v2599_v60  ;;  %v1501_v30 = vpop.permute.xlu0 %1500  ;;  %v2705_v22 = vsel %vm1710_vm4, %v2671_v52, 0.0  ;;  %v1898_v45 = vsel %vm1875_vm9, %v1865_v5, %v1499_v34  ;;  %v1735_v3 = vsel %vm1710_vm4, %v1702_v39, %v5761_v57  ;;  %v5762_v55 = vld [vmem:[#allocation85_spill] sm:$0xff] }
 0x299   : > { %v2703_v4 = vsel %vm1710_vm4, %v2670_v28, 0.0  ;;  %v1899_v6 = vsel %vm1875_vm9, %v1866_v50, %v1501_v30  ;;  %v1736_v28 = vsel %vm1710_vm4, %v1703_v7, %v5762_v55  ;;  %v1768_v34 = vsel %vm1743_vm5, %v1735_v3, %v5153_v0 }
 0x29a   : > { %v2704_v32 = vadd.f32 %v2703_v4, %v2702_v8  ;;  %v2603_v27 = vadd.f32 %v2602_v35, %v2601_v18  ;;  %v1769_v44 = vsel %vm1743_vm5, %v1736_v28, %v5155_v14 }
 0x29b   : > { %v1119_v13 = vpop.permute.xlu1 %1118 }
 0x29c   : > { %v1121_v46 = vpop.permute.xlu0 %1120  ;;  %v2706_v21 = vadd.f32 %v2705_v22, %v2704_v32  ;;  %v1801_v15 = vsel %vm1776_vm6, %v1768_v34, %v1119_v13 }
 0x29d   : > { %v1802_v26 = vsel %vm1776_vm6, %v1769_v44, %v1121_v46 }
 0x29f   : > { %v1627_v54 = vpop.permute.xlu1 %1626 }
 0x2a0   : > { %v1931_v42 = vsel %vm1908_vm10, %v1898_v45, %v1627_v54  ;;  %v1629_v23 = vpop.permute.xlu0 %1628 }
 0x2a1   : > { %v1932_v62 = vsel %vm1908_vm10, %v1899_v6, %v1629_v23  ;;  %3332 = vmatprep.mubr.msk.f32.mxu0 %vm1946_vm11, %v1931_v42  ;;  %v391_v42 = vld [vmem:[#allocation2 + $0x138] sm:$0xff] }
 0x2a2   : > { %3333 = vmatmul.mubr.msk.f32.gmra.mrb[22].mxu0 %vm1946_vm11, %v1932_v62 }
 0x2a3   : > { %v1247_v58 = vpop.permute.xlu1 %1246 }
 0x2a4   : > { %v1375_v25 = vpop.permute.xlu0 %1374  ;;  %v1834_v17 = vsel %vm1809_vm7, %v1801_v15, %v1247_v58  ;;  %v5763_v58 = vld [vmem:[#allocation64_spill] sm:$0xff] }
 0x2a5   : > { %v1867_v30 = vsel %vm1842_vm8, %v1834_v17, %v1375_v25  ;;  %v1704_v25 = vsel %vm254_vm0, %v391_v42, %v5763_v58 }
 0x2a7   : > { %v1249_v41 = vpop.permute.xlu1 %1248 }
 0x2a8   : > { %v1377_v49 = vpop.permute.xlu0 %1376  ;;  %v1835_v51 = vsel %vm1809_vm7, %v1802_v26, %v1249_v41 }
 0x2a9   : > { %v3307_v60 = vpop.f32.mrb[4].mxu0  ;;  %v1868_v63 = vsel %vm1842_vm8, %v1835_v51, %v1377_v49  ;;  %v5764_v49 = vld [vmem:[#allocation67_spill] sm:$0xff] }
 0x2aa   : > { %2947 = vst.msk [vmem:[%s5130_s27 + $0x28] sm:$0xff] %vm1710_vm4, %v3307_v60  ;;  %v2133_v2 = vpop.f32.mrb[5].mxu0  ;;  %v2673_v43 = vmul.f32 %v3307_v60, %v3307_v60  ;;  %v2606_v20 = vsel %vm1710_vm4, %v3307_v60, 0.0  ;;  %v1705_v60 = vsel %vm254_vm0, %v4874_v16, %v5764_v49 }
 0x2ab   : > { %v2604_v37 = vsel %vm1710_vm4, %v2133_v2, 0.0  ;;  %v2672_v8 = vmul.f32 %v2133_v2, %v2133_v2  ;;  %2946 = vst.msk [vmem:[%s5130_s27 + $0x20] sm:$0xff] %vm1710_vm4, %v2133_v2  ;;  %v995_v11 = vpop.permute.xlu1 %994  ;;  %v5765_v2 = vld [vmem:[#allocation84_spill] sm:$0xff] }
 0x2ac   : > { %v2605_v56 = vadd.f32 %v2604_v37, %v2603_v27  ;;  %v997_v53 = vpop.permute.xlu0 %996  ;;  %v2709_v1 = vsel %vm1710_vm4, %v2673_v43, 0.0  ;;  %v1737_v43 = vsel %vm1710_vm4, %v1704_v25, %v5765_v2 }
 0x2ad   : > { %v2707_v38 = vsel %vm1710_vm4, %v2672_v8, 0.0  ;;  %v5766_v8 = vld [vmem:[#allocation87_spill] sm:$0xff] }
 0x2ae   : > { %v2708_v24 = vadd.f32 %v2707_v38, %v2706_v21  ;;  %v2607_v47 = vadd.f32 %v2606_v20, %v2605_v56  ;;  %v1738_v56 = vsel %vm1710_vm4, %v1705_v60, %v5766_v8  ;;  %v1770_v20 = vsel %vm1743_vm5, %v1737_v43, %v995_v11 }
 0x2af   : > { %v1503_v10 = vpop.permute.xlu1 %1502  ;;  %v1771_v38 = vsel %vm1743_vm5, %v1738_v56, %v997_v53 }
 0x2b0   : > { %v1505_v40 = vpop.permute.xlu0 %1504  ;;  %v2710_v52 = vadd.f32 %v2709_v1, %v2708_v24  ;;  %v1900_v0 = vsel %vm1875_vm9, %v1867_v30, %v1503_v10 }
 0x2b1   : > { %v1901_v14 = vsel %vm1875_vm9, %v1868_v63, %v1505_v40 }
 0x2b3   : > { %v1123_v29 = vpop.permute.xlu1 %1122 }
 0x2b4   : > { %v1125_v18 = vpop.permute.xlu0 %1124  ;;  %v1803_v24 = vsel %vm1776_vm6, %v1770_v20, %v1123_v29 }
 0x2b7   : > { %v1631_v61 = vpop.permute.xlu1 %1630 }
 0x2b8   : > { %v1933_v33 = vsel %vm1908_vm10, %v1900_v0, %v1631_v61  ;;  %v1633_v35 = vpop.permute.xlu0 %1632 }
 0x2b9   : > { %v1934_v4 = vsel %vm1908_vm10, %v1901_v14, %v1633_v35  ;;  %3335 = vmatprep.mubr.msk.f32.mxu0 %vm1946_vm11, %v1933_v33  ;;  %v393_v35 = vld [vmem:[#allocation2 + $0x150] sm:$0xff] }
 0x2ba   : > { %3336 = vmatmul.mubr.msk.f32.gmra.mrb[24].mxu0 %vm1946_vm11, %v1934_v4  ;;  %v394_v4 = vld [vmem:[#allocation2 + $0x158] sm:$0xff] }
 0x2bb   : > { %v1251_v36 = vpop.permute.xlu1 %1250 }
 0x2bc   : > { %v1379_v31 = vpop.permute.xlu0 %1378  ;;  %v1836_v59 = vsel %vm1809_vm7, %v1803_v24, %v1251_v36 }
 0x2bd   : > { %v3310_v32 = vpop.f32.mrb[6].mxu0  ;;  %v1869_v10 = vsel %vm1842_vm8, %v1836_v59, %v1379_v31  ;;  %v5767_v31 = vld [vmem:[#allocation66_spill] sm:$0xff] }
 0x2be   : > { %2949 = vst.msk [vmem:[%s5130_s27 + $0x38] sm:$0xff] %vm1710_vm4, %v3310_v32  ;;  %v2143_v27 = vpop.f32.mrb[7].mxu0  ;;  %v2675_v12 = vmul.f32 %v3310_v32, %v3310_v32  ;;  %v2610_v21 = vsel %vm1710_vm4, %v3310_v32, 0.0  ;;  %v1706_v32 = vsel %vm254_vm0, %v393_v35, %v5767_v31 }
 0x2bf   : > { %v2608_v19 = vsel %vm1710_vm4, %v2143_v27, 0.0  ;;  %v2674_v22 = vmul.f32 %v2143_v27, %v2143_v27  ;;  %2948 = vst.msk [vmem:[%s5130_s27 + $0x30] sm:$0xff] %vm1710_vm4, %v2143_v27  ;;  %v1253_v13 = vpop.permute.xlu1 %1252  ;;  %v5768_v27 = vld [vmem:[#allocation69_spill] sm:$0xff] }
 0x2c0   : > { %v2609_v9 = vadd.f32 %v2608_v19, %v2607_v47  ;;  %v1381_v46 = vpop.permute.xlu0 %1380  ;;  %v2713_v54 = vsel %vm1710_vm4, %v2675_v12, 0.0  ;;  %v1804_v47 = vsel %vm1776_vm6, %v1771_v38, %v1125_v18  ;;  %v1707_v12 = vsel %vm254_vm0, %v394_v4, %v5768_v27 }
 0x2c1   : > { %v2711_v5 = vsel %vm1710_vm4, %v2674_v22, 0.0  ;;  %v1837_v16 = vsel %vm1809_vm7, %v1804_v47, %v1253_v13  ;;  %v5769_v22 = vld [vmem:[#allocation86_spill] sm:$0xff]  ;;  %v395_v47 = vld [vmem:[#allocation2 + $0x168] sm:$0xff] }
 0x2c2   : > { %v2712_v50 = vadd.f32 %v2711_v5, %v2710_v52  ;;  %v2611_v45 = vadd.f32 %v2610_v21, %v2609_v9  ;;  %v1870_v48 = vsel %vm1842_vm8, %v1837_v16, %v1381_v46  ;;  %v1739_v13 = vsel %vm1710_vm4, %v1706_v32, %v5769_v22  ;;  %v5770_v9 = vld [vmem:[#allocation89_spill] sm:$0xff] }
 0x2c3   : > { %v999_v6 = vpop.permute.xlu1 %998  ;;  %v1740_v46 = vsel %vm1710_vm4, %v1707_v12, %v5770_v9 }
 0x2c4   : > { %v1001_v23 = vpop.permute.xlu0 %1000  ;;  %v2714_v62 = vadd.f32 %v2713_v54, %v2712_v50  ;;  %v1772_v5 = vsel %vm1743_vm5, %v1739_v13, %v999_v6 }
 0x2c5   : > { %v1773_v50 = vsel %vm1743_vm5, %v1740_v46, %v1001_v23 }
 0x2c7   : > { %v1507_v41 = vpop.permute.xlu1 %1506 }
 0x2c8   : > { %v1509_v37 = vpop.permute.xlu0 %1508  ;;  %v1902_v11 = vsel %vm1875_vm9, %v1869_v10, %v1507_v41 }
 0x2c9   : > { %v1903_v53 = vsel %vm1875_vm9, %v1870_v48, %v1509_v37 }
 0x2cb   : > { %v1127_v39 = vpop.permute.xlu1 %1126 }
 0x2cc   : > { %v1129_v1 = vpop.permute.xlu0 %1128 }
 0x2cd   : > { %v1806_v54 = vsel %vm1776_vm6, %v1773_v50, %v1129_v1 }
 0x2cf   : > { %v1635_v7 = vpop.permute.xlu1 %1634 }
 0x2d0   : > { %v1935_v57 = vsel %vm1908_vm10, %v1902_v11, %v1635_v7  ;;  %v1637_v3 = vpop.permute.xlu0 %1636  ;;  %v5771_v7 = vld [vmem:[#allocation68_spill] sm:$0xff] }
 0x2d1   : > { %v1936_v40 = vsel %vm1908_vm10, %v1903_v53, %v1637_v3  ;;  %v3313_v52 = vpop.f32.mrb[8].mxu0  ;;  %3338 = vmatprep.mubr.msk.f32.mxu0 %vm1946_vm11, %v1935_v57  ;;  %v1708_v53 = vsel %vm254_vm0, %v395_v47, %v5771_v7 }
 0x2d2   : > { %2951 = vst.msk [vmem:[%s5130_s27 + $0x48] sm:$0xff] %vm1710_vm4, %v3313_v52  ;;  %v2153_v55 = vpop.f32.mrb[9].mxu0  ;;  %3339 = vmatmul.mubr.msk.f32.gmra.mrb[26].mxu0 %vm1946_vm11, %v1936_v40  ;;  %v2677_v28 = vmul.f32 %v3313_v52, %v3313_v52  ;;  %v2614_v29 = vsel %vm1710_vm4, %v3313_v52, 0.0  ;;  %v5772_v40 = vld [vmem:[#allocation88_spill] sm:$0xff] }
 0x2d3   : > { %v2612_v34 = vsel %vm1710_vm4, %v2153_v55, 0.0  ;;  %v2676_v44 = vmul.f32 %v2153_v55, %v2153_v55  ;;  %2950 = vst.msk [vmem:[%s5130_s27 + $0x40] sm:$0xff] %vm1710_vm4, %v2153_v55  ;;  %v1255_v15 = vpop.permute.xlu1 %1254  ;;  %v1741_v52 = vsel %vm1710_vm4, %v1708_v53, %v5772_v40 }
 0x2d4   : > { %v2613_v26 = vadd.f32 %v2612_v34, %v2611_v45  ;;  %v1383_v17 = vpop.permute.xlu0 %1382  ;;  %v2717_v63 = vsel %vm1710_vm4, %v2677_v28, 0.0  ;;  %v1805_v45 = vsel %vm1776_vm6, %v1772_v5, %v1127_v39 }
 0x2d5   : > { %v2715_v51 = vsel %vm1710_vm4, %v2676_v44, 0.0  ;;  %v1838_v42 = vsel %vm1809_vm7, %v1805_v45, %v1255_v15 }
 0x2d6   : > { %v2716_v18 = vadd.f32 %v2715_v51, %v2714_v62  ;;  %v2615_v30 = vadd.f32 %v2614_v29, %v2613_v26  ;;  %v1871_v49 = vsel %vm1842_vm8, %v1838_v42, %v1383_v17  ;;  %v396_v26 = vld [vmem:[#allocation2 + $0x170] sm:$0xff] }
 0x2d7   : > { %v1257_v0 = vpop.permute.xlu1 %1256 }
 0x2d8   : > { %v1385_v61 = vpop.permute.xlu0 %1384  ;;  %v2718_v14 = vadd.f32 %v2717_v63, %v2716_v18  ;;  %v1839_v62 = vsel %vm1809_vm7, %v1806_v54, %v1257_v0 }
 0x2d9   : > { %v1872_v60 = vsel %vm1842_vm8, %v1839_v62, %v1385_v61  ;;  %v5774_v61 = vld [vmem:[#allocation90_spill] sm:$0xff] }
 0x2db   : > { %v1003_v33 = vpop.permute.xlu1 %1002 }
 0x2dc   : > { %v1005_v36 = vpop.permute.xlu0 %1004  ;;  %v1774_v55 = vsel %vm1743_vm5, %v1741_v52, %v1003_v33 }
 0x2df   : > { %v1511_v19 = vpop.permute.xlu1 %1510 }
 0x2e0   : > { %v1513_v21 = vpop.permute.xlu0 %1512  ;;  %v1904_v23 = vsel %vm1875_vm9, %v1871_v49, %v1511_v19 }
 0x2e1   : > { %v1905_v56 = vsel %vm1875_vm9, %v1872_v60, %v1513_v21 }
 0x2e3   : > { %v1131_v58 = vpop.permute.xlu1 %1130 }
 0x2e4   : > { %v1133_v25 = vpop.permute.xlu0 %1132  ;;  %v1807_v28 = vsel %vm1776_vm6, %v1774_v55, %v1131_v58 }
 0x2e5   : > { %v3316_v41 = vpop.f32.mrb[10].mxu0 }
 0x2e6   : > { %2953 = vst.msk [vmem:[%s5130_s27 + $0x58] sm:$0xff] %vm1710_vm4, %v3316_v41  ;;  %v2163_v6 = vpop.f32.mrb[11].mxu0  ;;  %v2679_v2 = vmul.f32 %v3316_v41, %v3316_v41  ;;  %v2618_v59 = vsel %vm1710_vm4, %v3316_v41, 0.0 }
 0x2e7   : > { %v2616_v43 = vsel %vm1710_vm4, %v2163_v6, 0.0  ;;  %v2678_v37 = vmul.f32 %v2163_v6, %v2163_v6  ;;  %2952 = vst.msk [vmem:[%s5130_s27 + $0x50] sm:$0xff] %vm1710_vm4, %v2163_v6  ;;  %v1639_v8 = vpop.permute.xlu1 %1638 }
 0x2e8   : > { %v2617_v20 = vadd.f32 %v2616_v43, %v2615_v30  ;;  %v1937_v38 = vsel %vm1908_vm10, %v1904_v23, %v1639_v8  ;;  %v1641_v24 = vpop.permute.xlu0 %1640  ;;  %v2721_v48 = vsel %vm1710_vm4, %v2679_v2, 0.0  ;;  %v5773_v30 = vld [vmem:[#allocation70_spill] sm:$0xff] }
 0x2e9   : > { %v2719_v39 = vsel %vm1710_vm4, %v2678_v37, 0.0  ;;  %v1938_v16 = vsel %vm1908_vm10, %v1905_v56, %v1641_v24  ;;  %3341 = vmatprep.mubr.msk.f32.mxu0 %vm1946_vm11, %v1937_v38  ;;  %v1709_v63 = vsel %vm254_vm0, %v396_v26, %v5773_v30 }
 0x2ea   : > { %v2720_v1 = vadd.f32 %v2719_v39, %v2718_v14  ;;  %3342 = vmatmul.mubr.msk.f32.gmra.mrb[28].mxu0 %vm1946_vm11, %v1938_v16  ;;  %v2619_v10 = vadd.f32 %v2618_v59, %v2617_v20  ;;  %v1742_v14 = vsel %vm1710_vm4, %v1709_v63, %v5774_v61  ;;  %v3351_v58 = vpop.f32.mrb[0].mxu1 }
 0x2eb   : > { %v1259_v11 = vpop.permute.xlu1 %1258  ;;  %v1775_v33 = vsel %vm1743_vm5, %v1742_v14, %v1005_v36  ;;  %v2771_v41 = vsel %vm1710_vm4, %v3351_v58, 0.0  ;;  %v2841_v49 = vmul.f32 %v3351_v58, %v3351_v58 }
 0x2ec   : > { %v1387_v57 = vpop.permute.xlu0 %1386  ;;  %v2722_v3 = vadd.f32 %v2721_v48, %v2720_v1  ;;  %v1840_v44 = vsel %vm1809_vm7, %v1807_v28, %v1259_v11  ;;  %v1808_v4 = vsel %vm1776_vm6, %v1775_v33, %v1133_v25  ;;  %v2438_v25 = vpop.f32.mrb[1].mxu1 }
 0x2ed   : > { %v1873_v17 = vsel %vm1842_vm8, %v1840_v44, %v1387_v57  ;;  %v2770_v60 = vsel %vm1710_vm4, %v2438_v25, 0.0  ;;  %v2840_v6 = vmul.f32 %v2438_v25, %v2438_v25  ;;  %v2873_v37 = vsel %vm1710_vm4, %v2841_v49, 0.0 }
 0x2ee   : > { %v2772_v2 = vadd.f32 %v2771_v41, %v2770_v60 }
 0x2ef   : > { %v1261_v34 = vpop.permute.xlu1 %1260  ;;  %v2872_v8 = vsel %vm1710_vm4, %v2840_v6, 0.0 }
 0x2f0   : > { %v1515_v15 = vpop.permute.xlu0 %1514  ;;  %v1841_v31 = vsel %vm1809_vm7, %v1808_v4, %v1261_v34  ;;  %v2874_v38 = vadd.f32 %v2873_v37, %v2872_v8 }
 0x2f1   : > { %v1906_v51 = vsel %vm1875_vm9, %v1873_v17, %v1515_v15 }
 0x2f3   : > { %v1389_v29 = vpop.permute.xlu1 %1388 }
 0x2f4   : > { %v1643_v18 = vpop.permute.xlu0 %1642  ;;  %v1874_v32 = vsel %vm1842_vm8, %v1841_v31, %v1389_v29 }
 0x2f5   : > { %v1939_v0 = vsel %vm1908_vm10, %v1906_v51, %v1643_v18 }
 0x2f6   : > { %3344 = vmatprep.mubr.msk.f32.mxu0 %vm1946_vm11, %v1939_v0 }
 0x2f7   : > { %v1517_v35 = vpop.permute.xlu1 %1516 }
 0x2f8   : > { %v1907_v27 = vsel %vm1875_vm9, %v1874_v32, %v1517_v35 }
 0x2fb   : > { %v1645_v12 = vpop.permute.xlu1 %1644 }
 0x2fc   : > { %v1940_v19 = vsel %vm1908_vm10, %v1907_v27, %v1645_v12 }
 0x2fd   : > { %v3319_v22 = vpop.f32.mrb[12].mxu0  ;;  %3345 = vmatmul.mubr.msk.f32.gmra.mrb[30].mxu0 %vm1946_vm11, %v1940_v19 }
 0x2fe   : > { %2955 = vst.msk [vmem:[%s5130_s27 + $0x68] sm:$0xff] %vm1710_vm4, %v3319_v22  ;;  %v2173_v13 = vpop.f32.mrb[13].mxu0  ;;  %v2681_v9 = vmul.f32 %v3319_v22, %v3319_v22  ;;  %v2622_v5 = vsel %vm1710_vm4, %v3319_v22, 0.0  ;;  %v3354_v23 = vpop.f32.mrb[2].mxu1 }
 0x2ff   : > { %v2620_v36 = vsel %vm1710_vm4, %v2173_v13, 0.0  ;;  %v2680_v46 = vmul.f32 %v2173_v13, %v2173_v13  ;;  %2954 = vst.msk [vmem:[%s5130_s27 + $0x60] sm:$0xff] %vm1710_vm4, %v2173_v13  ;;  %v2448_v43 = vpop.f32.mrb[3].mxu1  ;;  %v2775_v24 = vsel %vm1710_vm4, %v3354_v23, 0.0  ;;  %v2843_v47 = vmul.f32 %v3354_v23, %v3354_v23 }
 0x300   : > { %v2621_v21 = vadd.f32 %v2620_v36, %v2619_v10  ;;  %v2725_v42 = vsel %vm1710_vm4, %v2681_v9, 0.0  ;;  %v2773_v56 = vsel %vm1710_vm4, %v2448_v43, 0.0  ;;  %v2842_v20 = vmul.f32 %v2448_v43, %v2448_v43 }
 0x301   : > { %v2723_v50 = vsel %vm1710_vm4, %v2680_v46, 0.0  ;;  %v2774_v59 = vadd.f32 %v2773_v56, %v2772_v2  ;;  %v2877_v1 = vsel %vm1710_vm4, %v2843_v47, 0.0 }
 0x302   : > { %v2724_v45 = vadd.f32 %v2723_v50, %v2722_v3  ;;  %v2623_v54 = vadd.f32 %v2622_v5, %v2621_v21  ;;  %v2875_v39 = vsel %vm1710_vm4, %v2842_v20, 0.0  ;;  %v3357_v16 = vpop.f32.mrb[4].mxu1 }
 0x303   : > { %v2876_v10 = vadd.f32 %v2875_v39, %v2874_v38  ;;  %v2845_v48 = vmul.f32 %v3357_v16, %v3357_v16  ;;  %v2458_v11 = vpop.f32.mrb[5].mxu1  ;;  %v2776_v53 = vadd.f32 %v2775_v24, %v2774_v59  ;;  %v2779_v55 = vsel %vm1710_vm4, %v3357_v16, 0.0 }
 0x304   : > { %v2726_v62 = vadd.f32 %v2725_v42, %v2724_v45  ;;  %v2777_v57 = vsel %vm1710_vm4, %v2458_v11, 0.0  ;;  %v2844_v3 = vmul.f32 %v2458_v11, %v2458_v11 }
 0x305   : > { %v2881_v28 = vsel %vm1710_vm4, %v2845_v48, 0.0  ;;  %v2878_v34 = vadd.f32 %v2877_v1, %v2876_v10  ;;  %v2778_v26 = vadd.f32 %v2777_v57, %v2776_v53 }
 0x306   : > { %v2879_v17 = vsel %vm1710_vm4, %v2844_v3, 0.0  ;;  %v3360_v29 = vpop.f32.mrb[6].mxu1 }
 0x307   : > { %v2880_v30 = vadd.f32 %v2879_v17, %v2878_v34  ;;  %v2783_v63 = vsel %vm1710_vm4, %v3360_v29, 0.0  ;;  %v2468_v0 = vpop.f32.mrb[7].mxu1  ;;  %v2847_v14 = vmul.f32 %v3360_v29, %v3360_v29  ;;  %v2780_v33 = vadd.f32 %v2779_v55, %v2778_v26 }
 0x308   : > { %v2781_v35 = vsel %vm1710_vm4, %v2468_v0, 0.0  ;;  %v2846_v32 = vmul.f32 %v2468_v0, %v2468_v0 }
 0x309   : > { %v2882_v27 = vadd.f32 %v2881_v28, %v2880_v30  ;;  %v2782_v19 = vadd.f32 %v2781_v35, %v2780_v33  ;;  %v2885_v9 = vsel %vm1710_vm4, %v2847_v14, 0.0 }
 0x30a   : > { %v2883_v36 = vsel %vm1710_vm4, %v2846_v32, 0.0 }
 0x30b   : > { %v2884_v5 = vadd.f32 %v2883_v36, %v2882_v27  ;;  %v2784_v50 = vadd.f32 %v2783_v63, %v2782_v19 }
 0x30d   : > { %v3363_v22 = vpop.f32.mrb[8].mxu1  ;;  %v2886_v58 = vadd.f32 %v2885_v9, %v2884_v5 }
 0x30e   : > { %v2849_v46 = vmul.f32 %v3363_v22, %v3363_v22  ;;  %v2478_v21 = vpop.f32.mrb[9].mxu1  ;;  %v2787_v42 = vsel %vm1710_vm4, %v3363_v22, 0.0 }
 0x30f   : > { %v2785_v45 = vsel %vm1710_vm4, %v2478_v21, 0.0 }
 0x310   : > { %v2889_v49 = vsel %vm1710_vm4, %v2849_v46, 0.0 }
 0x311   : > { %v3366_v41 = vpop.f32.mrb[10].mxu1 }
 0x312   : > { %v2851_v60 = vmul.f32 %v3366_v41, %v3366_v41  ;;  %v2488_v6 = vpop.f32.mrb[11].mxu1  ;;  %v2791_v8 = vsel %vm1710_vm4, %v3366_v41, 0.0 }
 0x313   : > { %v2789_v43 = vsel %vm1710_vm4, %v2488_v6, 0.0  ;;  %v2850_v37 = vmul.f32 %v2488_v6, %v2488_v6 }
 0x314   : > { %v2893_v47 = vsel %vm1710_vm4, %v2851_v60, 0.0 }
 0x315   : > { %v3322_v7 = vpop.f32.mrb[14].mxu0  ;;  %v2891_v38 = vsel %vm1710_vm4, %v2850_v37, 0.0 }
 0x316   : > { %v2683_v40 = vmul.f32 %v3322_v7, %v3322_v7  ;;  %2957 = vst.msk [vmem:[%s5130_s27 + $0x78] sm:$0xff] %vm1710_vm4, %v3322_v7  ;;  %v2183_v52 = vpop.f32.mrb[15].mxu0  ;;  %v2626_v51 = vsel %vm1710_vm4, %v3322_v7, 0.0  ;;  %v3369_v24 = vpop.f32.mrb[12].mxu1 }
 0x317   : > { %v2624_v44 = vsel %vm1710_vm4, %v2183_v52, 0.0  ;;  %v2682_v15 = vmul.f32 %v2183_v52, %v2183_v52  ;;  %2956 = vst.msk [vmem:[%s5130_s27 + $0x70] sm:$0xff] %vm1710_vm4, %v2183_v52  ;;  %v2853_v59 = vmul.f32 %v3369_v24, %v3369_v24  ;;  %v2498_v39 = vpop.f32.mrb[13].mxu1  ;;  %v2795_v11 = vsel %vm1710_vm4, %v3369_v24, 0.0 }
 0x318   : > { %v2625_v18 = vadd.f32 %v2624_v44, %v2623_v54  ;;  %v2729_v12 = vsel %vm1710_vm4, %v2683_v40, 0.0  ;;  %v2848_v54 = vmul.f32 %v2478_v21, %v2478_v21  ;;  %v2793_v10 = vsel %vm1710_vm4, %v2498_v39, 0.0 }
 0x319   : > { %v2727_v61 = vsel %vm1710_vm4, %v2682_v15, 0.0  ;;  %v2852_v48 = vmul.f32 %v2498_v39, %v2498_v39  ;;  %v2897_v40 = vsel %vm1710_vm4, %v2853_v59, 0.0 }
 0x31a   : > { %v2728_v4 = vadd.f32 %v2727_v61, %v2726_v62  ;;  %v5345_v31 = vadd.f32 %v2626_v51, %v2625_v18  ;;  %v2786_v62 = vadd.f32 %v2785_v45, %v2784_v50  ;;  %v2887_v25 = vsel %vm1710_vm4, %v2848_v54, 0.0  ;;  %v3372_v3 = vpop.f32.mrb[14].mxu1 }
 0x31b   : > { %v2888_v23 = vadd.f32 %v2887_v25, %v2886_v58  ;;  %v2895_v57 = vsel %vm1710_vm4, %v2852_v48, 0.0  ;;  %v2508_v52 = vpop.f32.mrb[15].mxu1  ;;  %v2799_v15 = vsel %vm1710_vm4, %v3372_v3, 0.0  ;;  %v2855_v26 = vmul.f32 %v3372_v3, %v3372_v3 }
 0x31c   : > { %v5348_v13 = vadd.f32 %v2729_v12, %v2728_v4  ;;  %v2788_v2 = vadd.f32 %v2787_v42, %v2786_v62  ;;  %v2797_v34 = vsel %vm1710_vm4, %v2508_v52, 0.0  ;;  %v2854_v44 = vmul.f32 %v2508_v52, %v2508_v52 }
 0x31d   : > { %v2890_v20 = vadd.f32 %v2889_v49, %v2888_v23  ;;  %v2901_v30 = vsel %vm1710_vm4, %v2855_v26, 0.0 }
 0x31e   : > { %v2790_v56 = vadd.f32 %v2789_v43, %v2788_v2  ;;  %v2899_v51 = vsel %vm1710_vm4, %v2854_v44, 0.0  ;;  %v3375_v18 = vpop.f32.mrb[16].mxu1 }
 0x31f   : > { %v2892_v16 = vadd.f32 %v2891_v38, %v2890_v20  ;;  %v2857_v63 = vmul.f32 %v3375_v18, %v3375_v18  ;;  %v2518_v0 = vpop.f32.mrb[17].mxu1  ;;  %v2803_v19 = vsel %vm1710_vm4, %v3375_v18, 0.0 }
 0x320   : > { %v2792_v1 = vadd.f32 %v2791_v8, %v2790_v56  ;;  %v2801_v35 = vsel %vm1710_vm4, %v2518_v0, 0.0  ;;  %v2856_v4 = vmul.f32 %v2518_v0, %v2518_v0 }
 0x321   : > { %v2894_v53 = vadd.f32 %v2893_v47, %v2892_v16  ;;  %v2905_v50 = vsel %vm1710_vm4, %v2857_v63, 0.0 }
 0x322   : > { %v2794_v7 = vadd.f32 %v2793_v10, %v2792_v1  ;;  %v3378_v21 = vpop.f32.mrb[18].mxu1  ;;  %v2903_v45 = vsel %vm1710_vm4, %v2856_v4, 0.0 }
 0x323   : > { %v2896_v55 = vadd.f32 %v2895_v57, %v2894_v53  ;;  %v2807_v54 = vsel %vm1710_vm4, %v3378_v21, 0.0  ;;  %v2528_v42 = vpop.f32.mrb[19].mxu1  ;;  %v2859_v25 = vmul.f32 %v3378_v21, %v3378_v21 }
 0x324   : > { %v2796_v28 = vadd.f32 %v2795_v11, %v2794_v7  ;;  %v2805_v6 = vsel %vm1710_vm4, %v2528_v42, 0.0  ;;  %v2858_v23 = vmul.f32 %v2528_v42, %v2528_v42 }
 0x325   : > { %v2898_v29 = vadd.f32 %v2897_v40, %v2896_v55  ;;  %v2909_v56 = vsel %vm1710_vm4, %v2859_v25, 0.0 }
 0x326   : > { %v2798_v17 = vadd.f32 %v2797_v34, %v2796_v28  ;;  %v3381_v37 = vpop.f32.mrb[20].mxu1  ;;  %v2907_v20 = vsel %vm1710_vm4, %v2858_v23, 0.0 }
 0x327   : > { %v2900_v14 = vadd.f32 %v2899_v51, %v2898_v29  ;;  %v2861_v38 = vmul.f32 %v3381_v37, %v3381_v37  ;;  %v2538_v24 = vpop.f32.mrb[21].mxu1  ;;  %v2811_v16 = vsel %vm1710_vm4, %v3381_v37, 0.0 }
 0x328   : > { %v2800_v33 = vadd.f32 %v2799_v15, %v2798_v17  ;;  %v2809_v59 = vsel %vm1710_vm4, %v2538_v24, 0.0  ;;  %v2860_v39 = vmul.f32 %v2538_v24, %v2538_v24 }
 0x329   : > { %v2902_v46 = vadd.f32 %v2901_v30, %v2900_v14  ;;  %v2913_v7 = vsel %vm1710_vm4, %v2861_v38, 0.0 }
 0x32a   : > { %v2802_v36 = vadd.f32 %v2801_v35, %v2800_v33  ;;  %v2911_v48 = vsel %vm1710_vm4, %v2860_v39, 0.0  ;;  %v3384_v11 = vpop.f32.mrb[22].mxu1 }
 0x32b   : > { %v2904_v58 = vadd.f32 %v2903_v45, %v2902_v46  ;;  %v2863_v53 = vmul.f32 %v3384_v11, %v3384_v11  ;;  %v2548_v57 = vpop.f32.mrb[23].mxu1  ;;  %v2815_v28 = vsel %vm1710_vm4, %v3384_v11, 0.0 }
 0x32c   : > { %v2804_v41 = vadd.f32 %v2803_v19, %v2802_v36  ;;  %v2813_v52 = vsel %vm1710_vm4, %v2548_v57, 0.0  ;;  %v2862_v55 = vmul.f32 %v2548_v57, %v2548_v57 }
 0x32d   : > { %v3325_v61 = vpop.f32.mrb[16].mxu0  ;;  %v2906_v43 = vadd.f32 %v2905_v50, %v2904_v58  ;;  %v2917_v17 = vsel %vm1710_vm4, %v2863_v53, 0.0 }
 0x32e   : > { %v2630_v32 = vsel %vm1710_vm4, %v3325_v61, 0.0  ;;  %v2685_v27 = vmul.f32 %v3325_v61, %v3325_v61  ;;  %2959 = vst.msk [vmem:[%s5130_s27 + $0x88] sm:$0xff] %vm1710_vm4, %v3325_v61  ;;  %v2193_v12 = vpop.f32.mrb[17].mxu0  ;;  %v2806_v2 = vadd.f32 %v2805_v6, %v2804_v41  ;;  %v2915_v15 = vsel %vm1710_vm4, %v2862_v55, 0.0  ;;  %v3387_v26 = vpop.f32.mrb[24].mxu1 }
 0x32f   : > { %v2628_v22 = vsel %vm1710_vm4, %v2193_v12, 0.0  ;;  %v2684_v9 = vmul.f32 %v2193_v12, %v2193_v12  ;;  %2958 = vst.msk [vmem:[%s5130_s27 + $0x80] sm:$0xff] %vm1710_vm4, %v2193_v12  ;;  %v2908_v47 = vadd.f32 %v2907_v20, %v2906_v43  ;;  %v2865_v29 = vmul.f32 %v3387_v26, %v3387_v26  ;;  %v2558_v51 = vpop.f32.mrb[25].mxu1 }
 0x330   : > { %v2629_v5 = vadd.f32 %v2628_v22, %v5345_v31  ;;  %v2733_v31 = vsel %vm1710_vm4, %v2685_v27, 0.0  ;;  %v2817_v63 = vsel %vm1710_vm4, %v2558_v51, 0.0  ;;  %v2864_v0 = vmul.f32 %v2558_v51, %v2558_v51 }
 0x331   : > { %v2731_v62 = vsel %vm1710_vm4, %v2684_v9, 0.0  ;;  %v2910_v10 = vadd.f32 %v2909_v56, %v2908_v47  ;;  %v2819_v61 = vsel %vm1710_vm4, %v3387_v26, 0.0 }
 0x332   : > { %v2732_v49 = vadd.f32 %v2731_v62, %v5348_v13  ;;  %v5382_v60 = vadd.f32 %v2630_v32, %v2629_v5  ;;  %v2808_v13 = vadd.f32 %v2807_v54, %v2806_v2  ;;  %v2919_v35 = vsel %vm1710_vm4, %v2864_v0, 0.0  ;;  %v3390_v4 = vpop.f32.mrb[26].mxu1 }
 0x333   : > { %v2912_v3 = vadd.f32 %v2911_v48, %v2910_v10  ;;  %v2921_v32 = vsel %vm1710_vm4, %v2865_v29, 0.0  ;;  %v2568_v27 = vpop.f32.mrb[27].mxu1  ;;  %v2823_v36 = vsel %vm1710_vm4, %v3390_v4, 0.0  ;;  %v2867_v46 = vmul.f32 %v3390_v4, %v3390_v4 }
 0x334   : > { %v5386_v8 = vadd.f32 %v2733_v31, %v2732_v49  ;;  %v2810_v1 = vadd.f32 %v2809_v59, %v2808_v13  ;;  %v2821_v22 = vsel %vm1710_vm4, %v2568_v27, 0.0  ;;  %v2866_v9 = vmul.f32 %v2568_v27, %v2568_v27 }
 0x335   : > { %v2914_v44 = vadd.f32 %v2913_v7, %v2912_v3  ;;  %v2925_v54 = vsel %vm1710_vm4, %v2867_v46, 0.0 }
 0x336   : > { %v2812_v40 = vadd.f32 %v2811_v16, %v2810_v1  ;;  %v2923_v50 = vsel %vm1710_vm4, %v2866_v9, 0.0  ;;  %v3393_v45 = vpop.f32.mrb[28].mxu1 }
 0x337   : > { %v2916_v18 = vadd.f32 %v2915_v15, %v2914_v44  ;;  %v2869_v42 = vmul.f32 %v3393_v45, %v3393_v45  ;;  %v2578_v62 = vpop.f32.mrb[29].mxu1  ;;  %v2827_v43 = vsel %vm1710_vm4, %v3393_v45, 0.0 }
 0x338   : > { %v2814_v34 = vadd.f32 %v2813_v52, %v2812_v40  ;;  %v2825_v49 = vsel %vm1710_vm4, %v2578_v62, 0.0  ;;  %v2868_v6 = vmul.f32 %v2578_v62, %v2578_v62 }
 0x339   : > { %v2918_v33 = vadd.f32 %v2917_v17, %v2916_v18  ;;  %v2929_v13 = vsel %vm1710_vm4, %v2869_v42, 0.0 }
 0x33a   : > { %v2816_v30 = vadd.f32 %v2815_v28, %v2814_v34  ;;  %v3396_v24 = vpop.f32.mrb[30].mxu1  ;;  %v2927_v59 = vsel %vm1710_vm4, %v2868_v6, 0.0 }
 0x33b   : > { %v2920_v12 = vadd.f32 %v2919_v35, %v2918_v33  ;;  %v2831_v39 = vsel %vm1710_vm4, %v3396_v24, 0.0  ;;  %v2588_v16 = vpop.f32.mrb[31].mxu1  ;;  %v2871_v48 = vmul.f32 %v3396_v24, %v3396_v24 }
 0x33c   : > { %v2818_v14 = vadd.f32 %v2817_v63, %v2816_v30  ;;  %v2829_v57 = vsel %vm1710_vm4, %v2588_v16, 0.0  ;;  %v2870_v3 = vmul.f32 %v2588_v16, %v2588_v16 }
 0x33d   : > { %v2922_v5 = vadd.f32 %v2921_v32, %v2920_v12  ;;  %v2933_v28 = vsel %vm1710_vm4, %v2871_v48, 0.0 }
 0x33e   : > { %v2820_v19 = vadd.f32 %v2819_v61, %v2818_v14  ;;  %v2931_v34 = vsel %vm1710_vm4, %v2870_v3, 0.0 }
 0x33f   : > { %v2924_v25 = vadd.f32 %v2923_v50, %v2922_v5 }
 0x340   : > { %v2822_v21 = vadd.f32 %v2821_v22, %v2820_v19 }
 0x341   : > { %v2926_v38 = vadd.f32 %v2925_v54, %v2924_v25 }
 0x342   : > { %v2824_v41 = vadd.f32 %v2823_v36, %v2822_v21 }
 0x343   : > { %v2928_v10 = vadd.f32 %v2927_v59, %v2926_v38 }
 0x344   : > { %v2826_v20 = vadd.f32 %v2825_v49, %v2824_v41 }
 0x345   : > { %v3328_v58 = vpop.f32.mrb[18].mxu0  ;;  %v2930_v52 = vadd.f32 %v2929_v13, %v2928_v10 }
 0x346   : > { %v2634_v23 = vsel %vm1710_vm4, %v3328_v58, 0.0  ;;  %v2687_v31 = vmul.f32 %v3328_v58, %v3328_v58  ;;  %2961 = vst.msk [vmem:[%s5130_s27 + $0x98] sm:$0xff] %vm1710_vm4, %v3328_v58  ;;  %v2203_v2 = vpop.f32.mrb[19].mxu0  ;;  %v2828_v11 = vadd.f32 %v2827_v43, %v2826_v20 }
 0x347   : > { %v2632_v37 = vsel %vm1710_vm4, %v2203_v2, 0.0  ;;  %v2686_v56 = vmul.f32 %v2203_v2, %v2203_v2  ;;  %2960 = vst.msk [vmem:[%s5130_s27 + $0x90] sm:$0xff] %vm1710_vm4, %v2203_v2  ;;  %v2932_v15 = vadd.f32 %v2931_v34, %v2930_v52 }
 0x348   : > { %v2633_v47 = vadd.f32 %v2632_v37, %v5382_v60  ;;  %v2737_v60 = vsel %vm1710_vm4, %v2687_v31, 0.0  ;;  %v2830_v40 = vadd.f32 %v2829_v57, %v2828_v11 }
 0x349   : > { %v2735_v1 = vsel %vm1710_vm4, %v2686_v56, 0.0  ;;  %v2934_v17 = vadd.f32 %v2933_v28, %v2932_v15 }
 0x34a   : > { %v2736_v7 = vadd.f32 %v2735_v1, %v5386_v8  ;;  %v2635_v53 = vadd.f32 %v2634_v23, %v2633_v47  ;;  %v2832_v44 = vadd.f32 %v2831_v39, %v2830_v40 }
 0x34b   : > { %v2935_v8 = vrot.slane %v2934_v17, 4 }
 0x34c   : > { %v2738_v55 = vadd.f32 %v2737_v60, %v2736_v7  ;;  %v2833_v26 = vrot.slane %v2832_v44, 4 }
 0x34d   : > { %v2936_v18 = vadd.f32 %v2935_v8, %v2934_v17 }
 0x34e   : > { %v2834_v29 = vadd.f32 %v2833_v26, %v2832_v44 }
 0x34f   : > { %v2937_v63 = vrot.slane %v2936_v18, 2 }
 0x350   : > { %v2835_v51 = vrot.slane %v2834_v29, 2 }
 0x351   : > { %v2938_v61 = vadd.f32 %v2937_v63, %v2936_v18 }
 0x352   : > { %v2836_v30 = vadd.f32 %v2835_v51, %v2834_v29 }
 0x353   : > { %v2939_v33 = vrot.slane %v2938_v61, 1 }
 0x354   : > { %v2837_v0 = vrot.slane %v2836_v30, 1 }
 0x355   : > { %v2940_v35 = vadd.f32 %v2939_v33, %v2938_v61 }
 0x356   : > { %v2838_v14 = vadd.f32 %v2837_v0, %v2836_v30 }
 0x357   : > { %2941 = vst.msk [vmem:[%s5425_s29 + $0x3] sm:$0x1] %vm2666_vm12, %v2940_v35 }
 0x358   : > { %2839 = vst.msk [vmem:[%s5425_s29 + $0x2] sm:$0x1] %vm2666_vm12, %v2838_v14 }
 0x35d   : > { %v3331_v4 = vpop.f32.mrb[20].mxu0 }
 0x35e   : > { %2963 = vst.msk [vmem:[%s5130_s27 + $0xa8] sm:$0xff] %vm1710_vm4, %v3331_v4  ;;  %v2213_v32 = vpop.f32.mrb[21].mxu0  ;;  %v2689_v27 = vmul.f32 %v3331_v4, %v3331_v4  ;;  %v2638_v9 = vsel %vm1710_vm4, %v3331_v4, 0.0 }
 0x35f   : > { %v2636_v12 = vsel %vm1710_vm4, %v2213_v32, 0.0  ;;  %v2688_v19 = vmul.f32 %v2213_v32, %v2213_v32  ;;  %2962 = vst.msk [vmem:[%s5130_s27 + $0xa0] sm:$0xff] %vm1710_vm4, %v2213_v32 }
 0x360   : > { %v2637_v22 = vadd.f32 %v2636_v12, %v2635_v53  ;;  %v2741_v5 = vsel %vm1710_vm4, %v2689_v27, 0.0 }
 0x361   : > { %v2739_v36 = vsel %vm1710_vm4, %v2688_v19, 0.0 }
 0x362   : > { %v2740_v46 = vadd.f32 %v2739_v36, %v2738_v55  ;;  %v2639_v21 = vadd.f32 %v2638_v9, %v2637_v22 }
 0x364   : > { %v2742_v50 = vadd.f32 %v2741_v5, %v2740_v46 }
 0x375   : > { %v3334_v45 = vpop.f32.mrb[22].mxu0 }
 0x376   : > { %2965 = vst.msk [vmem:[%s5130_s27 + $0xb8] sm:$0xff] %vm1710_vm4, %v3334_v45  ;;  %v2223_v54 = vpop.f32.mrb[23].mxu0  ;;  %v2691_v42 = vmul.f32 %v3334_v45, %v3334_v45  ;;  %v2642_v41 = vsel %vm1710_vm4, %v3334_v45, 0.0 }
 0x377   : > { %v2640_v62 = vsel %vm1710_vm4, %v2223_v54, 0.0  ;;  %v2690_v58 = vmul.f32 %v2223_v54, %v2223_v54  ;;  %2964 = vst.msk [vmem:[%s5130_s27 + $0xb0] sm:$0xff] %vm1710_vm4, %v2223_v54 }
 0x378   : > { %v2641_v25 = vadd.f32 %v2640_v62, %v2639_v21  ;;  %v2745_v31 = vsel %vm1710_vm4, %v2691_v42, 0.0 }
 0x379   : > { %v2743_v49 = vsel %vm1710_vm4, %v2690_v58, 0.0 }
 0x37a   : > { %v2744_v6 = vadd.f32 %v2743_v49, %v2742_v50  ;;  %v2643_v23 = vadd.f32 %v2642_v41, %v2641_v25 }
 0x37c   : > { %v2746_v2 = vadd.f32 %v2745_v31, %v2744_v6 }
 0x38d   : > { %v3337_v43 = vpop.f32.mrb[24].mxu0 }
 0x38e   : > { %2967 = vst.msk [vmem:[%s5130_s27 + $0xc8] sm:$0xff] %vm1710_vm4, %v3337_v43  ;;  %v2233_v37 = vpop.f32.mrb[25].mxu0  ;;  %v2693_v56 = vmul.f32 %v3337_v43, %v3337_v43  ;;  %v2646_v47 = vsel %vm1710_vm4, %v3337_v43, 0.0 }
 0x38f   : > { %v2644_v20 = vsel %vm1710_vm4, %v2233_v37, 0.0  ;;  %v2692_v38 = vmul.f32 %v2233_v37, %v2233_v37  ;;  %2966 = vst.msk [vmem:[%s5130_s27 + $0xc0] sm:$0xff] %vm1710_vm4, %v2233_v37 }
 0x390   : > { %v2645_v24 = vadd.f32 %v2644_v20, %v2643_v23  ;;  %v2749_v16 = vsel %vm1710_vm4, %v2693_v56, 0.0 }
 0x391   : > { %v2747_v13 = vsel %vm1710_vm4, %v2692_v38, 0.0 }
 0x392   : > { %v2748_v59 = vadd.f32 %v2747_v13, %v2746_v2  ;;  %v2647_v39 = vadd.f32 %v2646_v47, %v2645_v24 }
 0x394   : > { %v2750_v1 = vadd.f32 %v2749_v16, %v2748_v59 }
 0x3a5   : > { %v3340_v10 = vpop.f32.mrb[26].mxu0 }
 0x3a6   : > { %2969 = vst.msk [vmem:[%s5130_s27 + $0xd8] sm:$0xff] %vm1710_vm4, %v3340_v10  ;;  %v2243_v48 = vpop.f32.mrb[27].mxu0  ;;  %v2695_v11 = vmul.f32 %v3340_v10, %v3340_v10  ;;  %v2650_v3 = vsel %vm1710_vm4, %v3340_v10, 0.0 }
 0x3a7   : > { %v2648_v7 = vsel %vm1710_vm4, %v2243_v48, 0.0  ;;  %v2694_v53 = vmul.f32 %v2243_v48, %v2243_v48  ;;  %2968 = vst.msk [vmem:[%s5130_s27 + $0xd0] sm:$0xff] %vm1710_vm4, %v2243_v48 }
 0x3a8   : > { %v2649_v57 = vadd.f32 %v2648_v7, %v2647_v39  ;;  %v2753_v55 = vsel %vm1710_vm4, %v2695_v11, 0.0 }
 0x3a9   : > { %v2751_v60 = vsel %vm1710_vm4, %v2694_v53, 0.0 }
 0x3aa   : > { %v2752_v40 = vadd.f32 %v2751_v60, %v2750_v1  ;;  %v2651_v52 = vadd.f32 %v2650_v3, %v2649_v57 }
 0x3ac   : > { %v2754_v28 = vadd.f32 %v2753_v55, %v2752_v40 }
 0x3bd   : > { %v3343_v34 = vpop.f32.mrb[28].mxu0 }
 0x3be   : > { %2971 = vst.msk [vmem:[%s5130_s27 + $0xe8] sm:$0xff] %vm1710_vm4, %v3343_v34  ;;  %v2253_v44 = vpop.f32.mrb[29].mxu0  ;;  %v2697_v15 = vmul.f32 %v3343_v34, %v3343_v34  ;;  %v2654_v8 = vsel %vm1710_vm4, %v3343_v34, 0.0 }
 0x3bf   : > { %v2652_v26 = vsel %vm1710_vm4, %v2253_v44, 0.0  ;;  %v2696_v17 = vmul.f32 %v2253_v44, %v2253_v44  ;;  %2970 = vst.msk [vmem:[%s5130_s27 + $0xe0] sm:$0xff] %vm1710_vm4, %v2253_v44 }
 0x3c0   : > { %v2653_v29 = vadd.f32 %v2652_v26, %v2651_v52  ;;  %v2757_v63 = vsel %vm1710_vm4, %v2697_v15, 0.0 }
 0x3c1   : > { %v2755_v51 = vsel %vm1710_vm4, %v2696_v17, 0.0 }
 0x3c2   : > { %v2756_v18 = vadd.f32 %v2755_v51, %v2754_v28  ;;  %v2655_v30 = vadd.f32 %v2654_v8, %v2653_v29 }
 0x3c4   : > { %v2758_v0 = vadd.f32 %v2757_v63, %v2756_v18 }
 0x3d0   : > { %v3346_v61 = vpop.f32.mrb[30].mxu0 }
 0x3d1   : > { %2973 = vst.msk [vmem:[%s5130_s27 + $0xf8] sm:$0xff] %vm1710_vm4, %v3346_v61  ;;  %v2263_v14 = vpop.f32.mrb[31].mxu0  ;;  %v2699_v33 = vmul.f32 %v3346_v61, %v3346_v61 }
 0x3d2   : > { %v2656_v35 = vsel %vm1710_vm4, %v2263_v14, 0.0  ;;  %v2698_v4 = vmul.f32 %v2263_v14, %v2263_v14  ;;  %2972 = vst.msk [vmem:[%s5130_s27 + $0xf0] sm:$0xff] %vm1710_vm4, %v2263_v14 }
 0x3d3   : > { %v2657_v32 = vadd.f32 %v2656_v35, %v2655_v30 }
 0x3d4   : > { %3588 = shalt.err (!%p3585_p1)
}
 0x3d5   : > { %s3589_s7 = scalar_lea.hbm %s5476_s25, 4096  ;;  %s3593_s20 = scalar_lea.hbm %s5569_s3, 8192 }
 0x3d6   : > { %p3590_p13 = scmp.ne.s32.totalorder %s5476_s25, %s3589_s7  ;;  %p3594_p4 = scmp.lt.u32.totalorder %s5476_s25, %s5569_s3 }
 0x3d7   : > { %p3595_p5 = scmp.lt.u32.totalorder %s3593_s20, %s3589_s7  ;;  %p3597_p11 = scmp.lt.u32.totalorder %s3589_s7, %s5476_s25 }
 0x3d8   : > { %p3591_p6 = pnand %p3590_p13, %p5775_p0 }
 0x3d9   : > { %p3596_p8 = por %p3595_p5, %p3594_p4 }
 0x3da   : > { %p3592_p10 = pneg %p3591_p6 }
 0x3db   : > { %p3598_p2 = por %p3597_p11, %p3596_p8 }
 0x3dd   : > { %p3599_p3 = pnand %p3598_p2, %p3592_p10 }
 0x3df   : > { %3602 = shalt.err (!%p3599_p3)
}
 0x3e0   : > { %s3694_s24 = smov 128   ;;  %v2658_v27 = vsel %vm1710_vm4, %v3346_v61, 0.0  ;;  %v2759_v12 = vsel %vm1710_vm4, %v2698_v4, 0.0  ;;  %v2761_v9 = vsel %vm1710_vm4, %v2699_v33, 0.0  ;;  %s2980_s12 = scalar_lea.sflag [#allocation11], %s3899_s8 }
 0x3e1   : > { %3415 = dma.vmem_to_hbm [thread:$0]  (%p5775_p0), %s5478_s26, 4096, %s5476_s25, %s2975_s21, %s3694_s24, %s3694_s24, %s3686_s23   ;;  %v2659_v19 = vadd.f32 %v2658_v27, %v2657_v32  ;;  %v2760_v22 = vadd.f32 %v2759_v12, %v2758_v0 }
 0x3e2   : > { %s3214_s23 = sshll.u32 %s3742_s19, 6  ;;  %s3009_s26 = sshll.u32 %s5425_s29, 4  ;;  %s5522_s26 = int_to_ptr.vmem [resolvable:$true] %s3009_s26 }
 0x3e3   : > { %v2660_v36 = vrot.slane %v2659_v19, 4  ;;  %v2762_v46 = vadd.f32 %v2761_v9, %v2760_v22  ;;  %s5520_s11 = scalar_lea.hbm %s5570_s4, %s3214_s23  ;;  %s3603_s19 = scalar_lea.vmem %s5522_s26, 64 }
 0x3e4   : > { %p3604_p7 = scmp.ne.s32.totalorder %s5522_s26, %s3603_s19  ;;  %s3695_s30 = smov [#allocation10]  }
 0x3e5   : > { %v2661_v21 = vadd.f32 %v2660_v36, %v2659_v19  ;;  %v2763_v5 = vrot.slane %v2762_v46, 4  ;;  %s3607_s6 = sshll.u32 %s3695_s30, 4  ;;  %s3608_s6 = int_to_ptr.vmem [resolvable:$false] %s3607_s6 }
 0x3e6   : > { %p3605_p9 = pnand %p3604_p7, %p5775_p0  ;;  %s3609_s7 = scalar_lea.vmem %s3608_s6, 128 }
 0x3e7   : > { %v2662_v50 = vrot.slane %v2661_v21, 2  ;;  %v2764_v45 = vadd.f32 %v2763_v5, %v2762_v46  ;;  %p3610_p1 = scmp.lt.s32.totalorder %s5522_s26, %s3608_s6  ;;  %p3611_p13 = scmp.lt.s32.totalorder %s3609_s7, %s3603_s19 }
 0x3e8   : > { %p3606_p12 = pneg %p3605_p9 }
 0x3e9   : > { %v2663_v54 = vadd.f32 %v2662_v50, %v2661_v21  ;;  %v2765_v42 = vrot.slane %v2764_v45, 2  ;;  %p3612_p6 = por %p3611_p13, %p3610_p1 }
 0x3eb   : > { %v2664_v62 = vrot.slane %v2663_v54, 1  ;;  %v2766_v58 = vadd.f32 %v2765_v42, %v2764_v45  ;;  %p3613_p10 = pnand %p3612_p6, %p3606_p12 }
 0x3ed   : > { %v2665_v25 = vadd.f32 %v2664_v62, %v2663_v54  ;;  %v2767_v41 = vrot.slane %v2766_v58, 1 }
 0x3ef   : > { %v2768_v49 = vadd.f32 %v2767_v41, %v2766_v58  ;;  %2667 = vst.msk [vmem:[%s5425_s29] sm:$0x1] %vm2666_vm12, %v2665_v25 }
 0x3f1   : > { %2769 = vst.msk [vmem:[%s5425_s29 + $0x1] sm:$0x1] %vm2666_vm12, %v2768_v49 }
 0x3f2   : > { %3616 = shalt.err (!%p3613_p10)
}
 0x3f3   : > { %s3617_s8 = scalar_lea.hbm %s5520_s11, 64  ;;  %s3621_s27 = scalar_lea.hbm %s5570_s4, 128 }
 0x3f4   : > { %p3618_p4 = scmp.ne.s32.totalorder %s5520_s11, %s3617_s8  ;;  %p3622_p11 = scmp.lt.u32.totalorder %s5520_s11, %s5570_s4 }
 0x3f5   : > { %p3623_p2 = scmp.lt.u32.totalorder %s3621_s27, %s3617_s8  ;;  %p3625_p7 = scmp.lt.u32.totalorder %s3617_s8, %s5520_s11 }
 0x3f6   : > { %p3619_p5 = pnand %p3618_p4, %p5775_p0 }
 0x3f7   : > { %p3624_p3 = por %p3623_p2, %p3622_p11 }
 0x3f8   : > { %p3620_p8 = pneg %p3619_p5 }
 0x3f9   : > { %p3626_p9 = por %p3625_p7, %p3624_p3 }
 0x3fb   : > { %p3627_p12 = pnand %p3626_p9, %p3620_p8 }
 0x3fd   : > { %3630 = shalt.err (!%p3627_p12)
}
 0x3fe   : > { %3416 = dma.vmem_to_hbm [thread:$0]  (%p5775_p0), %s5522_s26, 64, %s5520_s11, %s2980_s12  }
 0x3ff PF: > { %s3021_s10 = sand.u32 1, %s3665_s15   ;;  %p5776_p1 = scmp.ne.s32.totalorder %s5608_s22, 0 }
 0x400   : > { %p5777_p13 = scmp.ge.s32.totalorder %s3677_s18, 2  ;;  %s3022_s24 = scalar_lea.sflag [#allocation5], %s3021_s10 }
 0x402   : > { %p3431_p6 = pnand %p5777_p13, %p5776_p1 }
 0x404   : > { %3656 = dma.done.wait (!%p3431_p6), %s3022_s24, 4096  }
 0x405   : > { %3658 = vsyncadd (!%p3431_p6), %s3022_s24, 4294963200  ;;  %s3031_s23 = scalar_lea.sflag [#allocation11], %s3021_s10 }
 0x406   : > { %3660 = dma.done.wait (!%p3431_p6), %s3031_s23, 64  }
 0x407   : > { %3662 = vsyncadd (!%p3431_p6), %s3031_s23, 4294967232  ;;  %p22_p0 = scmp.ge.s32.totalorder %s3834_s9, 4   ;;  %s5778_s15 = smov %s3669_s16 }
 0x408   : > { %s5779_s16 = smov %s3673_s17  ;;  %s5780_s17 = smov %s3850_s14 }
 0x409   : > { %s5781_s18 = smov %s3834_s9  ;;  %24 = sbr.rel (!%p22_p0) target bundleno = 8 (0x8), region = 105 }
 0x410   :  { %3036 = vsyncpa [#allocation4], 1 }
 0x411   :  { %3038 = vsyncpa [#allocation4 + $0x1], 1 }
 0x412   :  { %3039 = vsyncpa [#allocation7], 1 }
 0x413   :  { %3040 = vsyncpa [#allocation5], 1 }
 0x414   :  { %3042 = vsyncpa [#allocation5 + $0x1], 1 }
 0x415   :  { %3043 = vsyncpa [#allocation11], 1 }
 0x416   :  { %3045 = vsyncpa [#allocation11 + $0x1], 1 }

</bundles_post_ra>
